<compile_context>
chip_gen: v7x
topology: tpu7x:2x2x1
jax: 0.10.0
libtpu: 0.0.40
codegen_flags: <defaults>
</compile_context>

<pallas_src>
import functools

import jax
import jax.numpy as jnp
from jax import lax
from jax.experimental import pallas as pl
from jax.experimental.pallas import tpu as pltpu


def _round_up(x, m):
    return (x + m - 1) // m * m


def _lstm_kernel(x_ref, wih_ref, whh_ref, b_ref, wlin_ref, blin_ref, out_ref,
                 h_ref, c_ref, *, seq_len, t_chunk, hidden_pad):
    """One grid step = one (batch shard, time chunk).

    x_ref    : (bB, tT, I)   batch-first input chunk (streamed / pipelined)
    wih_ref  : (I,  4*Hp)    input->gate weights, gate-padded   (resident)
    whh_ref  : (Hp, 4*Hp)    hidden->gate weights, gate-padded  (resident)
    b_ref    : (1,  4*Hp)    b_ih + b_hh, gate-padded           (resident)
    wlin_ref : (Hp, Op)      head weights                       (resident)
    blin_ref : (1,  Op)      head bias                          (resident)
    out_ref  : (bB, Op)      sigmoid(head(h_T))   (written on last time chunk)
    h_ref/c_ref : (bB, Hp)   recurrent state, persists across the time grid
    """
    t_idx = pl.program_id(1)
    n_t = pl.num_programs(1)
    bB, tT, in_dim = x_ref.shape
    Hp = hidden_pad

    @pl.when(t_idx == 0)
    def _init():
        h_ref[...] = jnp.zeros_like(h_ref)
        c_ref[...] = jnp.zeros_like(c_ref)

    # ---- hoisted input projection: one MXU matmul for the whole chunk ----
    x_blk = x_ref[...]                                        # (bB, tT, I)
    xg = jnp.dot(x_blk.reshape(bB * tT, in_dim), wih_ref[...],
                 preferred_element_type=jnp.float32)          # (bB*tT, 4Hp)
    xg = xg + b_ref[...]                                      # fold bias once
    xg = xg.reshape(bB, tT, 4 * Hp)

    whh = whh_ref[...]
    h = h_ref[...]
    c = c_ref[...]

    needs_mask = (seq_len % t_chunk) != 0   # static: only if T was padded

    # ---- statically unrolled serial recurrence over the chunk ----
    for k in range(t_chunk):
        gates = xg[:, k, :] + jnp.dot(h.astype(whh.dtype), whh,
                                      preferred_element_type=jnp.float32)
        i_g = jax.nn.sigmoid(gates[:, 0 * Hp:1 * Hp])
        f_g = jax.nn.sigmoid(gates[:, 1 * Hp:2 * Hp])
        g_g = jnp.tanh(gates[:, 2 * Hp:3 * Hp])
        o_g = jax.nn.sigmoid(gates[:, 3 * Hp:4 * Hp])
        c_new = f_g * c + i_g * g_g
        h_new = o_g * jnp.tanh(c_new)
        if needs_mask:
            valid = (t_idx * t_chunk + k) < seq_len
            h = jnp.where(valid, h_new, h)
            c = jnp.where(valid, c_new, c)
        else:
            h, c = h_new, c_new

    h_ref[...] = h
    c_ref[...] = c

    # ---- head: Linear(H -> O) + sigmoid, only after the last time chunk ----
    @pl.when(t_idx == n_t - 1)
    def _head():
        logits = jnp.dot(h_ref[...], wlin_ref[...],
                         preferred_element_type=jnp.float32) + blin_ref[...]
        out_ref[...] = jax.nn.sigmoid(logits)


def _pad_gate_weight(w, H, Hp):
    """PyTorch (4H, X) [gate order i,f,g,o] -> (X, 4*Hp), per-gate zero-padded
    columns so every gate occupies a lane-aligned 128-multiple panel."""
    X = w.shape[1]
    w4 = w.reshape(4, H, X)
    w4 = jnp.pad(w4, ((0, 0), (0, Hp - H), (0, 0)))           # (4, Hp, X)
    return jnp.transpose(w4, (2, 0, 1)).reshape(X, 4 * Hp)    # (X, 4*Hp)


def rnn_lstm_forward(x, params, *, t_chunk=8, matmul_dtype=jnp.float32):
    """x: (B, T, I) batch-first float32 (matches the PyTorch call convention)."""
    w_ih, w_hh, b_ih, b_hh, w_lin, b_lin = params
    B, T, I = x.shape
    H = w_hh.shape[1]             # PyTorch w_hh is (4H, H)
    O = w_lin.shape[0]

    Hp = _round_up(H, 128)        # lane-align every gate panel
    Op = _round_up(O, 128)        # lane-dense output stores
    Bp = _round_up(max(B, 8), 8)  # full f32 sublanes
    tT = min(t_chunk, T)          # t_chunk should be a multiple of 8 (or >= T)
    Tp = _round_up(T, tT)

    # batch shard size (>= 8, divides Bp); gives v7x a 2-TC "parallel" axis.
    bB = min(Bp, 128)
    while Bp % bB:
        bB -= 8

    # ---- one-time weight layout transforms (tiny, off the hot path) ----
    f32 = jnp.float32
    wih_t = _pad_gate_weight(w_ih.astype(f32), H, Hp).astype(matmul_dtype)  # (I, 4Hp)
    whh_t = _pad_gate_weight(w_hh.astype(f32), H, Hp)                       # (H, 4Hp)
    whh_t = jnp.pad(whh_t, ((0, Hp - H), (0, 0))).astype(matmul_dtype)      # (Hp, 4Hp)
    bias = jnp.pad((b_ih + b_hh).astype(f32).reshape(4, H),
                   ((0, 0), (0, Hp - H))).reshape(1, 4 * Hp)                # (1, 4Hp)
    wlin_t = jnp.pad(jnp.transpose(w_lin.astype(f32)),
                     ((0, Hp - H), (0, Op - O)))                            # (Hp, Op)
    blin = jnp.pad(b_lin.astype(f32), (0, Op - O)).reshape(1, Op)           # (1, Op)

    # x stays batch-first; zero-pad batch/time only when not already aligned.
    xp = x.astype(matmul_dtype)
    if (Bp, Tp) != (B, T):
        xp = jnp.pad(xp, ((0, Bp - B), (0, Tp - T), (0, 0)))

    grid = (Bp // bB, Tp // tT)
    kernel = functools.partial(_lstm_kernel, seq_len=T, t_chunk=tT,
                               hidden_pad=Hp)

    out = pl.pallas_call(
        kernel,
        out_shape=jax.ShapeDtypeStruct((Bp, Op), jnp.float32),
        grid_spec=pltpu.PrefetchScalarGridSpec(
            num_scalar_prefetch=0,
            grid=grid,
            in_specs=[
                pl.BlockSpec((bB, tT, I), lambda b, t: (b, t, 0)),   # x chunk
                pl.BlockSpec((I, 4 * Hp), lambda b, t: (0, 0)),      # W_ih
                pl.BlockSpec((Hp, 4 * Hp), lambda b, t: (0, 0)),     # W_hh
                pl.BlockSpec((1, 4 * Hp), lambda b, t: (0, 0)),      # bias
                pl.BlockSpec((Hp, Op), lambda b, t: (0, 0)),         # W_lin
                pl.BlockSpec((1, Op), lambda b, t: (0, 0)),          # b_lin
            ],
            out_specs=pl.BlockSpec((bB, Op), lambda b, t: (b, 0)),
            scratch_shapes=[pltpu.VMEM((bB, Hp), jnp.float32),       # h state
                            pltpu.VMEM((bB, Hp), jnp.float32)],      # c state
        ),
        compiler_params=pltpu.CompilerParams(
            dimension_semantics=("parallel", "arbitrary")),
    )(xp, wih_t, whh_t, bias, wlin_t, blin)

    return out[:B, :O]


def init_params(key, input_size, hidden, output_size=1):
    """Deterministic PyTorch-style init: U(-1/sqrt(H), 1/sqrt(H))."""
    k = 1.0 / jnp.sqrt(jnp.float32(hidden))
    ks = jax.random.split(key, 6)
    u = lambda kk, shape: jax.random.uniform(kk, shape, jnp.float32, -k, k)
    w_ih = u(ks[0], (4 * hidden, input_size))
    w_hh = u(ks[1], (4 * hidden, hidden))
    b_ih = u(ks[2], (4 * hidden,))
    b_hh = u(ks[3], (4 * hidden,))
    w_lin = u(ks[4], (output_size, hidden))
    b_lin = u(ks[5], (output_size,))
    return (w_ih, w_hh, b_ih, b_hh, w_lin, b_lin)


def rnn_lstm_reference(x_btI, params):
    """Pure-JAX reference of the same forward pass (for verification)."""
    w_ih, w_hh, b_ih, b_hh, w_lin, b_lin = params
    B, T, I = x_btI.shape
    H = w_hh.shape[1]

    def step(carry, x_t):
        h, c = carry
        gates = x_t @ w_ih.T + b_ih + h @ w_hh.T + b_hh
        i_g = jax.nn.sigmoid(gates[:, 0 * H:1 * H])
        f_g = jax.nn.sigmoid(gates[:, 1 * H:2 * H])
        g_g = jnp.tanh(gates[:, 2 * H:3 * H])
        o_g = jax.nn.sigmoid(gates[:, 3 * H:4 * H])
        c_new = f_g * c + i_g * g_g
        h_new = o_g * jnp.tanh(c_new)
        return (h_new, c_new), None

    h0 = jnp.zeros((B, H), jnp.float32)
    c0 = jnp.zeros((B, H), jnp.float32)
    (h_final, _), _ = lax.scan(step, (h0, c0), jnp.transpose(x_btI, (1, 0, 2)))
    return jax.nn.sigmoid(h_final @ w_lin.T + b_lin)


if __name__ == "__main__":
    B, T, I, H, O = 2, 32, 8, 16, 1
    key = jax.random.PRNGKey(0)
    k_x, k_p = jax.random.split(key)
    x = jax.random.normal(k_x, (B, T, I), jnp.float32)
    params = init_params(k_p, input_size=I, hidden=H, output_size=O)

    out = jax.block_until_ready(rnn_lstm_forward(x, params))
    ref = jax.block_until_ready(rnn_lstm_reference(x, params))

    assert out.shape == (B, O)
    assert jnp.allclose(out, ref, atol=2e-5, rtol=2e-5), (out, ref)
    print("KERNEL_OK")
</pallas_src>

<mosaic_0001>
module attributes {stable_mosaic.version = 11 : i64} {
  func.func @_lstm_kernel(%arg0: i32, %arg1: i32, %arg2: memref<8x8x8xf32, #tpu.memory_space<vmem>>, %arg3: memref<8x512xf32, #tpu.memory_space<vmem>>, %arg4: memref<128x512xf32, #tpu.memory_space<vmem>>, %arg5: memref<1x512xf32, #tpu.memory_space<vmem>>, %arg6: memref<128x128xf32, #tpu.memory_space<vmem>>, %arg7: memref<1x128xf32, #tpu.memory_space<vmem>>, %arg8: memref<8x128xf32, #tpu.memory_space<vmem>>, %arg9: memref<8x128xf32, #tpu.memory_space<vmem>>, %arg10: memref<8x128xf32, #tpu.memory_space<vmem>>) attributes {dimension_semantics = [#tpu.dimension_semantics<parallel>, #tpu.dimension_semantics<arbitrary>], iteration_bounds = array<i64: 1, 4>, scalar_prefetch = 0 : i64, scratch_operands = 2 : i64, tpu.core_type = #tpu.core_type<tc>, window_params = [{transform_indices = @transform_0, window_bounds = array<i64: 8, 8, 8>}, {pipeline_mode = #tpu.pipeline_mode<synchronous>, transform_indices = @transform_1, window_bounds = array<i64: 8, 512>}, {pipeline_mode = #tpu.pipeline_mode<synchronous>, transform_indices = @transform_2, window_bounds = array<i64: 128, 512>}, {pipeline_mode = #tpu.pipeline_mode<synchronous>, transform_indices = @transform_3, window_bounds = array<i64: 1, 512>}, {pipeline_mode = #tpu.pipeline_mode<synchronous>, transform_indices = @transform_4, window_bounds = array<i64: 128, 128>}, {pipeline_mode = #tpu.pipeline_mode<synchronous>, transform_indices = @transform_5, window_bounds = array<i64: 1, 128>}, {transform_indices = @transform_6, window_bounds = array<i64: 8, 128>}]} {
    %c0_i32 = arith.constant 0 : i32
    %0 = arith.cmpi eq, %arg1, %c0_i32 : i32
    %1 = arith.extui %0 : i1 to i32
    %c0_i32_0 = arith.constant 0 : i32
    %2 = arith.cmpi ne, %1, %c0_i32_0 : i32
    scf.if %2 {
      %cst_50 = arith.constant 0.000000e+00 : f32
      %251 = vector.broadcast %cst_50 : f32 to vector<8x128xf32>
      %c0_51 = arith.constant 0 : index
      %c0_52 = arith.constant 0 : index
      %252 = vector.load %arg9[%c0_51, %c0_52] : memref<8x128xf32, #tpu.memory_space<vmem>>, vector<8x128xf32>
      tpu.vector_store %arg9[%c0_51, %c0_52], %251 {strides = array<i32>} : memref<8x128xf32, #tpu.memory_space<vmem>>, vector<8x128xf32>,
      %cst_53 = arith.constant 0.000000e+00 : f32
      %253 = vector.broadcast %cst_53 : f32 to vector<8x128xf32>
      %c0_54 = arith.constant 0 : index
      %c0_55 = arith.constant 0 : index
      %254 = vector.load %arg10[%c0_54, %c0_55] : memref<8x128xf32, #tpu.memory_space<vmem>>, vector<8x128xf32>
      tpu.vector_store %arg10[%c0_54, %c0_55], %253 {strides = array<i32>} : memref<8x128xf32, #tpu.memory_space<vmem>>, vector<8x128xf32>,
    } else {
    }
    %c0 = arith.constant 0 : index
    %c0_1 = arith.constant 0 : index
    %c0_2 = arith.constant 0 : index
    %3 = vector.load %arg2[%c0, %c0_1, %c0_2] : memref<8x8x8xf32, #tpu.memory_space<vmem>>, vector<8x8x8xf32>
    %4 = vector.shape_cast %3 : vector<8x8x8xf32> to vector<64x8xf32>
    %c0_3 = arith.constant 0 : index
    %c0_4 = arith.constant 0 : index
    %5 = vector.load %arg3[%c0_3, %c0_4] : memref<8x512xf32, #tpu.memory_space<vmem>>, vector<8x512xf32>
    %cst = arith.constant dense<0.000000e+00> : vector<64x512xf32>
    %6 = tpu.matmul %4, %5, %cst {dimension_numbers = #tpu.dot_dimension_numbers<[1], [0], [0], [1], [0, 0, 1, 1], [], []>} : vector<64x8xf32>, vector<8x512xf32>, vector<64x512xf32> -> vector<64x512xf32>
    %c0_5 = arith.constant 0 : index
    %c0_6 = arith.constant 0 : index
    %7 = vector.load %arg5[%c0_5, %c0_6] : memref<1x512xf32, #tpu.memory_space<vmem>>, vector<1x512xf32>
    %8 = vector.broadcast %7 : vector<1x512xf32> to vector<64x512xf32>
    %9 = arith.addf %6, %8 : vector<64x512xf32>
    %10 = vector.shape_cast %9 : vector<64x512xf32> to vector<8x8x512xf32>
    %c0_7 = arith.constant 0 : index
    %c0_8 = arith.constant 0 : index
    %11 = vector.load %arg4[%c0_7, %c0_8] : memref<128x512xf32, #tpu.memory_space<vmem>>, vector<128x512xf32>
    %c0_9 = arith.constant 0 : index
    %c0_10 = arith.constant 0 : index
    %12 = vector.load %arg9[%c0_9, %c0_10] : memref<8x128xf32, #tpu.memory_space<vmem>>, vector<8x128xf32>
    %c0_11 = arith.constant 0 : index
    %c0_12 = arith.constant 0 : index
    %13 = vector.load %arg10[%c0_11, %c0_12] : memref<8x128xf32, #tpu.memory_space<vmem>>, vector<8x128xf32>
    %14 = vector.extract_strided_slice %10 {offsets = [0, 0, 0], sizes = [8, 1, 512], strides = [1, 1, 1]} : vector<8x8x512xf32> to vector<8x1x512xf32>
    %15 = vector.shape_cast %14 : vector<8x1x512xf32> to vector<8x512xf32>
    %cst_13 = arith.constant dense<0.000000e+00> : vector<8x512xf32>
    %16 = tpu.matmul %12, %11, %cst_13 {dimension_numbers = #tpu.dot_dimension_numbers<[1], [0], [0], [1], [0, 0, 1, 1], [], []>} : vector<8x128xf32>, vector<128x512xf32>, vector<8x512xf32> -> vector<8x512xf32>
    %17 = arith.addf %15, %16 : vector<8x512xf32>
    %18 = vector.extract_strided_slice %17 {offsets = [0, 0], sizes = [8, 128], strides = [1, 1]} : vector<8x512xf32> to vector<8x128xf32>
    %19 = arith.negf %18 : vector<8x128xf32>
    %20 = math.exp %19 : vector<8x128xf32>
    %cst_14 = arith.constant 1.000000e+00 : f32
    %21 = vector.broadcast %cst_14 : f32 to vector<8x128xf32>
    %22 = arith.addf %21, %20 : vector<8x128xf32>
    %23 = arith.divf %21, %22 : vector<8x128xf32>
    %24 = vector.extract_strided_slice %17 {offsets = [0, 128], sizes = [8, 128], strides = [1, 1]} : vector<8x512xf32> to vector<8x128xf32>
    %25 = arith.negf %24 : vector<8x128xf32>
    %26 = math.exp %25 : vector<8x128xf32>
    %cst_15 = arith.constant 1.000000e+00 : f32
    %27 = vector.broadcast %cst_15 : f32 to vector<8x128xf32>
    %28 = arith.addf %27, %26 : vector<8x128xf32>
    %29 = arith.divf %27, %28 : vector<8x128xf32>
    %30 = vector.extract_strided_slice %17 {offsets = [0, 256], sizes = [8, 128], strides = [1, 1]} : vector<8x512xf32> to vector<8x128xf32>
    %31 = math.tanh %30 : vector<8x128xf32>
    %32 = vector.extract_strided_slice %17 {offsets = [0, 384], sizes = [8, 128], strides = [1, 1]} : vector<8x512xf32> to vector<8x128xf32>
    %33 = arith.negf %32 : vector<8x128xf32>
    %34 = math.exp %33 : vector<8x128xf32>
    %cst_16 = arith.constant 1.000000e+00 : f32
    %35 = vector.broadcast %cst_16 : f32 to vector<8x128xf32>
    %36 = arith.addf %35, %34 : vector<8x128xf32>
    %37 = arith.divf %35, %36 : vector<8x128xf32>
    %38 = arith.mulf %29, %13 : vector<8x128xf32>
    %39 = arith.mulf %23, %31 : vector<8x128xf32>
    %40 = arith.addf %38, %39 : vector<8x128xf32>
    %41 = math.tanh %40 : vector<8x128xf32>
    %42 = arith.mulf %37, %41 : vector<8x128xf32>
    %43 = vector.extract_strided_slice %10 {offsets = [0, 1, 0], sizes = [8, 1, 512], strides = [1, 1, 1]} : vector<8x8x512xf32> to vector<8x1x512xf32>
    %44 = vector.shape_cast %43 : vector<8x1x512xf32> to vector<8x512xf32>
    %cst_17 = arith.constant dense<0.000000e+00> : vector<8x512xf32>
    %45 = tpu.matmul %42, %11, %cst_17 {dimension_numbers = #tpu.dot_dimension_numbers<[1], [0], [0], [1], [0, 0, 1, 1], [], []>} : vector<8x128xf32>, vector<128x512xf32>, vector<8x512xf32> -> vector<8x512xf32>
    %46 = arith.addf %44, %45 : vector<8x512xf32>
    %47 = vector.extract_strided_slice %46 {offsets = [0, 0], sizes = [8, 128], strides = [1, 1]} : vector<8x512xf32> to vector<8x128xf32>
    %48 = arith.negf %47 : vector<8x128xf32>
    %49 = math.exp %48 : vector<8x128xf32>
    %cst_18 = arith.constant 1.000000e+00 : f32
    %50 = vector.broadcast %cst_18 : f32 to vector<8x128xf32>
    %51 = arith.addf %50, %49 : vector<8x128xf32>
    %52 = arith.divf %50, %51 : vector<8x128xf32>
    %53 = vector.extract_strided_slice %46 {offsets = [0, 128], sizes = [8, 128], strides = [1, 1]} : vector<8x512xf32> to vector<8x128xf32>
    %54 = arith.negf %53 : vector<8x128xf32>
    %55 = math.exp %54 : vector<8x128xf32>
    %cst_19 = arith.constant 1.000000e+00 : f32
    %56 = vector.broadcast %cst_19 : f32 to vector<8x128xf32>
    %57 = arith.addf %56, %55 : vector<8x128xf32>
    %58 = arith.divf %56, %57 : vector<8x128xf32>
    %59 = vector.extract_strided_slice %46 {offsets = [0, 256], sizes = [8, 128], strides = [1, 1]} : vector<8x512xf32> to vector<8x128xf32>
    %60 = math.tanh %59 : vector<8x128xf32>
    %61 = vector.extract_strided_slice %46 {offsets = [0, 384], sizes = [8, 128], strides = [1, 1]} : vector<8x512xf32> to vector<8x128xf32>
    %62 = arith.negf %61 : vector<8x128xf32>
    %63 = math.exp %62 : vector<8x128xf32>
    %cst_20 = arith.constant 1.000000e+00 : f32
    %64 = vector.broadcast %cst_20 : f32 to vector<8x128xf32>
    %65 = arith.addf %64, %63 : vector<8x128xf32>
    %66 = arith.divf %64, %65 : vector<8x128xf32>
    %67 = arith.mulf %58, %40 : vector<8x128xf32>
    %68 = arith.mulf %52, %60 : vector<8x128xf32>
    %69 = arith.addf %67, %68 : vector<8x128xf32>
    %70 = math.tanh %69 : vector<8x128xf32>
    %71 = arith.mulf %66, %70 : vector<8x128xf32>
    %72 = vector.extract_strided_slice %10 {offsets = [0, 2, 0], sizes = [8, 1, 512], strides = [1, 1, 1]} : vector<8x8x512xf32> to vector<8x1x512xf32>
    %73 = vector.shape_cast %72 : vector<8x1x512xf32> to vector<8x512xf32>
    %cst_21 = arith.constant dense<0.000000e+00> : vector<8x512xf32>
    %74 = tpu.matmul %71, %11, %cst_21 {dimension_numbers = #tpu.dot_dimension_numbers<[1], [0], [0], [1], [0, 0, 1, 1], [], []>} : vector<8x128xf32>, vector<128x512xf32>, vector<8x512xf32> -> vector<8x512xf32>
    %75 = arith.addf %73, %74 : vector<8x512xf32>
    %76 = vector.extract_strided_slice %75 {offsets = [0, 0], sizes = [8, 128], strides = [1, 1]} : vector<8x512xf32> to vector<8x128xf32>
    %77 = arith.negf %76 : vector<8x128xf32>
    %78 = math.exp %77 : vector<8x128xf32>
    %cst_22 = arith.constant 1.000000e+00 : f32
    %79 = vector.broadcast %cst_22 : f32 to vector<8x128xf32>
    %80 = arith.addf %79, %78 : vector<8x128xf32>
    %81 = arith.divf %79, %80 : vector<8x128xf32>
    %82 = vector.extract_strided_slice %75 {offsets = [0, 128], sizes = [8, 128], strides = [1, 1]} : vector<8x512xf32> to vector<8x128xf32>
    %83 = arith.negf %82 : vector<8x128xf32>
    %84 = math.exp %83 : vector<8x128xf32>
    %cst_23 = arith.constant 1.000000e+00 : f32
    %85 = vector.broadcast %cst_23 : f32 to vector<8x128xf32>
    %86 = arith.addf %85, %84 : vector<8x128xf32>
    %87 = arith.divf %85, %86 : vector<8x128xf32>
    %88 = vector.extract_strided_slice %75 {offsets = [0, 256], sizes = [8, 128], strides = [1, 1]} : vector<8x512xf32> to vector<8x128xf32>
    %89 = math.tanh %88 : vector<8x128xf32>
    %90 = vector.extract_strided_slice %75 {offsets = [0, 384], sizes = [8, 128], strides = [1, 1]} : vector<8x512xf32> to vector<8x128xf32>
    %91 = arith.negf %90 : vector<8x128xf32>
    %92 = math.exp %91 : vector<8x128xf32>
    %cst_24 = arith.constant 1.000000e+00 : f32
    %93 = vector.broadcast %cst_24 : f32 to vector<8x128xf32>
    %94 = arith.addf %93, %92 : vector<8x128xf32>
    %95 = arith.divf %93, %94 : vector<8x128xf32>
    %96 = arith.mulf %87, %69 : vector<8x128xf32>
    %97 = arith.mulf %81, %89 : vector<8x128xf32>
    %98 = arith.addf %96, %97 : vector<8x128xf32>
    %99 = math.tanh %98 : vector<8x128xf32>
    %100 = arith.mulf %95, %99 : vector<8x128xf32>
    %101 = vector.extract_strided_slice %10 {offsets = [0, 3, 0], sizes = [8, 1, 512], strides = [1, 1, 1]} : vector<8x8x512xf32> to vector<8x1x512xf32>
    %102 = vector.shape_cast %101 : vector<8x1x512xf32> to vector<8x512xf32>
    %cst_25 = arith.constant dense<0.000000e+00> : vector<8x512xf32>
    %103 = tpu.matmul %100, %11, %cst_25 {dimension_numbers = #tpu.dot_dimension_numbers<[1], [0], [0], [1], [0, 0, 1, 1], [], []>} : vector<8x128xf32>, vector<128x512xf32>, vector<8x512xf32> -> vector<8x512xf32>
    %104 = arith.addf %102, %103 : vector<8x512xf32>
    %105 = vector.extract_strided_slice %104 {offsets = [0, 0], sizes = [8, 128], strides = [1, 1]} : vector<8x512xf32> to vector<8x128xf32>
    %106 = arith.negf %105 : vector<8x128xf32>
    %107 = math.exp %106 : vector<8x128xf32>
    %cst_26 = arith.constant 1.000000e+00 : f32
    %108 = vector.broadcast %cst_26 : f32 to vector<8x128xf32>
    %109 = arith.addf %108, %107 : vector<8x128xf32>
    %110 = arith.divf %108, %109 : vector<8x128xf32>
    %111 = vector.extract_strided_slice %104 {offsets = [0, 128], sizes = [8, 128], strides = [1, 1]} : vector<8x512xf32> to vector<8x128xf32>
    %112 = arith.negf %111 : vector<8x128xf32>
    %113 = math.exp %112 : vector<8x128xf32>
    %cst_27 = arith.constant 1.000000e+00 : f32
    %114 = vector.broadcast %cst_27 : f32 to vector<8x128xf32>
    %115 = arith.addf %114, %113 : vector<8x128xf32>
    %116 = arith.divf %114, %115 : vector<8x128xf32>
    %117 = vector.extract_strided_slice %104 {offsets = [0, 256], sizes = [8, 128], strides = [1, 1]} : vector<8x512xf32> to vector<8x128xf32>
    %118 = math.tanh %117 : vector<8x128xf32>
    %119 = vector.extract_strided_slice %104 {offsets = [0, 384], sizes = [8, 128], strides = [1, 1]} : vector<8x512xf32> to vector<8x128xf32>
    %120 = arith.negf %119 : vector<8x128xf32>
    %121 = math.exp %120 : vector<8x128xf32>
    %cst_28 = arith.constant 1.000000e+00 : f32
    %122 = vector.broadcast %cst_28 : f32 to vector<8x128xf32>
    %123 = arith.addf %122, %121 : vector<8x128xf32>
    %124 = arith.divf %122, %123 : vector<8x128xf32>
    %125 = arith.mulf %116, %98 : vector<8x128xf32>
    %126 = arith.mulf %110, %118 : vector<8x128xf32>
    %127 = arith.addf %125, %126 : vector<8x128xf32>
    %128 = math.tanh %127 : vector<8x128xf32>
    %129 = arith.mulf %124, %128 : vector<8x128xf32>
    %130 = vector.extract_strided_slice %10 {offsets = [0, 4, 0], sizes = [8, 1, 512], strides = [1, 1, 1]} : vector<8x8x512xf32> to vector<8x1x512xf32>
    %131 = vector.shape_cast %130 : vector<8x1x512xf32> to vector<8x512xf32>
    %cst_29 = arith.constant dense<0.000000e+00> : vector<8x512xf32>
    %132 = tpu.matmul %129, %11, %cst_29 {dimension_numbers = #tpu.dot_dimension_numbers<[1], [0], [0], [1], [0, 0, 1, 1], [], []>} : vector<8x128xf32>, vector<128x512xf32>, vector<8x512xf32> -> vector<8x512xf32>
    %133 = arith.addf %131, %132 : vector<8x512xf32>
    %134 = vector.extract_strided_slice %133 {offsets = [0, 0], sizes = [8, 128], strides = [1, 1]} : vector<8x512xf32> to vector<8x128xf32>
    %135 = arith.negf %134 : vector<8x128xf32>
    %136 = math.exp %135 : vector<8x128xf32>
    %cst_30 = arith.constant 1.000000e+00 : f32
    %137 = vector.broadcast %cst_30 : f32 to vector<8x128xf32>
    %138 = arith.addf %137, %136 : vector<8x128xf32>
    %139 = arith.divf %137, %138 : vector<8x128xf32>
    %140 = vector.extract_strided_slice %133 {offsets = [0, 128], sizes = [8, 128], strides = [1, 1]} : vector<8x512xf32> to vector<8x128xf32>
    %141 = arith.negf %140 : vector<8x128xf32>
    %142 = math.exp %141 : vector<8x128xf32>
    %cst_31 = arith.constant 1.000000e+00 : f32
    %143 = vector.broadcast %cst_31 : f32 to vector<8x128xf32>
    %144 = arith.addf %143, %142 : vector<8x128xf32>
    %145 = arith.divf %143, %144 : vector<8x128xf32>
    %146 = vector.extract_strided_slice %133 {offsets = [0, 256], sizes = [8, 128], strides = [1, 1]} : vector<8x512xf32> to vector<8x128xf32>
    %147 = math.tanh %146 : vector<8x128xf32>
    %148 = vector.extract_strided_slice %133 {offsets = [0, 384], sizes = [8, 128], strides = [1, 1]} : vector<8x512xf32> to vector<8x128xf32>
    %149 = arith.negf %148 : vector<8x128xf32>
    %150 = math.exp %149 : vector<8x128xf32>
    %cst_32 = arith.constant 1.000000e+00 : f32
    %151 = vector.broadcast %cst_32 : f32 to vector<8x128xf32>
    %152 = arith.addf %151, %150 : vector<8x128xf32>
    %153 = arith.divf %151, %152 : vector<8x128xf32>
    %154 = arith.mulf %145, %127 : vector<8x128xf32>
    %155 = arith.mulf %139, %147 : vector<8x128xf32>
    %156 = arith.addf %154, %155 : vector<8x128xf32>
    %157 = math.tanh %156 : vector<8x128xf32>
    %158 = arith.mulf %153, %157 : vector<8x128xf32>
    %159 = vector.extract_strided_slice %10 {offsets = [0, 5, 0], sizes = [8, 1, 512], strides = [1, 1, 1]} : vector<8x8x512xf32> to vector<8x1x512xf32>
    %160 = vector.shape_cast %159 : vector<8x1x512xf32> to vector<8x512xf32>
    %cst_33 = arith.constant dense<0.000000e+00> : vector<8x512xf32>
    %161 = tpu.matmul %158, %11, %cst_33 {dimension_numbers = #tpu.dot_dimension_numbers<[1], [0], [0], [1], [0, 0, 1, 1], [], []>} : vector<8x128xf32>, vector<128x512xf32>, vector<8x512xf32> -> vector<8x512xf32>
    %162 = arith.addf %160, %161 : vector<8x512xf32>
    %163 = vector.extract_strided_slice %162 {offsets = [0, 0], sizes = [8, 128], strides = [1, 1]} : vector<8x512xf32> to vector<8x128xf32>
    %164 = arith.negf %163 : vector<8x128xf32>
    %165 = math.exp %164 : vector<8x128xf32>
    %cst_34 = arith.constant 1.000000e+00 : f32
    %166 = vector.broadcast %cst_34 : f32 to vector<8x128xf32>
    %167 = arith.addf %166, %165 : vector<8x128xf32>
    %168 = arith.divf %166, %167 : vector<8x128xf32>
    %169 = vector.extract_strided_slice %162 {offsets = [0, 128], sizes = [8, 128], strides = [1, 1]} : vector<8x512xf32> to vector<8x128xf32>
    %170 = arith.negf %169 : vector<8x128xf32>
    %171 = math.exp %170 : vector<8x128xf32>
    %cst_35 = arith.constant 1.000000e+00 : f32
    %172 = vector.broadcast %cst_35 : f32 to vector<8x128xf32>
    %173 = arith.addf %172, %171 : vector<8x128xf32>
    %174 = arith.divf %172, %173 : vector<8x128xf32>
    %175 = vector.extract_strided_slice %162 {offsets = [0, 256], sizes = [8, 128], strides = [1, 1]} : vector<8x512xf32> to vector<8x128xf32>
    %176 = math.tanh %175 : vector<8x128xf32>
    %177 = vector.extract_strided_slice %162 {offsets = [0, 384], sizes = [8, 128], strides = [1, 1]} : vector<8x512xf32> to vector<8x128xf32>
    %178 = arith.negf %177 : vector<8x128xf32>
    %179 = math.exp %178 : vector<8x128xf32>
    %cst_36 = arith.constant 1.000000e+00 : f32
    %180 = vector.broadcast %cst_36 : f32 to vector<8x128xf32>
    %181 = arith.addf %180, %179 : vector<8x128xf32>
    %182 = arith.divf %180, %181 : vector<8x128xf32>
    %183 = arith.mulf %174, %156 : vector<8x128xf32>
    %184 = arith.mulf %168, %176 : vector<8x128xf32>
    %185 = arith.addf %183, %184 : vector<8x128xf32>
    %186 = math.tanh %185 : vector<8x128xf32>
    %187 = arith.mulf %182, %186 : vector<8x128xf32>
    %188 = vector.extract_strided_slice %10 {offsets = [0, 6, 0], sizes = [8, 1, 512], strides = [1, 1, 1]} : vector<8x8x512xf32> to vector<8x1x512xf32>
    %189 = vector.shape_cast %188 : vector<8x1x512xf32> to vector<8x512xf32>
    %cst_37 = arith.constant dense<0.000000e+00> : vector<8x512xf32>
    %190 = tpu.matmul %187, %11, %cst_37 {dimension_numbers = #tpu.dot_dimension_numbers<[1], [0], [0], [1], [0, 0, 1, 1], [], []>} : vector<8x128xf32>, vector<128x512xf32>, vector<8x512xf32> -> vector<8x512xf32>
    %191 = arith.addf %189, %190 : vector<8x512xf32>
    %192 = vector.extract_strided_slice %191 {offsets = [0, 0], sizes = [8, 128], strides = [1, 1]} : vector<8x512xf32> to vector<8x128xf32>
    %193 = arith.negf %192 : vector<8x128xf32>
    %194 = math.exp %193 : vector<8x128xf32>
    %cst_38 = arith.constant 1.000000e+00 : f32
    %195 = vector.broadcast %cst_38 : f32 to vector<8x128xf32>
    %196 = arith.addf %195, %194 : vector<8x128xf32>
    %197 = arith.divf %195, %196 : vector<8x128xf32>
    %198 = vector.extract_strided_slice %191 {offsets = [0, 128], sizes = [8, 128], strides = [1, 1]} : vector<8x512xf32> to vector<8x128xf32>
    %199 = arith.negf %198 : vector<8x128xf32>
    %200 = math.exp %199 : vector<8x128xf32>
    %cst_39 = arith.constant 1.000000e+00 : f32
    %201 = vector.broadcast %cst_39 : f32 to vector<8x128xf32>
    %202 = arith.addf %201, %200 : vector<8x128xf32>
    %203 = arith.divf %201, %202 : vector<8x128xf32>
    %204 = vector.extract_strided_slice %191 {offsets = [0, 256], sizes = [8, 128], strides = [1, 1]} : vector<8x512xf32> to vector<8x128xf32>
    %205 = math.tanh %204 : vector<8x128xf32>
    %206 = vector.extract_strided_slice %191 {offsets = [0, 384], sizes = [8, 128], strides = [1, 1]} : vector<8x512xf32> to vector<8x128xf32>
    %207 = arith.negf %206 : vector<8x128xf32>
    %208 = math.exp %207 : vector<8x128xf32>
    %cst_40 = arith.constant 1.000000e+00 : f32
    %209 = vector.broadcast %cst_40 : f32 to vector<8x128xf32>
    %210 = arith.addf %209, %208 : vector<8x128xf32>
    %211 = arith.divf %209, %210 : vector<8x128xf32>
    %212 = arith.mulf %203, %185 : vector<8x128xf32>
    %213 = arith.mulf %197, %205 : vector<8x128xf32>
    %214 = arith.addf %212, %213 : vector<8x128xf32>
    %215 = math.tanh %214 : vector<8x128xf32>
    %216 = arith.mulf %211, %215 : vector<8x128xf32>
    %217 = vector.extract_strided_slice %10 {offsets = [0, 7, 0], sizes = [8, 1, 512], strides = [1, 1, 1]} : vector<8x8x512xf32> to vector<8x1x512xf32>
    %218 = vector.shape_cast %217 : vector<8x1x512xf32> to vector<8x512xf32>
    %cst_41 = arith.constant dense<0.000000e+00> : vector<8x512xf32>
    %219 = tpu.matmul %216, %11, %cst_41 {dimension_numbers = #tpu.dot_dimension_numbers<[1], [0], [0], [1], [0, 0, 1, 1], [], []>} : vector<8x128xf32>, vector<128x512xf32>, vector<8x512xf32> -> vector<8x512xf32>
    %220 = arith.addf %218, %219 : vector<8x512xf32>
    %221 = vector.extract_strided_slice %220 {offsets = [0, 0], sizes = [8, 128], strides = [1, 1]} : vector<8x512xf32> to vector<8x128xf32>
    %222 = arith.negf %221 : vector<8x128xf32>
    %223 = math.exp %222 : vector<8x128xf32>
    %cst_42 = arith.constant 1.000000e+00 : f32
    %224 = vector.broadcast %cst_42 : f32 to vector<8x128xf32>
    %225 = arith.addf %224, %223 : vector<8x128xf32>
    %226 = arith.divf %224, %225 : vector<8x128xf32>
    %227 = vector.extract_strided_slice %220 {offsets = [0, 128], sizes = [8, 128], strides = [1, 1]} : vector<8x512xf32> to vector<8x128xf32>
    %228 = arith.negf %227 : vector<8x128xf32>
    %229 = math.exp %228 : vector<8x128xf32>
    %cst_43 = arith.constant 1.000000e+00 : f32
    %230 = vector.broadcast %cst_43 : f32 to vector<8x128xf32>
    %231 = arith.addf %230, %229 : vector<8x128xf32>
    %232 = arith.divf %230, %231 : vector<8x128xf32>
    %233 = vector.extract_strided_slice %220 {offsets = [0, 256], sizes = [8, 128], strides = [1, 1]} : vector<8x512xf32> to vector<8x128xf32>
    %234 = math.tanh %233 : vector<8x128xf32>
    %235 = vector.extract_strided_slice %220 {offsets = [0, 384], sizes = [8, 128], strides = [1, 1]} : vector<8x512xf32> to vector<8x128xf32>
    %236 = arith.negf %235 : vector<8x128xf32>
    %237 = math.exp %236 : vector<8x128xf32>
    %cst_44 = arith.constant 1.000000e+00 : f32
    %238 = vector.broadcast %cst_44 : f32 to vector<8x128xf32>
    %239 = arith.addf %238, %237 : vector<8x128xf32>
    %240 = arith.divf %238, %239 : vector<8x128xf32>
    %241 = arith.mulf %232, %214 : vector<8x128xf32>
    %242 = arith.mulf %226, %234 : vector<8x128xf32>
    %243 = arith.addf %241, %242 : vector<8x128xf32>
    %244 = math.tanh %243 : vector<8x128xf32>
    %245 = arith.mulf %240, %244 : vector<8x128xf32>
    %c0_45 = arith.constant 0 : index
    %c0_46 = arith.constant 0 : index
    %246 = vector.load %arg9[%c0_45, %c0_46] : memref<8x128xf32, #tpu.memory_space<vmem>>, vector<8x128xf32>
    tpu.vector_store %arg9[%c0_45, %c0_46], %245 {strides = array<i32>} : memref<8x128xf32, #tpu.memory_space<vmem>>, vector<8x128xf32>,
    %c0_47 = arith.constant 0 : index
    %c0_48 = arith.constant 0 : index
    %247 = vector.load %arg10[%c0_47, %c0_48] : memref<8x128xf32, #tpu.memory_space<vmem>>, vector<8x128xf32>
    tpu.vector_store %arg10[%c0_47, %c0_48], %243 {strides = array<i32>} : memref<8x128xf32, #tpu.memory_space<vmem>>, vector<8x128xf32>,
    %c3_i32 = arith.constant 3 : i32
    %248 = arith.cmpi eq, %arg1, %c3_i32 : i32
    %249 = arith.extui %248 : i1 to i32
    %c0_i32_49 = arith.constant 0 : i32
    %250 = arith.cmpi ne, %249, %c0_i32_49 : i32
    scf.if %250 {
      %c0_50 = arith.constant 0 : index
      %c0_51 = arith.constant 0 : index
      %251 = vector.load %arg9[%c0_50, %c0_51] : memref<8x128xf32, #tpu.memory_space<vmem>>, vector<8x128xf32>
      %c0_52 = arith.constant 0 : index
      %c0_53 = arith.constant 0 : index
      %252 = vector.load %arg6[%c0_52, %c0_53] : memref<128x128xf32, #tpu.memory_space<vmem>>, vector<128x128xf32>
      %cst_54 = arith.constant dense<0.000000e+00> : vector<8x128xf32>
      %253 = tpu.matmul %251, %252, %cst_54 {dimension_numbers = #tpu.dot_dimension_numbers<[1], [0], [0], [1], [0, 0, 1, 1], [], []>} : vector<8x128xf32>, vector<128x128xf32>, vector<8x128xf32> -> vector<8x128xf32>
      %c0_55 = arith.constant 0 : index
      %c0_56 = arith.constant 0 : index
      %254 = vector.load %arg7[%c0_55, %c0_56] : memref<1x128xf32, #tpu.memory_space<vmem>>, vector<1x128xf32>
      %255 = vector.broadcast %254 : vector<1x128xf32> to vector<8x128xf32>
      %256 = arith.addf %253, %255 : vector<8x128xf32>
      %257 = arith.negf %256 : vector<8x128xf32>
      %258 = math.exp %257 : vector<8x128xf32>
      %cst_57 = arith.constant 1.000000e+00 : f32
      %259 = vector.broadcast %cst_57 : f32 to vector<8x128xf32>
      %260 = arith.addf %259, %258 : vector<8x128xf32>
      %261 = arith.divf %259, %260 : vector<8x128xf32>
      %c0_58 = arith.constant 0 : index
      %c0_59 = arith.constant 0 : index
      %262 = vector.load %arg8[%c0_58, %c0_59] : memref<8x128xf32, #tpu.memory_space<vmem>>, vector<8x128xf32>
      tpu.vector_store %arg8[%c0_58, %c0_59], %261 {strides = array<i32>} : memref<8x128xf32, #tpu.memory_space<vmem>>, vector<8x128xf32>,
    } else {
    }
    return
  }
  func.func @transform_0(%arg0: i32, %arg1: i32) -> (i32, i32, i32) {
    %c0_i32 = arith.constant 0 : i32
    %c0_i32_0 = arith.constant 0 : i32
    return %arg0, %arg1, %c0_i32 : i32, i32, i32
  }
  func.func @transform_1(%arg0: i32, %arg1: i32) -> (i32, i32) {
    %c0_i32 = arith.constant 0 : i32
    %c0_i32_0 = arith.constant 0 : i32
    %c0_i32_1 = arith.constant 0 : i32
    return %c0_i32, %c0_i32_0 : i32, i32
  }
  func.func @transform_2(%arg0: i32, %arg1: i32) -> (i32, i32) {
    %c0_i32 = arith.constant 0 : i32
    %c0_i32_0 = arith.constant 0 : i32
    %c0_i32_1 = arith.constant 0 : i32
    return %c0_i32, %c0_i32_0 : i32, i32
  }
  func.func @transform_3(%arg0: i32, %arg1: i32) -> (i32, i32) {
    %c0_i32 = arith.constant 0 : i32
    %c0_i32_0 = arith.constant 0 : i32
    %c0_i32_1 = arith.constant 0 : i32
    return %c0_i32, %c0_i32_0 : i32, i32
  }
  func.func @transform_4(%arg0: i32, %arg1: i32) -> (i32, i32) {
    %c0_i32 = arith.constant 0 : i32
    %c0_i32_0 = arith.constant 0 : i32
    %c0_i32_1 = arith.constant 0 : i32
    return %c0_i32, %c0_i32_0 : i32, i32
  }
  func.func @transform_5(%arg0: i32, %arg1: i32) -> (i32, i32) {
    %c0_i32 = arith.constant 0 : i32
    %c0_i32_0 = arith.constant 0 : i32
    %c0_i32_1 = arith.constant 0 : i32
    return %c0_i32, %c0_i32_0 : i32, i32
  }
  func.func @transform_6(%arg0: i32, %arg1: i32) -> (i32, i32) {
    %c0_i32 = arith.constant 0 : i32
    %c0_i32_0 = arith.constant 0 : i32
    return %arg0, %c0_i32 : i32, i32
  }
}

</mosaic_0001>

<bundles_post_ra>
// kernel: tpu_custom_call.1
= control target key start
LH: loop header
LB: loop body
LE: loop exit
PB: predicated region body
PF: predicated region fallthrough
CT: control target
= control target key end

     0   :  { %11 = vsyncpa [#allocation6], 0  ;;  %s8494_s0 = inlined_call_operand.vmem [shape: f32[8,32,8], index: 0, kind: input, shape index: {}]   ;;  %s8495_s1 = inlined_call_operand.vmem [shape: f32[8,512], index: 1, kind: input, shape index: {}]   ;;  %s8496_s2 = inlined_call_operand.hbm [shape: f32[128,512], index: 2, kind: input, shape index: {}]   ;;  %s8497_s3 = inlined_call_operand.vmem [shape: f32[1,512], index: 3, kind: input, shape index: {}]   ;;  %s8498_s4 = inlined_call_operand.vmem [shape: f32[128,128], index: 4, kind: input, shape index: {}]   ;;  %s8499_s5 = inlined_call_operand.vmem [shape: f32[1,128], index: 5, kind: input, shape index: {}]   ;;  %s8500_s6 = inlined_call_operand.hbm [shape: f32[8,128], index: 6, kind: output, shape index: {}]  }
   0x1   :  { %12 = vsyncpa [#allocation7], 0  ;;  %s6773_s21 = smov 0   ;;  %s6775_s22 = smov 0  }
   0x2   :  { %s6777_s23 = smov 0   ;;  %s6779_s24 = smov 0  }
   0x3   :  { %s6781_s25 = smov 0  }
   0x4 LB: > { %s4721_s26 = sadd.s32 4294967295, %s6727_s25   ;;  %s27_s27 = sadd.s32 1, %s6723_s24  ;;  %s6727_s25 = sphi %s6781_s25, %s18_s25   ;;  %s6723_s24 = sphi %s6779_s24, %s8916_s24   ;;  %s6719_s23 = sphi %s6777_s23, %s8915_s23   ;;  %s6715_s22 = sphi %s6775_s22, %s8914_s22   ;;  %s6711_s21 = sphi %s6773_s21, %s8913_s21  }
   0x5   : > { %p28_p0 = scmp.ge.s32.totalorder %s27_s27, 4  ;;  %s39_s28 = sadd.s32 1, %s6715_s22 }
   0x6   : > { %p46_p1 = scmp.ne.s32.totalorder %s6715_s22, %s6711_s21  ;;  %p47_p2 = scmp.eq.s32.totalorder %s6727_s25, 0 }
   0x7   : > { %s8918_s27 = smov (%p28_p0, %s27_s27), 0  ;;  %p4722_p4 = scmp.ge.s32.totalorder %s6727_s25, 1 }
   0x8   : > { %p6806_p3 = por %p47_p2, %p46_p1  ;;  %s35_s30 = ssub.s32 %s6723_s24, %s8918_s27 }
   0x9   : > { %p194_p5 = scmp.lt.s32.totalorder %s6727_s25, 5  ;;  %p37_p6 = scmp.eq.s32.totalorder %s35_s30, 0 }
   0xa   : > { %s8615_s29 = scalar_select %p6806_p3, 1, 0 }
   0xb   : > { %p6814_p7 = pnand %p4722_p4, %p194_p5  ;;  %p6820_p8 = scmp.eq.s32.totalorder %s4721_s26, 0 }
   0xc   : > { %s6825_s9 = scalar_select %p37_p6, %s6715_s22, %s39_s28  }
   0xd   : > { %s8616_s7 = scalar_select %p6814_p7, 1, 0 }
   0xe   : > { %s8617_s8 = scalar_select %p6820_p8, 1, 0 }
   0xf   : > { %p5542_p9 = pneg %p6814_p7  ;;  %s6729_s10 = smov [#allocation5]  }
  0x10   : > { %s209_s11 = sshll.u32 %s6729_s10, 4  ;;  %s6627_s15 = scalar_lea.hbm %s8496_s2, 8192  ;;  %s210_s11 = int_to_ptr.vmem [resolvable:$true] %s209_s11 }
  0x11   : > { %p6831_p10 = pnand %p6820_p8, %p5542_p9  ;;  %p6628_p11 = scmp.ne.s32.totalorder %s8496_s2, %s6627_s15 }
  0x12   : > { %p6634_p1 = scmp.lt.u32.totalorder %s6627_s15, %s8496_s2 }
  0x13   : > { %p6629_p12 = pneg %p6831_p10 }
  0x15   : > { %p6630_p13 = pnand %p6629_p12, %p6628_p11 }
  0x17   : > { %p6631_p0 = pneg %p6630_p13 }
  0x19   : > { %p6636_p2 = pnand %p6634_p1, %p6631_p0 }
  0x1b   : > { %6639 = shalt.err (!%p6636_p2)
}
  0x1c   : > { %s6640_s20 = scalar_lea.vmem %s210_s11, 8192  ;;  %p6648_p9 = scmp.lt.s32.totalorder %s210_s11, %s210_s11 }
  0x1d   : > { %p6641_p4 = scmp.ne.s32.totalorder %s210_s11, %s6640_s20  ;;  %p6649_p8 = scmp.lt.s32.totalorder %s6640_s20, %s6640_s20 }
  0x1f   : > { %p6643_p5 = pnand %p6641_p4, %p6629_p12  ;;  %p6650_p7 = por %p6649_p8, %p6648_p9 }
  0x21   : > { %p6644_p6 = pneg %p6643_p5 }
  0x23   : > { %p6651_p3 = pnand %p6650_p7, %p6644_p6 }
  0x25   : > { %6654 = shalt.err (!%p6651_p3)
}
  0x26   : > { %s6730_s28 = smov 512   ;;  %s6731_s30 = smov 32  }
  0x27   : > { %5545 = dma.hbm_to_vmem [thread:$0]  (!%p6831_p10), %s8496_s2, 8192, %s210_s11, [#allocation6], %s6730_s28, %s6730_s28, %s6731_s30  }
  0x28   : > { %p4724_p11 = scmp.ge.s32.totalorder %s6727_s25, 4 }
  0x29   : > { %p8619_p13 = scmp.ne.s32.totalorder (!%p4724_p11), %s8615_s29, 0 }
  0x2a   : > { %228 = sbr.rel (%p4724_p11) target bundleno = 61 (0x3d), region = 36 }
  0x31   : > { %231 = sbr.rel (!%p8619_p13) target bundleno = 61 (0x3d), region = 40  ;;  %s233_s14 = sand.u32 (%p8619_p13), 1, %s6715_s22  }
  0x32   : > { %s4726_s15 = sshll.u32 (%p8619_p13), %s6723_s24, 3  ;;  %s4725_s16 = sshll.u32 (%p8619_p13), %s233_s14, 6 }
  0x33   : > { %s240_s19 = scalar_lea.vmem (%p8619_p13), %s8494_s0, %s4726_s15  ;;  %s235_s12 = scalar_lea.vmem (%p8619_p13), [#allocation4], %s4725_s16 }
  0x34   : > { %v282_v0 = vld [vmem:[%s240_s19] sm:$0xff] (%p8619_p13) }
  0x35   : > { %v284_v1 = vld [vmem:[%s240_s19 + $0x20] sm:$0xff] (%p8619_p13)  ;;  %283 = vst [vmem:[%s235_s12] sm:$0xff] (%p8619_p13), %v282_v0 }
  0x36   : > { %v286_v2 = vld [vmem:[%s240_s19 + $0x40] sm:$0xff] (%p8619_p13)  ;;  %285 = vst [vmem:[%s235_s12 + $0x8] sm:$0xff] (%p8619_p13), %v284_v1 }
  0x37   : > { %287 = vst [vmem:[%s235_s12 + $0x10] sm:$0xff] (%p8619_p13), %v286_v2  ;;  %v288_v3 = vld [vmem:[%s240_s19 + $0x60] sm:$0xff] (%p8619_p13) }
  0x38   : > { %v290_v4 = vld [vmem:[%s240_s19 + $0x80] sm:$0xff]  ;;  %289 = vst [vmem:[%s235_s12 + $0x18] sm:$0xff] %v288_v3 }
  0x39   : > { %v292_v5 = vld [vmem:[%s240_s19 + $0xa0] sm:$0xff]  ;;  %291 = vst [vmem:[%s235_s12 + $0x20] sm:$0xff] %v290_v4 }
  0x3a   : > { %293 = vst [vmem:[%s235_s12 + $0x28] sm:$0xff] %v292_v5  ;;  %v294_v6 = vld [vmem:[%s240_s19 + $0xc0] sm:$0xff] }
  0x3b   : > { %v296_v7 = vld [vmem:[%s240_s19 + $0xe0] sm:$0xff]  ;;  %295 = vst [vmem:[%s235_s12 + $0x30] sm:$0xff] %v294_v6 }
  0x3c   : > { %297 = vst [vmem:[%s235_s12 + $0x38] sm:$0xff] %v296_v7 }
  0x3d PF: > { %p8620_p3 = scmp.ne.s32.totalorder %s8616_s7, 0 }
  0x3f   : > { %306 = sbr.rel (%p8620_p3) target bundleno = 2784 (0xae0), region = 78 }
  0x46   : > { %s309_s29 = sand.u32 1, %s6711_s21   ;;  %p8621_p7 = scmp.ne.s32.totalorder %s8617_s8, 0 }
  0x47   : > { %s4728_s11 = sshll.u32 %s309_s29, 6 }
  0x48   : > { %s6862_s20 = scalar_lea.vmem [#allocation4], %s4728_s11 }
  0x49   : > { %6702 = dma.done.wait (%p8621_p7), [#allocation6], 8192  }
  0x4a   : > { %6704 = vsyncadd (%p8621_p7), [#allocation6], 4294959104  ;;  %p4730_p8 = scmp.ne.s32.totalorder %s6719_s23, 0 }
  0x4b   : > { %v6732_v8 = vmov (!%p4730_p8), 0.0  }
  0x4c   : > { %341 = sbr.rel (%p4730_p8) target bundleno = 83 (0x53), region = 90  ;;  %342 = vst [vmem:[#allocation2] sm:$0xff] (!%p4730_p8), %v6732_v8  ;;  %343 = vst [vmem:[#allocation3] sm:$0xff] (!%p4730_p8), %v6732_v8 }
  0x53 PF: > { %v353_v9 = vld [vmem:[%s8495_s1 + $0x8] sm:$0xff]  ;;  %v355_v10 = vld [vmem:[%s8495_s1 + $0x18] sm:$0xff]  ;;  %v352_v11 = vld [vmem:[%s8495_s1] sm:$0xff]  ;;  %vm378_vm0 = vcmask 64512   ;;  %v8504_v15 = vmov 0.0   ;;  %vm1150_vm1 = vcmask 1041409  }
  0x54   : > { %403 = vmatprep.subr.mxu0 %v353_v9  ;;  %516 = vmatprep.subr.mxu1 %v355_v10  ;;  %v354_v12 = vld [vmem:[%s8495_s1 + $0x10] sm:$0xff]  ;;  %v630_v14 = vld [vmem:[#allocation5 + $0x8] sm:$0xff]  ;;  %v632_v17 = vld [vmem:[#allocation5 + $0x18] sm:$0xff]  ;;  %vm1153_vm2 = vcmask 1042434   ;;  %vm1156_vm3 = vcmask 1043459   ;;  %vm1159_vm4 = vcmask 1044484  }
  0x55   : > { %v344_v13 = vld [vmem:[%s6862_s20] sm:$0xff]  ;;  %404 = vmatpush1.msra.mxu0 %v352_v11  ;;  %467 = vmatprep.mubr.f32.mxu0 %v8504_v15  ;;  %v634_v16 = vld [vmem:[#allocation5 + $0x28] sm:$0xff]  ;;  %v636_v18 = vld [vmem:[#allocation5 + $0x38] sm:$0xff]  ;;  %vm1162_vm5 = vcmask 1045509   ;;  %vm1165_vm6 = vcmask 1046534   ;;  %vm1168_vm7 = vcmask 1047559  }
  0x56   : > { %517 = vmatpush1.msra.mxu1 %v354_v12  ;;  %580 = vmatprep.mubr.f32.mxu1 %v8504_v15  ;;  %v6884_v19 = vpack.c.bf16 %v634_v16, %v630_v14  ;;  %v6886_v20 = vpack.c.bf16 %v636_v18, %v632_v17  ;;  %v629_v21 = vld [vmem:[#allocation5] sm:$0xff]  ;;  %v631_v23 = vld [vmem:[#allocation5 + $0x10] sm:$0xff]  ;;  %v345_v26 = vld [vmem:[%s6862_s20 + $0x8] sm:$0xff]  ;;  %p4939_p10 = scmp.ne.s32.totalorder %s6719_s23, 3 }
  0x57   : > { %v633_v22 = vld [vmem:[#allocation5 + $0x20] sm:$0xff]  ;;  %4731 = vmatmul.mubr.msk.f32.vlgmr.msra.gmra.mrb[0].mxu0 %vm378_vm0, %v344_v13  ;;  %4739 = vmatmul.mubr.msk.f32.vlgmr.msra.gmra.mrb[0].mxu1 %vm378_vm0, %v344_v13  ;;  %v635_v25 = vld [vmem:[#allocation5 + $0x30] sm:$0xff]  ;;  %v638_v27 = vld [vmem:[#allocation5 + $0x48] sm:$0xff]  ;;  %vm6735_vm8 = vmmov (!%p4939_p10), 0  }
  0x58   : > { %8622 = vst [vmem:[#allocation11_spill] sm:$0xff] %v6884_v19  ;;  %8623 = vst [vmem:[#allocation12_spill] sm:$0xff] %v6886_v20  ;;  %v6890_v24 = vpack.c.bf16 %v633_v22, %v629_v21  ;;  %4999 = vmatprep.subr.bf16.mxu0 %v6884_v19  ;;  %5031 = vmatprep.subr.bf16.mxu1 %v6886_v20  ;;  %v6895_v28 = vpack.c.bf16 %v635_v25, %v631_v23  ;;  %v642_v29 = vld [vmem:[#allocation5 + $0x68] sm:$0xff]  ;;  %v640_v30 = vld [vmem:[#allocation5 + $0x58] sm:$0xff] }
  0x59   : > { %v644_v31 = vld [vmem:[#allocation5 + $0x78] sm:$0xff]  ;;  %473 = vmatprep.mubr.f32.mxu0 %v8504_v15  ;;  %v6899_v32 = vpack.c.bf16 %v642_v29, %v638_v27  ;;  %v637_v34 = vld [vmem:[#allocation5 + $0x40] sm:$0xff]  ;;  %v639_v36 = vld [vmem:[#allocation5 + $0x50] sm:$0xff]  ;;  %586 = vmatprep.mubr.f32.mxu1 %v8504_v15 }
  0x5a   : > { %5001 = vmatpush1.bf16.msra.mxu0 %v6890_v24  ;;  %v6901_v33 = vpack.c.bf16 %v644_v31, %v640_v30  ;;  %v641_v35 = vld [vmem:[#allocation5 + $0x60] sm:$0xff]  ;;  %5033 = vmatpush1.bf16.msra.mxu1 %v6895_v28  ;;  %v643_v38 = vld [vmem:[#allocation5 + $0x70] sm:$0xff]  ;;  %v646_v40 = vld [vmem:[#allocation5 + $0x88] sm:$0xff] }
  0x5b   : > { %v6905_v37 = vpack.c.bf16 %v641_v35, %v637_v34  ;;  %v346_v39 = vld [vmem:[%s6862_s20 + $0x10] sm:$0xff]  ;;  %4732 = vmatmul.mubr.msk.f32.gmra.mrb[2].mxu0 %vm378_vm0, %v345_v26  ;;  %4740 = vmatmul.mubr.msk.f32.gmra.mrb[2].mxu1 %vm378_vm0, %v345_v26  ;;  %v6910_v41 = vpack.c.bf16 %v643_v38, %v639_v36  ;;  %v650_v42 = vld [vmem:[#allocation5 + $0xa8] sm:$0xff]  ;;  %v648_v43 = vld [vmem:[#allocation5 + $0x98] sm:$0xff] }
  0x5c   : > { %v652_v44 = vld [vmem:[#allocation5 + $0xb8] sm:$0xff]  ;;  %5003 = vmatprep.subr.bf16.mxu0 %v6899_v32  ;;  %5035 = vmatprep.subr.bf16.mxu1 %v6901_v33  ;;  %v6914_v45 = vpack.c.bf16 %v650_v42, %v646_v40  ;;  %v645_v47 = vld [vmem:[#allocation5 + $0x80] sm:$0xff]  ;;  %v647_v49 = vld [vmem:[#allocation5 + $0x90] sm:$0xff] }
  0x5d   : > { %8624 = vst [vmem:[#allocation13_spill] sm:$0xff] %v6910_v41  ;;  %v6916_v46 = vpack.c.bf16 %v652_v44, %v648_v43  ;;  %v649_v48 = vld [vmem:[#allocation5 + $0xa0] sm:$0xff]  ;;  %479 = vmatprep.mubr.f32.mxu0 %v8504_v15  ;;  %v651_v51 = vld [vmem:[#allocation5 + $0xb0] sm:$0xff]  ;;  %v654_v52 = vld [vmem:[#allocation5 + $0xc8] sm:$0xff]  ;;  %592 = vmatprep.mubr.f32.mxu1 %v8504_v15 }
  0x5e   : > { %8625 = vst [vmem:[#allocation14_spill] sm:$0xff] %v6914_v45  ;;  %5005 = vmatpush1.bf16.msra.mxu0 %v6905_v37  ;;  %v6920_v50 = vpack.c.bf16 %v649_v48, %v645_v47  ;;  %5037 = vmatpush1.bf16.msra.mxu1 %v6910_v41  ;;  %v6924_v53 = vpack.c.bf16 %v651_v51, %v647_v49  ;;  %v658_v54 = vld [vmem:[#allocation5 + $0xe8] sm:$0xff]  ;;  %v656_v55 = vld [vmem:[#allocation5 + $0xd8] sm:$0xff]  ;;  %v653_v57 = vld [vmem:[#allocation5 + $0xc0] sm:$0xff] }
  0x5f   : > { %8626 = vst [vmem:[#allocation15_spill] sm:$0xff] %v6916_v46  ;;  %v660_v56 = vld [vmem:[#allocation5 + $0xf8] sm:$0xff]  ;;  %4733 = vmatmul.mubr.msk.f32.gmra.mrb[4].mxu0 %vm378_vm0, %v346_v39  ;;  %4741 = vmatmul.mubr.msk.f32.gmra.mrb[4].mxu1 %vm378_vm0, %v346_v39  ;;  %v657_v58 = vld [vmem:[#allocation5 + $0xe0] sm:$0xff]  ;;  %v655_v59 = vld [vmem:[#allocation5 + $0xd0] sm:$0xff]  ;;  %v6931_v61 = vpack.c.bf16 %v658_v54, %v654_v52 }
  0x60   : > { %8627 = vst [vmem:[#allocation16_spill] sm:$0xff] %v6920_v50  ;;  %8628 = vst [vmem:[#allocation17_spill] sm:$0xff] %v6924_v53  ;;  %5007 = vmatprep.subr.bf16.mxu0 %v6914_v45  ;;  %5039 = vmatprep.subr.bf16.mxu1 %v6916_v46  ;;  %v347_v60 = vld [vmem:[%s6862_s20 + $0x18] sm:$0xff]  ;;  %v6933_v62 = vpack.c.bf16 %v660_v56, %v656_v55  ;;  %v659_v63 = vld [vmem:[#allocation5 + $0xf0] sm:$0xff]  ;;  %v6937_v1 = vpack.c.bf16 %v657_v58, %v653_v57 }
  0x61   : > { %8629 = vst [vmem:[#allocation18_spill] sm:$0xff] %v6931_v61  ;;  %v662_v0 = vld [vmem:[#allocation5 + $0x108] sm:$0xff]  ;;  %485 = vmatprep.mubr.f32.mxu0 %v8504_v15  ;;  %v664_v3 = vld [vmem:[#allocation5 + $0x118] sm:$0xff]  ;;  %598 = vmatprep.mubr.f32.mxu1 %v8504_v15  ;;  %v6941_v5 = vpack.c.bf16 %v659_v63, %v655_v59  ;;  %v661_v6 = vld [vmem:[#allocation5 + $0x100] sm:$0xff] }
  0x62   : > { %8630 = vst [vmem:[#allocation19_spill] sm:$0xff] %v6933_v62  ;;  %5009 = vmatpush1.bf16.msra.mxu0 %v6920_v50  ;;  %8631 = vst [vmem:[#allocation20_spill] sm:$0xff] %v6937_v1  ;;  %v666_v2 = vld [vmem:[#allocation5 + $0x128] sm:$0xff]  ;;  %v668_v4 = vld [vmem:[#allocation5 + $0x138] sm:$0xff]  ;;  %5041 = vmatpush1.bf16.msra.mxu1 %v6924_v53 }
  0x63   : > { %8632 = vst [vmem:[#allocation21_spill] sm:$0xff] %v6941_v5  ;;  %v665_v7 = vld [vmem:[#allocation5 + $0x120] sm:$0xff]  ;;  %4734 = vmatmul.mubr.msk.f32.gmra.mrb[6].mxu0 %vm378_vm0, %v347_v60  ;;  %4742 = vmatmul.mubr.msk.f32.gmra.mrb[6].mxu1 %vm378_vm0, %v347_v60  ;;  %v663_v8 = vld [vmem:[#allocation5 + $0x110] sm:$0xff]  ;;  %v6948_v11 = vpack.c.bf16 %v666_v2, %v662_v0  ;;  %v6950_v12 = vpack.c.bf16 %v668_v4, %v664_v3  ;;  %v670_v13 = vld [vmem:[#allocation5 + $0x148] sm:$0xff] }
  0x64   : > { %v667_v9 = vld [vmem:[#allocation5 + $0x130] sm:$0xff]  ;;  %5011 = vmatprep.subr.bf16.mxu0 %v6931_v61  ;;  %5043 = vmatprep.subr.bf16.mxu1 %v6933_v62  ;;  %v348_v10 = vld [vmem:[%s6862_s20 + $0x20] sm:$0xff]  ;;  %v6954_v14 = vpack.c.bf16 %v665_v7, %v661_v6  ;;  %v674_v16 = vld [vmem:[#allocation5 + $0x168] sm:$0xff] }
  0x65   : > { %8633 = vst [vmem:[#allocation22_spill] sm:$0xff] %v6948_v11  ;;  %8634 = vst [vmem:[#allocation23_spill] sm:$0xff] %v6950_v12  ;;  %491 = vmatprep.mubr.f32.mxu0 %v8504_v15  ;;  %v672_v17 = vld [vmem:[#allocation5 + $0x158] sm:$0xff]  ;;  %604 = vmatprep.mubr.f32.mxu1 %v8504_v15  ;;  %v6958_v21 = vpack.c.bf16 %v667_v9, %v663_v8  ;;  %v669_v22 = vld [vmem:[#allocation5 + $0x140] sm:$0xff]  ;;  %v6965_v29 = vpack.c.bf16 %v674_v16, %v670_v13 }
  0x66   : > { %5013 = vmatpush1.bf16.msra.mxu0 %v6937_v1  ;;  %8635 = vst [vmem:[#allocation24_spill] sm:$0xff] %v6954_v14  ;;  %v676_v18 = vld [vmem:[#allocation5 + $0x178] sm:$0xff]  ;;  %5045 = vmatpush1.bf16.msra.mxu1 %v6941_v5  ;;  %v673_v23 = vld [vmem:[#allocation5 + $0x160] sm:$0xff]  ;;  %v671_v25 = vld [vmem:[#allocation5 + $0x150] sm:$0xff] }
  0x67   : > { %8636 = vst [vmem:[#allocation25_spill] sm:$0xff] %v6958_v21  ;;  %4735 = vmatmul.mubr.msk.f32.gmra.mrb[8].mxu0 %vm378_vm0, %v348_v10  ;;  %4743 = vmatmul.mubr.msk.f32.gmra.mrb[8].mxu1 %vm378_vm0, %v348_v10  ;;  %v675_v26 = vld [vmem:[#allocation5 + $0x170] sm:$0xff]  ;;  %v349_v27 = vld [vmem:[%s6862_s20 + $0x28] sm:$0xff]  ;;  %8637 = vst [vmem:[#allocation26_spill] sm:$0xff] %v6965_v29  ;;  %v6967_v30 = vpack.c.bf16 %v676_v18, %v672_v17  ;;  %v6971_v34 = vpack.c.bf16 %v673_v23, %v669_v22 }
  0x68   : > { %5015 = vmatprep.subr.bf16.mxu0 %v6948_v11  ;;  %5047 = vmatprep.subr.bf16.mxu1 %v6950_v12  ;;  %v678_v31 = vld [vmem:[#allocation5 + $0x188] sm:$0xff]  ;;  %v680_v36 = vld [vmem:[#allocation5 + $0x198] sm:$0xff]  ;;  %v6975_v39 = vpack.c.bf16 %v675_v26, %v671_v25  ;;  %v677_v40 = vld [vmem:[#allocation5 + $0x180] sm:$0xff] }
  0x69   : > { %8638 = vst [vmem:[#allocation27_spill] sm:$0xff] %v6967_v30  ;;  %497 = vmatprep.mubr.f32.mxu0 %v8504_v15  ;;  %8639 = vst [vmem:[#allocation28_spill] sm:$0xff] %v6971_v34  ;;  %v682_v35 = vld [vmem:[#allocation5 + $0x1a8] sm:$0xff]  ;;  %v684_v38 = vld [vmem:[#allocation5 + $0x1b8] sm:$0xff]  ;;  %610 = vmatprep.mubr.f32.mxu1 %v8504_v15 }
  0x6a   : > { %5017 = vmatpush1.bf16.msra.mxu0 %v6954_v14  ;;  %5049 = vmatpush1.bf16.msra.mxu1 %v6958_v21  ;;  %8640 = vst [vmem:[#allocation29_spill] sm:$0xff] %v6975_v39  ;;  %v681_v42 = vld [vmem:[#allocation5 + $0x1a0] sm:$0xff]  ;;  %v679_v43 = vld [vmem:[#allocation5 + $0x190] sm:$0xff]  ;;  %v6982_v48 = vpack.c.bf16 %v682_v35, %v678_v31  ;;  %v6984_v49 = vpack.c.bf16 %v684_v38, %v680_v36  ;;  %v686_v51 = vld [vmem:[#allocation5 + $0x1c8] sm:$0xff] }
  0x6b   : > { %4736 = vmatmul.mubr.msk.f32.gmra.mrb[10].mxu0 %vm378_vm0, %v349_v27  ;;  %4744 = vmatmul.mubr.msk.f32.gmra.mrb[10].mxu1 %vm378_vm0, %v349_v27  ;;  %v683_v44 = vld [vmem:[#allocation5 + $0x1b0] sm:$0xff]  ;;  %v6988_v52 = vpack.c.bf16 %v681_v42, %v677_v40  ;;  %v690_v54 = vld [vmem:[#allocation5 + $0x1e8] sm:$0xff]  ;;  %v688_v55 = vld [vmem:[#allocation5 + $0x1d8] sm:$0xff]  ;;  %v358_v40 = vlaneseq }
  0x6c   : > { %5019 = vmatprep.subr.bf16.mxu0 %v6965_v29  ;;  %5051 = vmatprep.subr.bf16.mxu1 %v6967_v30  ;;  %v350_v47 = vld [vmem:[%s6862_s20 + $0x30] sm:$0xff]  ;;  %8641 = vst [vmem:[#allocation30_spill] sm:$0xff] %v6982_v48  ;;  %8642 = vst [vmem:[#allocation31_spill] sm:$0xff] %v6984_v49  ;;  %v692_v56 = vld [vmem:[#allocation5 + $0x1f8] sm:$0xff]  ;;  %v6992_v57 = vpack.c.bf16 %v683_v44, %v679_v43  ;;  %v6999_v2 = vpack.c.bf16 %v690_v54, %v686_v51 }
  0x6d   : > { %503 = vmatprep.mubr.f32.mxu0 %v8504_v15  ;;  %8643 = vst [vmem:[#allocation32_spill] sm:$0xff] %v6988_v52  ;;  %616 = vmatprep.mubr.f32.mxu1 %v8504_v15  ;;  %v685_v58 = vld [vmem:[#allocation5 + $0x1c0] sm:$0xff]  ;;  %v687_v60 = vld [vmem:[#allocation5 + $0x1d0] sm:$0xff]  ;;  %v351_v0 = vld [vmem:[%s6862_s20 + $0x38] sm:$0xff]  ;;  %v7001_v3 = vpack.c.bf16 %v692_v56, %v688_v55  ;;  %v359_v51 = vshrl.u32 %v358_v40, 7 }
  0x6e   : > { %5021 = vmatpush1.bf16.msra.mxu0 %v6971_v34  ;;  %5053 = vmatpush1.bf16.msra.mxu1 %v6975_v39  ;;  %8644 = vst [vmem:[#allocation33_spill] sm:$0xff] %v6992_v57  ;;  %v689_v59 = vld [vmem:[#allocation5 + $0x1e0] sm:$0xff]  ;;  %v691_v63 = vld [vmem:[#allocation5 + $0x1f0] sm:$0xff]  ;;  %8645 = vst [vmem:[#allocation34_spill] sm:$0xff] %v6999_v2 }
  0x6f   : > { %4737 = vmatmul.mubr.msk.f32.gmra.mrb[12].mxu0 %vm378_vm0, %v350_v47  ;;  %4745 = vmatmul.mubr.msk.f32.gmra.mrb[12].mxu1 %vm378_vm0, %v350_v47  ;;  %8646 = vst [vmem:[#allocation35_spill] sm:$0xff] %v7001_v3  ;;  %v7005_v4 = vpack.c.bf16 %v689_v59, %v685_v58  ;;  %v7009_v6 = vpack.c.bf16 %v691_v63, %v687_v60  ;;  %v693_v7 = vld [vmem:[#allocation2] sm:$0xff]  ;;  %v360_v59 = vsub.s32 0, %v359_v51  ;;  %v364_v40 = vsub.s32 1, %v359_v51 }
  0x70   : > { %5023 = vmatprep.subr.bf16.mxu0 %v6982_v48  ;;  %5055 = vmatprep.subr.bf16.mxu1 %v6984_v49 }
  0x71   : > { %509 = vmatprep.mubr.f32.mxu0 %v8504_v15  ;;  %8647 = vst [vmem:[#allocation36_spill] sm:$0xff] %v7005_v4  ;;  %622 = vmatprep.mubr.f32.mxu1 %v8504_v15  ;;  %8648 = vst [vmem:[#allocation37_spill] sm:$0xff] %v7009_v6 }
  0x72   : > { %5025 = vmatpush1.bf16.msra.mxu0 %v6988_v52  ;;  %5057 = vmatpush1.bf16.msra.mxu1 %v6992_v57 }
  0x73   : > { %4738 = vmatmul.mubr.msk.f32.gmra.mrb[14].mxu0 %vm378_vm0, %v351_v0  ;;  %4746 = vmatmul.mubr.msk.f32.gmra.mrb[14].mxu1 %vm378_vm0, %v351_v0  ;;  %v356_v0 = vld [vmem:[%s8497_s3] sm:$0xf] }
  0x74   : > { %5027 = vmatprep.subr.bf16.mxu0 %v6999_v2  ;;  %5059 = vmatprep.subr.bf16.mxu1 %v7001_v3 }
  0x75   : > { %759 = vmatprep.mubr.f32.mxu0 %v8504_v15  ;;  %830 = vmatprep.mubr.f32.mxu1 %v8504_v15 }
  0x76   : > { %5029 = vmatpush1.bf16.msra.mxu0 %v7005_v4  ;;  %5061 = vmatpush1.bf16.msra.mxu1 %v7009_v6 }
  0x77   : > { %5063 = vmatprep.subr.bf16.mxu0 %v6884_v19  ;;  %5095 = vmatprep.subr.bf16.mxu1 %v6886_v20 }
  0x79   : > { %760 = vmatmul.mubr.f32.vlgmr.msra.gmra.mrb[16].mxu0 %v693_v7  ;;  %831 = vmatmul.mubr.f32.vlgmr.msra.gmra.mrb[16].mxu1 %v693_v7 }
  0x7a   : > { %5065 = vmatpush1.bf16.msra.mxu0 %v6890_v24  ;;  %5097 = vmatpush1.bf16.msra.mxu1 %v6895_v28 }
  0x7b   : > { %5067 = vmatprep.subr.bf16.mxu0 %v6899_v32  ;;  %5099 = vmatprep.subr.bf16.mxu1 %v6901_v33 }
  0x7c   : > { %1235 = vmatprep.mubr.f32.mxu0 %v8504_v15  ;;  %1306 = vmatprep.mubr.f32.mxu1 %v8504_v15 }
  0x7e   : > { %5069 = vmatpush1.bf16.msra.mxu0 %v6905_v37  ;;  %5101 = vmatpush1.bf16.msra.mxu1 %v6910_v41 }
  0x7f   : > { %5071 = vmatprep.subr.bf16.mxu0 %v6914_v45  ;;  %5103 = vmatprep.subr.bf16.mxu1 %v6916_v46 }
  0x82   : > { %5073 = vmatpush1.bf16.msra.mxu0 %v6920_v50  ;;  %5105 = vmatpush1.bf16.msra.mxu1 %v6924_v53 }
  0x83   : > { %5075 = vmatprep.subr.bf16.mxu0 %v6931_v61  ;;  %5107 = vmatprep.subr.bf16.mxu1 %v6933_v62 }
  0x86   : > { %5077 = vmatpush1.bf16.msra.mxu0 %v6937_v1  ;;  %5109 = vmatpush1.bf16.msra.mxu1 %v6941_v5 }
  0x87   : > { %5079 = vmatprep.subr.bf16.mxu0 %v6948_v11  ;;  %5111 = vmatprep.subr.bf16.mxu1 %v6950_v12 }
  0x8a   : > { %5081 = vmatpush1.bf16.msra.mxu0 %v6954_v14  ;;  %5113 = vmatpush1.bf16.msra.mxu1 %v6958_v21 }
  0x8b   : > { %5083 = vmatprep.subr.bf16.mxu0 %v6965_v29  ;;  %5115 = vmatprep.subr.bf16.mxu1 %v6967_v30 }
  0x8e   : > { %5085 = vmatpush1.bf16.msra.mxu0 %v6971_v34  ;;  %5117 = vmatpush1.bf16.msra.mxu1 %v6975_v39 }
  0x8f   : > { %5087 = vmatprep.subr.bf16.mxu0 %v6982_v48  ;;  %5119 = vmatprep.subr.bf16.mxu1 %v6984_v49  ;;  %v372_v49 = vsub.s32 3, %v359_v51 }
  0x92   : > { %5089 = vmatpush1.bf16.msra.mxu0 %v6988_v52  ;;  %5121 = vmatpush1.bf16.msra.mxu1 %v6992_v57  ;;  %v7106_v57 = vrot.slane %v356_v0, %v364_v40 }
  0x93   : > { %5091 = vmatprep.subr.bf16.mxu0 %v6999_v2  ;;  %5123 = vmatprep.subr.bf16.mxu1 %v7001_v3 }
  0x96   : > { %5093 = vmatpush1.bf16.msra.mxu0 %v7005_v4  ;;  %5125 = vmatpush1.bf16.msra.mxu1 %v7009_v6 }
  0x97   : > { %5127 = vmatprep.subr.bf16.mxu0 %v6884_v19  ;;  %5159 = vmatprep.subr.bf16.mxu1 %v6886_v20  ;;  %v368_v20 = vsub.s32 2, %v359_v51  ;;  %v361_v19 = vrot.slane %v356_v0, %v360_v59 }
  0x99   : > { %v7108_v52 = vrot.slane %v356_v0, %v368_v20 }
 0x12a   : > { %v469_v8 = vpop.f32.mrb[0].mxu0  ;;  %v7055_v9 = vpop.f32.mrb[0].mxu1 }
 0x12b   : > { %v7057_v10 = vpop.f32.mrb[1].mxu0  ;;  %v7059_v13 = vpop.f32.mrb[1].mxu1  ;;  %v7110_v48 = vadd.f32 %v469_v8, %v361_v19 }
 0x12d   : > { %8649 = vst [vmem:[#allocation38_spill] sm:$0xff] %v7110_v48 }
 0x12e   : > { %v475_v16 = vpop.f32.mrb[2].mxu0  ;;  %v7061_v17 = vpop.f32.mrb[2].mxu1 }
 0x12f   : > { %v7063_v18 = vpop.f32.mrb[3].mxu0  ;;  %v7065_v22 = vpop.f32.mrb[3].mxu1  ;;  %v7112_v39 = vadd.f32 %v475_v16, %v361_v19 }
 0x131   : > { %8650 = vst [vmem:[#allocation39_spill] sm:$0xff] %v7112_v39 }
 0x132   : > { %v481_v23 = vpop.f32.mrb[4].mxu0  ;;  %v7067_v25 = vpop.f32.mrb[4].mxu1 }
 0x133   : > { %v7069_v26 = vpop.f32.mrb[5].mxu0  ;;  %v7071_v27 = vpop.f32.mrb[5].mxu1  ;;  %v7114_v34 = vadd.f32 %v481_v23, %v361_v19 }
 0x135   : > { %8651 = vst [vmem:[#allocation40_spill] sm:$0xff] %v7114_v34 }
 0x136   : > { %v487_v31 = vpop.f32.mrb[6].mxu0  ;;  %v7073_v35 = vpop.f32.mrb[6].mxu1 }
 0x137   : > { %v7075_v36 = vpop.f32.mrb[7].mxu0  ;;  %v7077_v38 = vpop.f32.mrb[7].mxu1  ;;  %v7116_v30 = vadd.f32 %v487_v31, %v361_v19 }
 0x139   : > { %8652 = vst [vmem:[#allocation41_spill] sm:$0xff] %v7116_v30 }
 0x13a   : > { %v493_v42 = vpop.f32.mrb[8].mxu0  ;;  %v7079_v43 = vpop.f32.mrb[8].mxu1 }
 0x13b   : > { %v7081_v44 = vpop.f32.mrb[9].mxu0  ;;  %v7083_v47 = vpop.f32.mrb[9].mxu1  ;;  %v7118_v59 = vadd.f32 %v493_v42, %v361_v19 }
 0x13d   : > { %8653 = vst [vmem:[#allocation42_spill] sm:$0xff] %v7118_v59 }
 0x13e   : > { %v499_v54 = vpop.f32.mrb[10].mxu0  ;;  %v7085_v55 = vpop.f32.mrb[10].mxu1 }
 0x13f   : > { %v7087_v56 = vpop.f32.mrb[11].mxu0  ;;  %v7089_v58 = vpop.f32.mrb[11].mxu1  ;;  %v7120_v29 = vadd.f32 %v499_v54, %v361_v19 }
 0x141   : > { %8654 = vst [vmem:[#allocation43_spill] sm:$0xff] %v7120_v29 }
 0x142   : > { %v505_v60 = vpop.f32.mrb[12].mxu0  ;;  %v7091_v63 = vpop.f32.mrb[12].mxu1 }
 0x143   : > { %v7096_v7 = vpop.f32.mrb[13].mxu0  ;;  %v7098_v15 = vpop.f32.mrb[13].mxu1  ;;  %v7122_v21 = vadd.f32 %v505_v60, %v361_v19 }
 0x145   : > { %8655 = vst [vmem:[#allocation44_spill] sm:$0xff] %v7122_v21 }
 0x146   : > { %v511_v6 = vpop.f32.mrb[14].mxu0  ;;  %v7100_v4 = vpop.f32.mrb[14].mxu1 }
 0x147   : > { %v7102_v3 = vpop.f32.mrb[15].mxu0  ;;  %v7104_v2 = vpop.f32.mrb[15].mxu1  ;;  %v7124_v14 = vadd.f32 %v511_v6, %v361_v19 }
 0x149   : > { %8656 = vst [vmem:[#allocation45_spill] sm:$0xff] %v7124_v14 }
 0x14c   : > { %v761_v40 = vpop.f32.mrb[16].mxu0  ;;  %v7126_v11 = vpop.f32.mrb[16].mxu1 }
 0x14d   : > { %v841_v20 = vrot.slane %v761_v40, 1  ;;  %v845_v12 = vrot.slane %v761_v40, 2  ;;  %v849_v51 = vrot.slane %v761_v40, 3  ;;  %v853_v8 = vrot.slane %v761_v40, 4  ;;  %v7128_v16 = vpop.f32.mrb[17].mxu0  ;;  %v7131_v54 = vpop.f32.mrb[17].mxu1 }
 0x14e   : > { %v857_v23 = vrot.slane %v761_v40, 5  ;;  %v861_v31 = vrot.slane %v761_v40, 6  ;;  %v865_v5 = vrot.slane %v761_v40, 7  ;;  %v901_v42 = vadd.f32 %v761_v40, %v7110_v48 }
 0x14f   : > { %v905_v60 = vadd.f32 %v841_v20, %v7112_v39  ;;  %v909_v19 = vadd.f32 %v845_v12, %v7114_v34  ;;  %v913_v6 = vadd.f32 %v849_v51, %v7116_v30  ;;  %v917_v1 = vadd.f32 %v853_v8, %v7118_v59 }
 0x150   : > { %v921_v62 = vadd.f32 %v857_v23, %v7120_v29  ;;  %v925_v61 = vadd.f32 %v861_v31, %v7122_v21  ;;  %v4747_v53 = vmul.f32 -1.442695, %v901_v42  ;;  %v929_v50 = vadd.f32 %v865_v5, %v7124_v14 }
 0x151   : > { %v4748_v46 = vmul.f32 -1.442695, %v905_v60  ;;  %v4749_v45 = vmul.f32 -1.442695, %v909_v19  ;;  %v4750_v40 = vmul.f32 -1.442695, %v913_v6  ;;  %v7142_v48 = vadd.f32 %v7055_v9, %v7108_v52 }
 0x152   : > { %v7144_v20 = vrot.slane %v356_v0, %v372_v49  ;;  %5599 = vpow2.f32 %v4747_v53  ;;  %v4751_v12 = vmul.f32 -1.442695, %v917_v1  ;;  %v7148_v51 = vadd.f32 %v7057_v10, %v7106_v57 }
 0x153   : > { %8657 = vst [vmem:[#allocation46_spill] sm:$0xff] %v7142_v48  ;;  %5601 = vpow2.f32 %v4748_v46  ;;  %v4752_v8 = vmul.f32 -1.442695, %v921_v62  ;;  %v843_v23 = vrot.slane %v7126_v11, 1  ;;  %v7153_v5 = vadd.f32 %v7061_v17, %v7108_v52 }
 0x154   : > { %8658 = vst [vmem:[#allocation47_spill] sm:$0xff] %v7148_v51  ;;  %5603 = vpow2.f32 %v4749_v45  ;;  %v4753_v31 = vmul.f32 -1.442695, %v925_v61  ;;  %v847_v9 = vrot.slane %v7126_v11, 2  ;;  %v7158_v53 = vadd.f32 %v7067_v25, %v7108_v52 }
 0x155   : > { %8659 = vst [vmem:[#allocation48_spill] sm:$0xff] %v7153_v5  ;;  %5605 = vpow2.f32 %v4750_v40  ;;  %v4754_v1 = vmul.f32 -1.442695, %v929_v50  ;;  %v851_v49 = vrot.slane %v7126_v11, 3  ;;  %v7163_v46 = vadd.f32 %v7079_v43, %v7108_v52 }
 0x156   : > { %8660 = vst [vmem:[#allocation49_spill] sm:$0xff] %v7158_v53  ;;  %5607 = vpow2.f32 %v4751_v12  ;;  %v855_v62 = vrot.slane %v7126_v11, 4  ;;  %v903_v45 = vadd.f32 %v7126_v11, %v7142_v48  ;;  %v7170_v61 = vadd.f32 %v7059_v13, %v7144_v20 }
 0x157   : > { %8661 = vst [vmem:[#allocation50_spill] sm:$0xff] %v7163_v46  ;;  %v7174_v10 = vadd.f32 %v7073_v35, %v7108_v52  ;;  %5609 = vpow2.f32 %v4752_v8  ;;  %v907_v50 = vadd.f32 %v843_v23, %v7153_v5  ;;  %v7179_v17 = vadd.f32 %v7063_v18, %v7106_v57 }
 0x158   : > { %8662 = vst [vmem:[#allocation51_spill] sm:$0xff] %v7170_v61  ;;  %v7183_v25 = vadd.f32 %v7065_v22, %v7144_v20  ;;  %5611 = vpow2.f32 %v4753_v31  ;;  %v911_v43 = vadd.f32 %v847_v9, %v7158_v53  ;;  %v7188_v13 = vadd.f32 %v7069_v26, %v7106_v57 }
 0x159   : > { %8663 = vst [vmem:[#allocation52_spill] sm:$0xff] %v7174_v10  ;;  %8664 = vst [vmem:[#allocation53_spill] sm:$0xff] %v7179_v17  ;;  %v7192_v35 = vadd.f32 %v7071_v27, %v7144_v20  ;;  %5613 = vpow2.f32 %v4754_v1  ;;  %v915_v0 = vadd.f32 %v851_v49, %v7174_v10  ;;  %v7197_v18 = vadd.f32 %v7075_v36, %v7106_v57 }
 0x15a   : > { %8665 = vst [vmem:[#allocation54_spill] sm:$0xff] %v7188_v13  ;;  %v7201_v22 = vadd.f32 %v7077_v38, %v7144_v20  ;;  %v919_v42 = vadd.f32 %v855_v62, %v7163_v46  ;;  %5615 = vtanh.f32 %v903_v45  ;;  %v7206_v26 = vadd.f32 %v7081_v44, %v7106_v57 }
 0x15b   : > { %8666 = vst [vmem:[#allocation55_spill] sm:$0xff] %v7197_v18  ;;  %v7210_v27 = vadd.f32 %v7085_v55, %v7108_v52  ;;  %v859_v60 = vrot.slane %v7126_v11, 5  ;;  %5617 = vtanh.f32 %v907_v50  ;;  %v7215_v19 = vadd.f32 %v7083_v47, %v7144_v20 }
 0x15c   : > { %8667 = vst [vmem:[#allocation56_spill] sm:$0xff] %v7206_v26  ;;  %v5600_v36 = vpop.eup %5599  ;;  %v7219_v38 = vadd.f32 %v7091_v63, %v7108_v52  ;;  %v863_v6 = vrot.slane %v7126_v11, 6  ;;  %5619 = vtanh.f32 %v911_v43  ;;  %v7224_v55 = vadd.f32 %v7087_v56, %v7106_v57 }
 0x15d   : > { %8668 = vst [vmem:[#allocation57_spill] sm:$0xff] %v7210_v27  ;;  %v5602_v44 = vpop.eup %5601  ;;  %v7228_v40 = vadd.f32 %v7096_v7, %v7106_v57  ;;  %v957_v12 = vadd.f32 1.0, %v5600_v36  ;;  %5621 = vtanh.f32 %v915_v0  ;;  %v7232_v8 = vadd.f32 %v7100_v4, %v7108_v52 }
 0x15e   : > { %8669 = vst [vmem:[#allocation58_spill] sm:$0xff] %v7219_v38  ;;  %8670 = vst [vmem:[#allocation59_spill] sm:$0xff] %v7224_v55  ;;  %v5604_v47 = vpop.eup %5603  ;;  %v958_v63 = vadd.f32 1.0, %v5602_v44  ;;  %v867_v23 = vrot.slane %v7126_v11, 7  ;;  %5623 = vtanh.f32 %v919_v42  ;;  %v923_v56 = vadd.f32 %v859_v60, %v7210_v27 }
 0x15f   : > { %8671 = vst [vmem:[#allocation60_spill] sm:$0xff] %v7228_v40  ;;  %8672 = vst [vmem:[#allocation61_spill] sm:$0xff] %v7232_v8  ;;  %v5606_v31 = vpop.eup %5605  ;;  %v959_v9 = vadd.f32 1.0, %v5604_v47  ;;  %5625 = vrcp.f32 %v957_v12  ;;  %v842_v1 = vrot.slane %v7128_v16, 1  ;;  %v927_v62 = vadd.f32 %v863_v6, %v7219_v38 }
 0x160   : > { %v5608_v7 = vpop.eup %5607  ;;  %v960_v49 = vadd.f32 1.0, %v5606_v31  ;;  %5627 = vrcp.f32 %v958_v63  ;;  %v846_v45 = vrot.slane %v7128_v16, 2  ;;  %v850_v11 = vrot.slane %v7128_v16, 3 }
 0x161   : > { %v5610_v52 = vpop.eup %5609  ;;  %v961_v4 = vadd.f32 1.0, %v5608_v7  ;;  %5629 = vrcp.f32 %v959_v9  ;;  %v854_v50 = vrot.slane %v7128_v16, 4  ;;  %v858_v42 = vrot.slane %v7128_v16, 5 }
 0x162   : > { %v5612_v43 = vpop.eup %5611  ;;  %v962_v0 = vadd.f32 1.0, %v5610_v52  ;;  %5631 = vrcp.f32 %v960_v49  ;;  %v902_v60 = vadd.f32 %v7128_v16, %v7148_v51  ;;  %v862_v6 = vrot.slane %v7128_v16, 6 }
 0x163   : > { %v5614_v36 = vpop.eup %5613  ;;  %v963_v44 = vadd.f32 1.0, %v5612_v43  ;;  %5633 = vrcp.f32 %v961_v4  ;;  %v906_v12 = vadd.f32 %v842_v1, %v7179_v17  ;;  %v866_v31 = vrot.slane %v7128_v16, 7 }
 0x164   : > { %v5616_v47 = vpop.eup %5615  ;;  %v964_v63 = vadd.f32 1.0, %v5614_v36  ;;  %5635 = vrcp.f32 %v962_v0  ;;  %v910_v9 = vadd.f32 %v846_v45, %v7188_v13  ;;  %v931_v49 = vadd.f32 %v867_v23, %v7232_v8 }
 0x165   : > { %v5618_v7 = vpop.eup %5617  ;;  %5637 = vrcp.f32 %v963_v44  ;;  %v914_v52 = vadd.f32 %v850_v11, %v7197_v18  ;;  %v918_v43 = vadd.f32 %v854_v50, %v7206_v26  ;;  %v7253_v51 = vadd.f32 %v7102_v3, %v7106_v57 }
 0x166   : > { %v5620_v4 = vpop.eup %5619  ;;  %5639 = vrcp.f32 %v964_v63  ;;  %v922_v1 = vadd.f32 %v858_v42, %v7224_v55  ;;  %v4755_v0 = vmul.f32 -1.442695, %v902_v60  ;;  %v926_v45 = vadd.f32 %v862_v6, %v7228_v40 }
 0x167   : > { %8673 = vst [vmem:[#allocation62_spill] sm:$0xff] %v7253_v51  ;;  %v5622_v16 = vpop.eup %5621  ;;  %5641 = vtanh.f32 %v923_v56  ;;  %v4756_v36 = vmul.f32 -1.442695, %v906_v12  ;;  %v844_v23 = vrot.slane %v7131_v54, 1  ;;  %v930_v11 = vadd.f32 %v866_v31, %v7253_v51 }
 0x168   : > { %v5624_v44 = vpop.eup %5623  ;;  %5643 = vtanh.f32 %v927_v62  ;;  %v4757_v50 = vmul.f32 -1.442695, %v910_v9  ;;  %v848_v26 = vrot.slane %v7131_v54, 2  ;;  %v4758_v3 = vmul.f32 -1.442695, %v914_v52 }
 0x169   : > { %v5626_v57 = vpop.eup %5625  ;;  %5645 = vtanh.f32 %v931_v49  ;;  %v4759_v63 = vmul.f32 -1.442695, %v918_v43  ;;  %v852_v42 = vrot.slane %v7131_v54, 3  ;;  %v856_v6 = vrot.slane %v7131_v54, 4 }
 0x16a   : > { %v5628_v60 = vpop.eup %5627  ;;  %v7261_v56 = vmul.f32 %v5626_v57, %v5616_v47  ;;  %5647 = vpow2.f32 %v4755_v0  ;;  %v904_v62 = vadd.f32 %v7131_v54, %v7170_v61  ;;  %v4760_v9 = vmul.f32 -1.442695, %v922_v1 }
 0x16b   : > { %v5630_v12 = vpop.eup %5629  ;;  %v7266_v31 = vmul.f32 %v5628_v60, %v5618_v7  ;;  %5649 = vpow2.f32 %v4756_v36  ;;  %v908_v49 = vadd.f32 %v844_v23, %v7183_v25  ;;  %v4761_v51 = vmul.f32 -1.442695, %v926_v45 }
 0x16c   : > { %v5632_v52 = vpop.eup %5631  ;;  %v7269_v43 = vmul.f32 %v5630_v12, %v5620_v4  ;;  %5651 = vpow2.f32 %v4757_v50  ;;  %v912_v47 = vadd.f32 %v848_v26, %v7192_v35  ;;  %v4762_v57 = vmul.f32 -1.442695, %v930_v11 }
 0x16d   : > { %v5634_v0 = vpop.eup %5633  ;;  %5653 = vpow2.f32 %v4758_v3  ;;  %v916_v40 = vadd.f32 %v852_v42, %v7201_v22  ;;  %v7273_v61 = vmul.f32 %v5632_v52, %v5622_v16  ;;  %v920_v1 = vadd.f32 %v856_v6, %v7215_v19 }
 0x16e   : > { %v5636_v7 = vpop.eup %5635  ;;  %5655 = vpow2.f32 %v4759_v63  ;;  %v4763_v36 = vmul.f32 -1.442695, %v904_v62  ;;  %v7276_v23 = vmul.f32 %v5634_v0, %v5624_v44  ;;  %v4764_v50 = vmul.f32 -1.442695, %v908_v49 }
 0x16f   : > { %v5638_v4 = vpop.eup %5637  ;;  %5657 = vpow2.f32 %v4760_v9  ;;  %v4765_v26 = vmul.f32 -1.442695, %v912_v47  ;;  %v4766_v11 = vmul.f32 -1.442695, %v916_v40  ;;  %v4767_v16 = vmul.f32 -1.442695, %v920_v1 }
 0x170   : > { %v5640_v45 = vpop.eup %5639  ;;  %5659 = vpow2.f32 %v4761_v51  ;;  %v7282_v6 = vadd.f32 %v7089_v58, %v7144_v20  ;;  %v860_v44 = vrot.slane %v7131_v54, 5  ;;  %v7289_v12 = vadd.f32 %v7098_v15, %v7144_v20 }
 0x171   : > { %v5642_v60 = vpop.eup %5641  ;;  %5661 = vpow2.f32 %v4762_v57  ;;  %v864_v40 = vrot.slane %v7131_v54, 6 }
 0x172   : > { %v5644_v3 = vpop.eup %5643  ;;  %5663 = vpow2.f32 %v4763_v36  ;;  %v7278_v42 = vmul.f32 %v5642_v60, %v5636_v7  ;;  %v924_v7 = vadd.f32 %v860_v44, %v7282_v6 }
 0x173   : > { %v5646_v63 = vpop.eup %5645  ;;  %5665 = vpow2.f32 %v4764_v50  ;;  %v7285_v62 = vmul.f32 %v5644_v3, %v5638_v4  ;;  %v928_v15 = vadd.f32 %v864_v40, %v7289_v12 }
 0x174   : > { %v5648_v51 = vpop.eup %5647  ;;  %5667 = vpow2.f32 %v4765_v26  ;;  %v7292_v9 = vmul.f32 %v5646_v63, %v5640_v45  ;;  %v7298_v26 = vadd.f32 %v7104_v2, %v7144_v20  ;;  %v4768_v63 = vmul.f32 -1.442695, %v924_v7 }
 0x175   : > { %v5650_v49 = vpop.eup %5649  ;;  %v1005_v52 = vadd.f32 1.0, %v5648_v51  ;;  %5669 = vpow2.f32 %v4766_v11  ;;  %v868_v11 = vrot.slane %v7131_v54, 7  ;;  %v694_v51 = vld [vmem:[#allocation3] sm:$0xff]  ;;  %v4769_v40 = vmul.f32 -1.442695, %v928_v15 }
 0x176   : > { %v5652_v58 = vpop.eup %5651  ;;  %v1006_v47 = vadd.f32 1.0, %v5650_v49  ;;  %5671 = vpow2.f32 %v4767_v16  ;;  %v1088_v15 = vrot.slane %v694_v51, 3 }
 0x177   : > { %v5654_v0 = vpop.eup %5653  ;;  %v1007_v57 = vadd.f32 1.0, %v5652_v58  ;;  %5673 = vrcp.f32 %v1005_v52  ;;  %v932_v2 = vadd.f32 %v868_v11, %v7298_v26  ;;  %v1090_v11 = vrot.slane %v694_v51, 5 }
 0x178   : > { %v5656_v1 = vpop.eup %5655  ;;  %v1008_v36 = vadd.f32 1.0, %v5654_v0  ;;  %5675 = vrcp.f32 %v1006_v47 }
 0x179   : > { %v5658_v4 = vpop.eup %5657  ;;  %v1009_v50 = vadd.f32 1.0, %v5656_v1  ;;  %5677 = vrcp.f32 %v1007_v57  ;;  %v1086_v57 = vrot.slane %v694_v51, 1 }
 0x17a   : > { %v5660_v45 = vpop.eup %5659  ;;  %v1010_v60 = vadd.f32 1.0, %v5658_v4  ;;  %5679 = vrcp.f32 %v1008_v36  ;;  %v1087_v36 = vrot.slane %v694_v51, 2 }
 0x17b   : > { %v5662_v3 = vpop.eup %5661  ;;  %v1011_v16 = vadd.f32 1.0, %v5660_v45  ;;  %5681 = vrcp.f32 %v1009_v50 }
 0x17c   : > { %v5664_v44 = vpop.eup %5663  ;;  %v1012_v49 = vadd.f32 1.0, %v5662_v3  ;;  %5683 = vrcp.f32 %v1010_v60  ;;  %v4770_v3 = vmul.f32 -1.442695, %v932_v2 }
 0x17d   : > { %v5666_v52 = vpop.eup %5665  ;;  %5685 = vrcp.f32 %v1011_v16  ;;  %v1061_v58 = vadd.f32 1.0, %v5664_v44  ;;  %v1089_v16 = vrot.slane %v694_v51, 4 }
 0x17e   : > { %v5668_v47 = vpop.eup %5667  ;;  %5687 = vrcp.f32 %v1012_v49  ;;  %v1062_v20 = vadd.f32 1.0, %v5666_v52  ;;  %v1091_v52 = vrot.slane %v694_v51, 6 }
 0x17f   : > { %v5670_v0 = vpop.eup %5669  ;;  %5689 = vpow2.f32 %v4768_v63  ;;  %v1063_v54 = vadd.f32 1.0, %v5668_v47 }
 0x180   : > { %v5672_v1 = vpop.eup %5671  ;;  %5691 = vpow2.f32 %v4769_v40  ;;  %v1064_v7 = vadd.f32 1.0, %v5670_v0 }
 0x181   : > { %v5674_v4 = vpop.eup %5673  ;;  %v1065_v50 = vadd.f32 1.0, %v5672_v1  ;;  %5693 = vrcp.f32 %v1061_v58  ;;  %v1092_v58 = vrot.slane %v694_v51, 7 }
 0x182   : > { %v5676_v45 = vpop.eup %5675  ;;  %v1101_v60 = vmul.f32 %v5674_v4, %v694_v51  ;;  %5695 = vrcp.f32 %v1062_v20 }
 0x183   : > { %v5678_v44 = vpop.eup %5677  ;;  %5697 = vrcp.f32 %v1063_v54  ;;  %v1102_v49 = vmul.f32 %v5676_v45, %v1086_v57 }
 0x184   : > { %v5680_v63 = vpop.eup %5679  ;;  %5699 = vrcp.f32 %v1064_v7  ;;  %v1103_v47 = vmul.f32 %v5678_v44, %v1087_v36  ;;  %v7303_v40 = vadd.f32 %v7261_v56, %v1101_v60 }
 0x185   : > { %v5682_v0 = vpop.eup %5681  ;;  %5701 = vrcp.f32 %v1065_v50  ;;  %v1104_v1 = vmul.f32 %v5680_v63, %v1088_v15  ;;  %v7306_v4 = vadd.f32 %v7266_v31, %v1102_v49 }
 0x186   : > { %v5684_v2 = vpop.eup %5683  ;;  %5703 = vpow2.f32 %v4770_v3  ;;  %v1105_v20 = vmul.f32 %v5682_v0, %v1089_v16  ;;  %v7309_v54 = vadd.f32 %v7269_v43, %v1103_v47 }
 0x187   : > { %v5686_v57 = vpop.eup %5685  ;;  %v1106_v7 = vmul.f32 %v5684_v2, %v1090_v11  ;;  %v7312_v36 = vadd.f32 %v7273_v61, %v1104_v1  ;;  %5705 = vtanh.f32 %v7303_v40 }
 0x188   : > { %v5688_v56 = vpop.eup %5687  ;;  %v1107_v50 = vmul.f32 %v5686_v57, %v1091_v52  ;;  %v7316_v51 = vadd.f32 %v7276_v23, %v1105_v20  ;;  %5707 = vtanh.f32 %v7306_v4 }
 0x189   : > { %v5690_v31 = vpop.eup %5689  ;;  %v1108_v15 = vmul.f32 %v5688_v56, %v1092_v58  ;;  %v7320_v45 = vadd.f32 %v7278_v42, %v1106_v7  ;;  %5709 = vtanh.f32 %v7309_v54 }
 0x18a   : > { %v5692_v43 = vpop.eup %5691  ;;  %v1066_v60 = vadd.f32 1.0, %v5690_v31  ;;  %v7324_v61 = vadd.f32 %v7285_v62, %v1107_v50  ;;  %5711 = vtanh.f32 %v7312_v36 }
 0x18b   : > { %v5694_v3 = vpop.eup %5693  ;;  %v1067_v16 = vadd.f32 1.0, %v5692_v43  ;;  %v7328_v23 = vadd.f32 %v7292_v9, %v1108_v15  ;;  %5713 = vtanh.f32 %v7316_v51 }
 0x18c   : > { %v5696_v44 = vpop.eup %5695  ;;  %5715 = vrcp.f32 %v1066_v60 }
 0x18d   : > { %v5698_v42 = vpop.eup %5697  ;;  %5717 = vrcp.f32 %v1067_v16 }
 0x18e   : > { %v5700_v11 = vpop.eup %5699  ;;  %5719 = vtanh.f32 %v7320_v45 }
 0x18f   : > { %v5702_v49 = vpop.eup %5701  ;;  %5721 = vtanh.f32 %v7324_v61 }
 0x190   : > { %v5704_v62 = vpop.eup %5703  ;;  %5723 = vtanh.f32 %v7328_v23 }
 0x191   : > { %v5706_v63 = vpop.eup %5705  ;;  %v1068_v52 = vadd.f32 1.0, %v5704_v62 }
 0x192   : > { %v5708_v47 = vpop.eup %5707  ;;  %v1133_v9 = vmul.f32 %v5706_v63, %v5694_v3 }
 0x193   : > { %v5710_v0 = vpop.eup %5709  ;;  %5725 = vrcp.f32 %v1068_v52  ;;  %v1134_v58 = vmul.f32 %v5708_v47, %v5696_v44 }
 0x194   : > { %v5712_v1 = vpop.eup %5711  ;;  %v1135_v2 = vmul.f32 %v5710_v0, %v5698_v42 }
 0x195   : > { %v5714_v20 = vpop.eup %5713  ;;  %v1136_v57 = vmul.f32 %v5712_v1, %v5700_v11  ;;  %v1149_v7 = vrot.slane %v1134_v58, 7 }
 0x196   : > { %v5716_v56 = vpop.eup %5715  ;;  %v1137_v50 = vmul.f32 %v5714_v20, %v5702_v49  ;;  %v1152_v31 = vrot.slane %v1135_v2, 6 }
 0x197   : > { %v5718_v15 = vpop.eup %5717  ;;  %v1151_v43 = vsel %vm1150_vm1, %v1149_v7, %v1133_v9  ;;  %v1155_v60 = vrot.slane %v1136_v57, 5  ;;  %v8674_v7 = vmov 0.0  }
 0x198   : > { %v5720_v3 = vpop.eup %5719  ;;  %v1154_v16 = vsel %vm1153_vm2, %v1152_v31, %v1151_v43  ;;  %v1158_v44 = vrot.slane %v1137_v50, 4  ;;  %v8676_v50 = vld [vmem:[#allocation15_spill] sm:$0xff]  ;;  %v8677_v31 = vld [vmem:[#allocation16_spill] sm:$0xff]  ;;  %v8679_v43 = vld [vmem:[#allocation18_spill] sm:$0xff] }
 0x199   : > { %v5722_v62 = vpop.eup %5721  ;;  %v1138_v42 = vmul.f32 %v5720_v3, %v5716_v56  ;;  %v1157_v63 = vsel %vm1156_vm3, %v1155_v60, %v1154_v16  ;;  %v8675_v56 = vld [vmem:[#allocation14_spill] sm:$0xff]  ;;  %v8680_v60 = vld [vmem:[#allocation19_spill] sm:$0xff]  ;;  %v8681_v3 = vld [vmem:[#allocation20_spill] sm:$0xff] }
 0x19a   : > { %v1139_v11 = vmul.f32 %v5722_v62, %v5718_v15  ;;  %v1160_v52 = vsel %vm1159_vm4, %v1158_v44, %v1157_v63  ;;  %v5724_v49 = vpop.eup %5723  ;;  %v8678_v15 = vld [vmem:[#allocation17_spill] sm:$0xff]  ;;  %v8683_v44 = vld [vmem:[#allocation22_spill] sm:$0xff]  ;;  %v8684_v62 = vld [vmem:[#allocation23_spill] sm:$0xff] }
 0x19b   : > { %v1161_v47 = vrot.slane %v1138_v42, 3  ;;  %v8682_v16 = vld [vmem:[#allocation21_spill] sm:$0xff]  ;;  %v8685_v42 = vld [vmem:[#allocation24_spill] sm:$0xff] }
 0x19c   : > { %v1164_v0 = vrot.slane %v1139_v11, 2  ;;  %v8686_v63 = vld [vmem:[#allocation25_spill] sm:$0xff]  ;;  %v8687_v11 = vld [vmem:[#allocation26_spill] sm:$0xff] }
 0x19d   : > { %v5726_v58 = vpop.eup %5725  ;;  %v1163_v9 = vsel %vm1162_vm5, %v1161_v47, %v1160_v52  ;;  %v8688_v52 = vld [vmem:[#allocation27_spill] sm:$0xff]  ;;  %v8690_v47 = vld [vmem:[#allocation29_spill] sm:$0xff] }
 0x19e   : > { %v1140_v1 = vmul.f32 %v5726_v58, %v5724_v49  ;;  %v1166_v2 = vsel %vm1165_vm6, %v1164_v0, %v1163_v9  ;;  %v8689_v49 = vld [vmem:[#allocation28_spill] sm:$0xff]  ;;  %v8691_v0 = vld [vmem:[#allocation30_spill] sm:$0xff]  ;;  %v8692_v58 = vld [vmem:[#allocation31_spill] sm:$0xff] }
 0x19f   : > { %v8693_v9 = vld [vmem:[#allocation32_spill] sm:$0xff] }
 0x1a0   : > { %v1167_v20 = vrot.slane %v1140_v1, 1  ;;  %v8694_v1 = vld [vmem:[#allocation33_spill] sm:$0xff] }
 0x1a2   : > { %v1169_v57 = vsel %vm1168_vm7, %v1167_v20, %v1166_v2  ;;  %v8695_v2 = vld [vmem:[#allocation34_spill] sm:$0xff]  ;;  %v8696_v20 = vld [vmem:[#allocation35_spill] sm:$0xff] }
 0x1a3   : > { %1236 = vmatmul.mubr.f32.vlgmr.msra.gmra.mrb[18].mxu0 %v1169_v57  ;;  %1307 = vmatmul.mubr.f32.vlgmr.msra.gmra.mrb[18].mxu1 %v1169_v57  ;;  %v8697_v57 = vld [vmem:[#allocation36_spill] sm:$0xff] }
 0x1a4   : > { %5129 = vmatpush1.bf16.msra.mxu0 %v6890_v24  ;;  %5161 = vmatpush1.bf16.msra.mxu1 %v6895_v28 }
 0x1a5   : > { %5131 = vmatprep.subr.bf16.mxu0 %v6899_v32  ;;  %5163 = vmatprep.subr.bf16.mxu1 %v6901_v33 }
 0x1a6   : > { %1712 = vmatprep.mubr.f32.mxu0 %v8674_v7  ;;  %1783 = vmatprep.mubr.f32.mxu1 %v8674_v7 }
 0x1a8   : > { %5133 = vmatpush1.bf16.msra.mxu0 %v6905_v37  ;;  %5165 = vmatpush1.bf16.msra.mxu1 %v6910_v41 }
 0x1a9   : > { %5135 = vmatprep.subr.bf16.mxu0 %v8675_v56  ;;  %5167 = vmatprep.subr.bf16.mxu1 %v8676_v50 }
 0x1ac   : > { %5137 = vmatpush1.bf16.msra.mxu0 %v8677_v31  ;;  %5169 = vmatpush1.bf16.msra.mxu1 %v8678_v15 }
 0x1ad   : > { %5139 = vmatprep.subr.bf16.mxu0 %v8679_v43  ;;  %5171 = vmatprep.subr.bf16.mxu1 %v8680_v60 }
 0x1b0   : > { %5141 = vmatpush1.bf16.msra.mxu0 %v8681_v3  ;;  %5173 = vmatpush1.bf16.msra.mxu1 %v8682_v16 }
 0x1b1   : > { %5143 = vmatprep.subr.bf16.mxu0 %v8683_v44  ;;  %5175 = vmatprep.subr.bf16.mxu1 %v8684_v62  ;;  %v8701_v44 = vld [vmem:[#allocation38_spill] sm:$0xff] }
 0x1b4   : > { %5145 = vmatpush1.bf16.msra.mxu0 %v8685_v42  ;;  %5177 = vmatpush1.bf16.msra.mxu1 %v8686_v63 }
 0x1b5   : > { %5147 = vmatprep.subr.bf16.mxu0 %v8687_v11  ;;  %5179 = vmatprep.subr.bf16.mxu1 %v8688_v52  ;;  %v8698_v11 = vld [vmem:[#allocation37_spill] sm:$0xff]  ;;  %v8699_v52 = vld [vmem:[#allocation11_spill] sm:$0xff] }
 0x1b8   : > { %5149 = vmatpush1.bf16.msra.mxu0 %v8689_v49  ;;  %5181 = vmatpush1.bf16.msra.mxu1 %v8690_v47  ;;  %v8700_v49 = vld [vmem:[#allocation12_spill] sm:$0xff] }
 0x1b9   : > { %5151 = vmatprep.subr.bf16.mxu0 %v8691_v0  ;;  %5183 = vmatprep.subr.bf16.mxu1 %v8692_v58 }
 0x1bc   : > { %5153 = vmatpush1.bf16.msra.mxu0 %v8693_v9  ;;  %5185 = vmatpush1.bf16.msra.mxu1 %v8694_v1 }
 0x1bd   : > { %5155 = vmatprep.subr.bf16.mxu0 %v8695_v2  ;;  %5187 = vmatprep.subr.bf16.mxu1 %v8696_v20 }
 0x1c0   : > { %5157 = vmatpush1.bf16.msra.mxu0 %v8697_v57  ;;  %5189 = vmatpush1.bf16.msra.mxu1 %v8698_v11 }
 0x1c1   : > { %5191 = vmatprep.subr.bf16.mxu0 %v8699_v52  ;;  %5223 = vmatprep.subr.bf16.mxu1 %v8700_v49 }
 0x276   : > { %v1237_v47 = vpop.f32.mrb[18].mxu0  ;;  %v7375_v0 = vpop.f32.mrb[18].mxu1 }
 0x277   : > { %v1317_v58 = vrot.slane %v1237_v47, 7  ;;  %v1321_v63 = vrot.slane %v1237_v47, 1  ;;  %v1325_v9 = vrot.slane %v1237_v47, 2  ;;  %v1329_v42 = vrot.slane %v1237_v47, 3  ;;  %v7377_v1 = vpop.f32.mrb[19].mxu0  ;;  %v7379_v2 = vpop.f32.mrb[19].mxu1 }
 0x278   : > { %v1333_v20 = vrot.slane %v1237_v47, 4  ;;  %v1337_v62 = vrot.slane %v1237_v47, 5  ;;  %v1341_v57 = vrot.slane %v1237_v47, 6  ;;  %v1381_v11 = vadd.f32 %v1237_v47, %v7112_v39 }
 0x279   : > { %v1377_v52 = vadd.f32 %v1317_v58, %v8701_v44  ;;  %v1385_v49 = vadd.f32 %v1321_v63, %v7114_v34  ;;  %v1389_v16 = vadd.f32 %v1325_v9, %v7116_v30  ;;  %v1393_v3 = vadd.f32 %v1329_v42, %v7118_v59 }
 0x27a   : > { %v1397_v60 = vadd.f32 %v1333_v20, %v7120_v29  ;;  %v1401_v43 = vadd.f32 %v1337_v62, %v7122_v21  ;;  %v4772_v15 = vmul.f32 -1.442695, %v1381_v11  ;;  %v1405_v31 = vadd.f32 %v1341_v57, %v7124_v14 }
 0x27b   : > { %v4771_v50 = vmul.f32 -1.442695, %v1377_v52  ;;  %v4773_v56 = vmul.f32 -1.442695, %v1385_v49  ;;  %v4774_v41 = vmul.f32 -1.442695, %v1389_v16 }
 0x27c   : > { %5727 = vpow2.f32 %v4772_v15  ;;  %v4775_v47 = vmul.f32 -1.442695, %v1393_v3  ;;  %v4776_v58 = vmul.f32 -1.442695, %v1397_v60  ;;  %v1319_v63 = vrot.slane %v7375_v0, 7 }
 0x27d   : > { %5729 = vpow2.f32 %v4771_v50  ;;  %v4777_v9 = vmul.f32 -1.442695, %v1401_v43  ;;  %v1323_v42 = vrot.slane %v7375_v0, 1  ;;  %v4778_v20 = vmul.f32 -1.442695, %v1405_v31 }
 0x27e   : > { %5731 = vpow2.f32 %v4773_v56  ;;  %v1327_v62 = vrot.slane %v7375_v0, 2  ;;  %v1331_v11 = vrot.slane %v7375_v0, 3  ;;  %v1379_v52 = vadd.f32 %v1319_v63, %v7142_v48 }
 0x27f   : > { %5733 = vpow2.f32 %v4774_v41  ;;  %v1383_v50 = vadd.f32 %v7375_v0, %v7153_v5  ;;  %v1387_v15 = vadd.f32 %v1323_v42, %v7158_v53  ;;  %v1335_v31 = vrot.slane %v7375_v0, 4 }
 0x280   : > { %5735 = vpow2.f32 %v4775_v47  ;;  %v1391_v56 = vadd.f32 %v1327_v62, %v7174_v10  ;;  %v1395_v41 = vadd.f32 %v1331_v11, %v7163_v46  ;;  %v1339_v60 = vrot.slane %v7375_v0, 5 }
 0x281   : > { %5737 = vpow2.f32 %v4776_v58  ;;  %v1318_v47 = vrot.slane %v7377_v1, 7  ;;  %v1399_v42 = vadd.f32 %v1335_v31, %v7210_v27  ;;  %v8702_v31 = vld [vmem:[#allocation47_spill] sm:$0xff] }
 0x282   : > { %5739 = vpow2.f32 %v4777_v9  ;;  %v1343_v9 = vrot.slane %v7375_v0, 6  ;;  %v1403_v11 = vadd.f32 %v1339_v60, %v7219_v38  ;;  %v1334_v0 = vrot.slane %v7377_v1, 4 }
 0x283   : > { %5741 = vpow2.f32 %v4778_v20  ;;  %v1338_v60 = vrot.slane %v7377_v1, 5  ;;  %v1342_v38 = vrot.slane %v7377_v1, 6 }
 0x284   : > { %5743 = vtanh.f32 %v1379_v52  ;;  %v1322_v52 = vrot.slane %v7377_v1, 1  ;;  %v1407_v27 = vadd.f32 %v1343_v9, %v7232_v8 }
 0x285   : > { %5745 = vtanh.f32 %v1383_v50 }
 0x286   : > { %v5728_v43 = vpop.eup %5727  ;;  %5747 = vtanh.f32 %v1387_v15 }
 0x287   : > { %v5730_v3 = vpop.eup %5729  ;;  %v1434_v16 = vadd.f32 1.0, %v5728_v43  ;;  %5749 = vtanh.f32 %v1391_v56  ;;  %v1326_v56 = vrot.slane %v7377_v1, 2 }
 0x288   : > { %v5732_v49 = vpop.eup %5731  ;;  %v1433_v57 = vadd.f32 1.0, %v5730_v3  ;;  %5751 = vtanh.f32 %v1395_v41  ;;  %v1330_v41 = vrot.slane %v7377_v1, 3 }
 0x289   : > { %v5734_v58 = vpop.eup %5733  ;;  %v1435_v63 = vadd.f32 1.0, %v5732_v49  ;;  %5753 = vrcp.f32 %v1434_v16  ;;  %v1378_v16 = vadd.f32 %v1318_v47, %v8702_v31  ;;  %v1390_v47 = vadd.f32 %v1326_v56, %v7197_v18 }
 0x28a   : > { %v5736_v20 = vpop.eup %5735  ;;  %v1436_v62 = vadd.f32 1.0, %v5734_v58  ;;  %5755 = vrcp.f32 %v1433_v57  ;;  %v1382_v58 = vadd.f32 %v7377_v1, %v7179_v17  ;;  %v1320_v17 = vrot.slane %v7379_v2, 7  ;;  %v8704_v1 = vld [vmem:[#allocation60_spill] sm:$0xff] }
 0x28b   : > { %v5738_v50 = vpop.eup %5737  ;;  %v1437_v15 = vadd.f32 1.0, %v5736_v20  ;;  %5757 = vrcp.f32 %v1435_v63  ;;  %v4779_v46 = vmul.f32 -1.442695, %v1378_v16  ;;  %v1324_v56 = vrot.slane %v7379_v2, 1 }
 0x28c   : > { %v5740_v43 = vpop.eup %5739  ;;  %v1438_v3 = vadd.f32 1.0, %v5738_v50  ;;  %5759 = vrcp.f32 %v1436_v62  ;;  %v1386_v50 = vadd.f32 %v1322_v52, %v7188_v13  ;;  %v4780_v52 = vmul.f32 -1.442695, %v1382_v58 }
 0x28d   : > { %v5742_v49 = vpop.eup %5741  ;;  %v1439_v57 = vadd.f32 1.0, %v5740_v43  ;;  %5761 = vrcp.f32 %v1437_v15  ;;  %v8703_v43 = vld [vmem:[#allocation56_spill] sm:$0xff] }
 0x28e   : > { %v5744_v63 = vpop.eup %5743  ;;  %v1440_v20 = vadd.f32 1.0, %v5742_v49  ;;  %5763 = vrcp.f32 %v1438_v3  ;;  %v1394_v15 = vadd.f32 %v1330_v41, %v8703_v43  ;;  %v1398_v3 = vadd.f32 %v1334_v0, %v7224_v55 }
 0x28f   : > { %v5746_v62 = vpop.eup %5745  ;;  %5765 = vrcp.f32 %v1439_v57  ;;  %v1402_v49 = vadd.f32 %v1338_v60, %v8704_v1  ;;  %v8705_v57 = vld [vmem:[#allocation62_spill] sm:$0xff]  ;;  %v4781_v8 = vmul.f32 -1.442695, %v1386_v50  ;;  %v1328_v43 = vrot.slane %v7379_v2, 2  ;;  %v8706_v60 = vld [vmem:[#allocation51_spill] sm:$0xff] }
 0x290   : > { %v5748_v31 = vpop.eup %5747  ;;  %5767 = vrcp.f32 %v1440_v20  ;;  %v1406_v9 = vadd.f32 %v1342_v38, %v8705_v57  ;;  %v4782_v20 = vmul.f32 -1.442695, %v1390_v47  ;;  %v4783_v16 = vmul.f32 -1.442695, %v1394_v15 }
 0x291   : > { %v5750_v10 = vpop.eup %5749  ;;  %5769 = vtanh.f32 %v1399_v42  ;;  %v1332_v0 = vrot.slane %v7379_v2, 3  ;;  %v1380_v58 = vadd.f32 %v1320_v17, %v8706_v60  ;;  %v4784_v38 = vmul.f32 -1.442695, %v1398_v3 }
 0x292   : > { %v5752_v13 = vpop.eup %5751  ;;  %5771 = vtanh.f32 %v1403_v11  ;;  %v4785_v15 = vmul.f32 -1.442695, %v1402_v49  ;;  %v1392_v17 = vadd.f32 %v1328_v43, %v7201_v22 }
 0x293   : > { %v5754_v41 = vpop.eup %5753  ;;  %5773 = vtanh.f32 %v1407_v27  ;;  %v1384_v27 = vadd.f32 %v7379_v2, %v7183_v25  ;;  %v4787_v3 = vmul.f32 -1.442695, %v1380_v58 }
 0x294   : > { %v5756_v18 = vpop.eup %5755  ;;  %v7424_v42 = vmul.f32 %v5754_v41, %v5746_v62  ;;  %5775 = vpow2.f32 %v4779_v46  ;;  %v1388_v62 = vadd.f32 %v1324_v56, %v7192_v35  ;;  %v4786_v41 = vmul.f32 -1.442695, %v1406_v9 }
 0x295   : > { %v5758_v11 = vpop.eup %5757  ;;  %v7428_v1 = vmul.f32 %v5756_v18, %v5744_v63  ;;  %5777 = vpow2.f32 %v4780_v52  ;;  %v1396_v63 = vadd.f32 %v1332_v0, %v7215_v19  ;;  %v4790_v9 = vmul.f32 -1.442695, %v1392_v17 }
 0x296   : > { %v5760_v50 = vpop.eup %5759  ;;  %v7432_v47 = vmul.f32 %v5758_v11, %v5748_v31  ;;  %5779 = vpow2.f32 %v4781_v8  ;;  %v4788_v8 = vmul.f32 -1.442695, %v1384_v27  ;;  %v4789_v56 = vmul.f32 -1.442695, %v1388_v62 }
 0x297   : > { %v5762_v46 = vpop.eup %5761  ;;  %5781 = vpow2.f32 %v4782_v20  ;;  %v7436_v60 = vmul.f32 %v5760_v50, %v5750_v10  ;;  %v4791_v10 = vmul.f32 -1.442695, %v1396_v63  ;;  %v1336_v0 = vrot.slane %v7379_v2, 4 }
 0x298   : > { %v5764_v18 = vpop.eup %5763  ;;  %5783 = vpow2.f32 %v4783_v16  ;;  %v7439_v52 = vmul.f32 %v5762_v46, %v5752_v13 }
 0x299   : > { %v5766_v31 = vpop.eup %5765  ;;  %5785 = vpow2.f32 %v4784_v38  ;;  %v1340_v38 = vrot.slane %v7379_v2, 5 }
 0x29a   : > { %v5768_v49 = vpop.eup %5767  ;;  %5787 = vpow2.f32 %v4785_v15 }
 0x29b   : > { %v5770_v11 = vpop.eup %5769  ;;  %5789 = vpow2.f32 %v4786_v41 }
 0x29c   : > { %v5772_v20 = vpop.eup %5771  ;;  %5791 = vpow2.f32 %v4787_v3  ;;  %v7441_v43 = vmul.f32 %v5770_v11, %v5764_v18  ;;  %v1400_v18 = vadd.f32 %v1336_v0, %v7282_v6 }
 0x29d   : > { %v5774_v16 = vpop.eup %5773  ;;  %5793 = vpow2.f32 %v4788_v8  ;;  %v7444_v13 = vmul.f32 %v5772_v20, %v5766_v31  ;;  %v1404_v31 = vadd.f32 %v1340_v38, %v7289_v12 }
 0x29e   : > { %v5776_v58 = vpop.eup %5775  ;;  %5795 = vpow2.f32 %v4789_v56  ;;  %v7447_v27 = vmul.f32 %v5774_v16, %v5768_v49  ;;  %v4792_v16 = vmul.f32 -1.442695, %v1400_v18 }
 0x29f   : > { %v5778_v50 = vpop.eup %5777  ;;  %v1481_v15 = vadd.f32 1.0, %v5776_v58  ;;  %5797 = vpow2.f32 %v4790_v9  ;;  %v1344_v9 = vrot.slane %v7379_v2, 6  ;;  %v4793_v0 = vmul.f32 -1.442695, %v1404_v31 }
 0x2a0   : > { %v5780_v62 = vpop.eup %5779  ;;  %v1482_v46 = vadd.f32 1.0, %v5778_v50  ;;  %5799 = vpow2.f32 %v4791_v10 }
 0x2a1   : > { %v5782_v41 = vpop.eup %5781  ;;  %v1483_v17 = vadd.f32 1.0, %v5780_v62  ;;  %5801 = vrcp.f32 %v1481_v15 }
 0x2a2   : > { %v5784_v63 = vpop.eup %5783  ;;  %v1484_v3 = vadd.f32 1.0, %v5782_v41  ;;  %5803 = vrcp.f32 %v1482_v46  ;;  %v1408_v46 = vadd.f32 %v1344_v9, %v7298_v26 }
 0x2a3   : > { %v5786_v8 = vpop.eup %5785  ;;  %v1485_v56 = vadd.f32 1.0, %v5784_v63  ;;  %5805 = vrcp.f32 %v1483_v17 }
 0x2a4   : > { %v5788_v49 = vpop.eup %5787  ;;  %v1486_v11 = vadd.f32 1.0, %v5786_v8  ;;  %5807 = vrcp.f32 %v1484_v3  ;;  %v1569_v3 = vrot.slane %v7303_v40, 7  ;;  %v1573_v40 = vrot.slane %v7316_v51, 7 }
 0x2a5   : > { %v5790_v20 = vpop.eup %5789  ;;  %v1487_v10 = vadd.f32 1.0, %v5788_v49  ;;  %5809 = vrcp.f32 %v1485_v56  ;;  %v1570_v56 = vrot.slane %v7306_v4, 7 }
 0x2a6   : > { %v5792_v58 = vpop.eup %5791  ;;  %v1488_v50 = vadd.f32 1.0, %v5790_v20  ;;  %5811 = vrcp.f32 %v1486_v11  ;;  %v1571_v11 = vrot.slane %v7309_v54, 7  ;;  %v4794_v20 = vmul.f32 -1.442695, %v1408_v46 }
 0x2a7   : > { %v5794_v15 = vpop.eup %5793  ;;  %5813 = vrcp.f32 %v1487_v10  ;;  %v1537_v62 = vadd.f32 1.0, %v5792_v58 }
 0x2a8   : > { %v5796_v38 = vpop.eup %5795  ;;  %5815 = vrcp.f32 %v1488_v50  ;;  %v1538_v41 = vadd.f32 1.0, %v5794_v15 }
 0x2a9   : > { %v5798_v17 = vpop.eup %5797  ;;  %5817 = vpow2.f32 %v4792_v16  ;;  %v1539_v63 = vadd.f32 1.0, %v5796_v38  ;;  %v1572_v16 = vrot.slane %v7312_v36, 7  ;;  %v1575_v36 = vrot.slane %v7324_v61, 7 }
 0x2aa   : > { %v5800_v2 = vpop.eup %5799  ;;  %5819 = vpow2.f32 %v4793_v0  ;;  %v1540_v18 = vadd.f32 1.0, %v5798_v17 }
 0x2ab   : > { %v5802_v8 = vpop.eup %5801  ;;  %v1541_v31 = vadd.f32 1.0, %v5800_v2  ;;  %5821 = vrcp.f32 %v1537_v62  ;;  %v1574_v62 = vrot.slane %v7320_v45, 7 }
 0x2ac   : > { %v5804_v49 = vpop.eup %5803  ;;  %5823 = vrcp.f32 %v1538_v41  ;;  %v1585_v9 = vmul.f32 %v5802_v8, %v1569_v3 }
 0x2ad   : > { %v5806_v10 = vpop.eup %5805  ;;  %v1586_v58 = vmul.f32 %v5804_v49, %v1570_v56  ;;  %5825 = vrcp.f32 %v1539_v63 }
 0x2ae   : > { %v5808_v50 = vpop.eup %5807  ;;  %5827 = vrcp.f32 %v1540_v18  ;;  %v1587_v0 = vmul.f32 %v5806_v10, %v1571_v11  ;;  %v7459_v4 = vadd.f32 %v7428_v1, %v1585_v9  ;;  %v1576_v1 = vrot.slane %v7328_v23, 7 }
 0x2af   : > { %v5810_v15 = vpop.eup %5809  ;;  %5829 = vrcp.f32 %v1541_v31  ;;  %v1588_v54 = vmul.f32 %v5808_v50, %v1572_v16  ;;  %v7463_v38 = vadd.f32 %v7424_v42, %v1586_v58 }
 0x2b0   : > { %v5812_v46 = vpop.eup %5811  ;;  %5831 = vpow2.f32 %v4794_v20  ;;  %v1589_v41 = vmul.f32 %v5810_v15, %v1573_v40  ;;  %v7467_v51 = vadd.f32 %v7432_v47, %v1587_v0 }
 0x2b1   : > { %v5814_v17 = vpop.eup %5813  ;;  %v1590_v63 = vmul.f32 %v5812_v46, %v1574_v62  ;;  %v7471_v2 = vadd.f32 %v7436_v60, %v1588_v54  ;;  %5833 = vtanh.f32 %v7459_v4 }
 0x2b2   : > { %v5816_v45 = vpop.eup %5815  ;;  %v1591_v42 = vmul.f32 %v5814_v17, %v1575_v36  ;;  %v7475_v3 = vadd.f32 %v7439_v52, %v1589_v41  ;;  %5835 = vtanh.f32 %v7463_v38 }
 0x2b3   : > { %v5818_v61 = vpop.eup %5817  ;;  %v1592_v18 = vmul.f32 %v5816_v45, %v1576_v1  ;;  %v7479_v47 = vadd.f32 %v7441_v43, %v1590_v63  ;;  %5837 = vtanh.f32 %v7467_v51 }
 0x2b4   : > { %v5820_v23 = vpop.eup %5819  ;;  %v1542_v8 = vadd.f32 1.0, %v5818_v61  ;;  %v7483_v60 = vadd.f32 %v7444_v13, %v1591_v42  ;;  %5839 = vtanh.f32 %v7471_v2 }
 0x2b5   : > { %v5822_v56 = vpop.eup %5821  ;;  %v1543_v31 = vadd.f32 1.0, %v5820_v23  ;;  %v7487_v52 = vadd.f32 %v7447_v27, %v1592_v18  ;;  %5841 = vtanh.f32 %v7475_v3 }
 0x2b6   : > { %v5824_v49 = vpop.eup %5823  ;;  %5843 = vrcp.f32 %v1542_v8 }
 0x2b7   : > { %v5826_v43 = vpop.eup %5825  ;;  %5845 = vrcp.f32 %v1543_v31 }
 0x2b8   : > { %v5828_v11 = vpop.eup %5827  ;;  %5847 = vtanh.f32 %v7479_v47 }
 0x2b9   : > { %v5830_v20 = vpop.eup %5829  ;;  %5849 = vtanh.f32 %v7483_v60 }
 0x2ba   : > { %v5832_v13 = vpop.eup %5831  ;;  %5851 = vtanh.f32 %v7487_v52 }
 0x2bb   : > { %v5834_v9 = vpop.eup %5833  ;;  %v1544_v10 = vadd.f32 1.0, %v5832_v13 }
 0x2bc   : > { %v5836_v16 = vpop.eup %5835  ;;  %v1617_v27 = vmul.f32 %v5834_v9, %v5822_v56 }
 0x2bd   : > { %v5838_v58 = vpop.eup %5837  ;;  %5853 = vrcp.f32 %v1544_v10  ;;  %v1618_v50 = vmul.f32 %v5836_v16, %v5824_v49 }
 0x2be   : > { %v5840_v40 = vpop.eup %5839  ;;  %v1619_v0 = vmul.f32 %v5838_v58, %v5826_v43  ;;  %v1633_v15 = vrot.slane %v1617_v27, 1  ;;  %v8707_v58 = vld [vmem:[#allocation13_spill] sm:$0xff] }
 0x2bf   : > { %v5842_v62 = vpop.eup %5841  ;;  %v1620_v54 = vmul.f32 %v5840_v40, %v5828_v11  ;;  %v8709_v40 = vld [vmem:[#allocation15_spill] sm:$0xff] }
 0x2c0   : > { %v5844_v46 = vpop.eup %5843  ;;  %v1621_v36 = vmul.f32 %v5842_v62, %v5830_v20  ;;  %v1634_v41 = vsel %vm1150_vm1, %v1618_v50, %v1633_v15  ;;  %v1635_v17 = vrot.slane %v1619_v0, 7  ;;  %v8708_v50 = vld [vmem:[#allocation14_spill] sm:$0xff]  ;;  %v8710_v0 = vld [vmem:[#allocation16_spill] sm:$0xff]  ;;  %v8711_v15 = vld [vmem:[#allocation17_spill] sm:$0xff] }
 0x2c1   : > { %v5846_v1 = vpop.eup %5845  ;;  %v1637_v63 = vrot.slane %v1620_v54, 6  ;;  %v8712_v62 = vld [vmem:[#allocation18_spill] sm:$0xff]  ;;  %v8713_v54 = vld [vmem:[#allocation19_spill] sm:$0xff] }
 0x2c2   : > { %v5848_v45 = vpop.eup %5847  ;;  %v1636_v42 = vsel %vm1153_vm2, %v1635_v17, %v1634_v41  ;;  %v1639_v61 = vrot.slane %v1621_v36, 5  ;;  %v8715_v36 = vld [vmem:[#allocation21_spill] sm:$0xff]  ;;  %v8716_v41 = vld [vmem:[#allocation22_spill] sm:$0xff]  ;;  %v8717_v17 = vld [vmem:[#allocation23_spill] sm:$0xff] }
 0x2c3   : > { %v5850_v18 = vpop.eup %5849  ;;  %v1622_v23 = vmul.f32 %v5848_v45, %v5844_v46  ;;  %v1638_v8 = vsel %vm1156_vm3, %v1637_v63, %v1636_v42  ;;  %v8714_v46 = vld [vmem:[#allocation20_spill] sm:$0xff]  ;;  %v8719_v63 = vld [vmem:[#allocation25_spill] sm:$0xff]  ;;  %v8720_v45 = vld [vmem:[#allocation26_spill] sm:$0xff] }
 0x2c4   : > { %v1623_v56 = vmul.f32 %v5850_v18, %v5846_v1  ;;  %v1640_v31 = vsel %vm1159_vm4, %v1639_v61, %v1638_v8  ;;  %v5852_v49 = vpop.eup %5851  ;;  %v8718_v1 = vld [vmem:[#allocation24_spill] sm:$0xff]  ;;  %v8721_v42 = vld [vmem:[#allocation27_spill] sm:$0xff]  ;;  %v8723_v18 = vld [vmem:[#allocation29_spill] sm:$0xff] }
 0x2c5   : > { %v1641_v43 = vrot.slane %v1622_v23, 4  ;;  %v8722_v61 = vld [vmem:[#allocation28_spill] sm:$0xff]  ;;  %v8724_v23 = vld [vmem:[#allocation30_spill] sm:$0xff]  ;;  %v8725_v8 = vld [vmem:[#allocation31_spill] sm:$0xff] }
 0x2c6   : > { %v1643_v11 = vrot.slane %v1623_v56, 3  ;;  %v8726_v56 = vld [vmem:[#allocation32_spill] sm:$0xff] }
 0x2c7   : > { %v5854_v20 = vpop.eup %5853  ;;  %v1642_v13 = vsel %vm1162_vm5, %v1641_v43, %v1640_v31  ;;  %v8727_v31 = vld [vmem:[#allocation33_spill] sm:$0xff]  ;;  %v8729_v43 = vld [vmem:[#allocation35_spill] sm:$0xff] }
 0x2c8   : > { %v1624_v9 = vmul.f32 %v5854_v20, %v5852_v49  ;;  %v1644_v10 = vsel %vm1165_vm6, %v1643_v11, %v1642_v13  ;;  %v8728_v49 = vld [vmem:[#allocation34_spill] sm:$0xff]  ;;  %v8730_v11 = vld [vmem:[#allocation36_spill] sm:$0xff]  ;;  %v8731_v20 = vld [vmem:[#allocation37_spill] sm:$0xff] }
 0x2c9   : > { %v8732_v13 = vld [vmem:[#allocation11_spill] sm:$0xff] }
 0x2ca   : > { %v1645_v16 = vrot.slane %v1624_v9, 2  ;;  %v8733_v9 = vld [vmem:[#allocation12_spill] sm:$0xff] }
 0x2cc   : > { %v1646_v27 = vsel %vm1168_vm7, %v1645_v16, %v1644_v10 }
 0x2cd   : > { %1713 = vmatmul.mubr.f32.vlgmr.msra.gmra.mrb[20].mxu0 %v1646_v27  ;;  %1784 = vmatmul.mubr.f32.vlgmr.msra.gmra.mrb[20].mxu1 %v1646_v27 }
 0x2ce   : > { %5193 = vmatpush1.bf16.msra.mxu0 %v6890_v24  ;;  %5225 = vmatpush1.bf16.msra.mxu1 %v6895_v28 }
 0x2cf   : > { %5195 = vmatprep.subr.bf16.mxu0 %v6899_v32  ;;  %5227 = vmatprep.subr.bf16.mxu1 %v6901_v33 }
 0x2d0   : > { %2189 = vmatprep.mubr.f32.mxu0 %v8674_v7  ;;  %2260 = vmatprep.mubr.f32.mxu1 %v8674_v7 }
 0x2d2   : > { %5197 = vmatpush1.bf16.msra.mxu0 %v6905_v37  ;;  %5229 = vmatpush1.bf16.msra.mxu1 %v8707_v58 }
 0x2d3   : > { %5199 = vmatprep.subr.bf16.mxu0 %v8708_v50  ;;  %5231 = vmatprep.subr.bf16.mxu1 %v8709_v40 }
 0x2d6   : > { %5201 = vmatpush1.bf16.msra.mxu0 %v8710_v0  ;;  %5233 = vmatpush1.bf16.msra.mxu1 %v8711_v15 }
 0x2d7   : > { %5203 = vmatprep.subr.bf16.mxu0 %v8712_v62  ;;  %5235 = vmatprep.subr.bf16.mxu1 %v8713_v54 }
 0x2da   : > { %5205 = vmatpush1.bf16.msra.mxu0 %v8714_v46  ;;  %5237 = vmatpush1.bf16.msra.mxu1 %v8715_v36 }
 0x2db   : > { %5207 = vmatprep.subr.bf16.mxu0 %v8716_v41  ;;  %5239 = vmatprep.subr.bf16.mxu1 %v8717_v17 }
 0x2de   : > { %5209 = vmatpush1.bf16.msra.mxu0 %v8718_v1  ;;  %5241 = vmatpush1.bf16.msra.mxu1 %v8719_v63 }
 0x2df   : > { %5211 = vmatprep.subr.bf16.mxu0 %v8720_v45  ;;  %5243 = vmatprep.subr.bf16.mxu1 %v8721_v42 }
 0x2e2   : > { %5213 = vmatpush1.bf16.msra.mxu0 %v8722_v61  ;;  %5245 = vmatpush1.bf16.msra.mxu1 %v8723_v18 }
 0x2e3   : > { %5215 = vmatprep.subr.bf16.mxu0 %v8724_v23  ;;  %5247 = vmatprep.subr.bf16.mxu1 %v8725_v8 }
 0x2e6   : > { %5217 = vmatpush1.bf16.msra.mxu0 %v8726_v56  ;;  %5249 = vmatpush1.bf16.msra.mxu1 %v8727_v31 }
 0x2e7   : > { %5219 = vmatprep.subr.bf16.mxu0 %v8728_v49  ;;  %5251 = vmatprep.subr.bf16.mxu1 %v8729_v43 }
 0x2ea   : > { %5221 = vmatpush1.bf16.msra.mxu0 %v8730_v11  ;;  %5253 = vmatpush1.bf16.msra.mxu1 %v8731_v20 }
 0x2eb   : > { %5255 = vmatprep.subr.bf16.mxu0 %v8732_v13  ;;  %5287 = vmatprep.subr.bf16.mxu1 %v8733_v9 }
 0x3a0   : > { %v1714_v10 = vpop.f32.mrb[20].mxu0  ;;  %v7534_v16 = vpop.f32.mrb[20].mxu1 }
 0x3a1   : > { %v1794_v27 = vrot.slane %v1714_v10, 6  ;;  %v1798_v8 = vrot.slane %v1714_v10, 7  ;;  %v1802_v56 = vrot.slane %v1714_v10, 1  ;;  %v1806_v23 = vrot.slane %v1714_v10, 2  ;;  %v7536_v31 = vpop.f32.mrb[21].mxu0  ;;  %v7538_v49 = vpop.f32.mrb[21].mxu1 }
 0x3a2   : > { %v1810_v43 = vrot.slane %v1714_v10, 3  ;;  %v1814_v18 = vrot.slane %v1714_v10, 4  ;;  %v1818_v11 = vrot.slane %v1714_v10, 5  ;;  %v1862_v20 = vadd.f32 %v1714_v10, %v7114_v34 }
 0x3a3   : > { %v1854_v13 = vadd.f32 %v1794_v27, %v8701_v44  ;;  %v1858_v9 = vadd.f32 %v1798_v8, %v7112_v39  ;;  %v1866_v61 = vadd.f32 %v1802_v56, %v7116_v30  ;;  %v1870_v42 = vadd.f32 %v1806_v23, %v7118_v59 }
 0x3a4   : > { %v1874_v45 = vadd.f32 %v1810_v43, %v7120_v29  ;;  %v1878_v63 = vadd.f32 %v1814_v18, %v7122_v21  ;;  %v4797_v1 = vmul.f32 -1.442695, %v1862_v20  ;;  %v1882_v17 = vadd.f32 %v1818_v11, %v7124_v14  ;;  %v8741_v14 = vld [vmem:[#allocation61_spill] sm:$0xff] }
 0x3a5   : > { %v4795_v41 = vmul.f32 -1.442695, %v1854_v13  ;;  %v4796_v36 = vmul.f32 -1.442695, %v1858_v9  ;;  %v4798_v46 = vmul.f32 -1.442695, %v1866_v61 }
 0x3a6   : > { %5855 = vpow2.f32 %v4797_v1  ;;  %v4799_v10 = vmul.f32 -1.442695, %v1870_v42  ;;  %v4800_v27 = vmul.f32 -1.442695, %v1874_v45  ;;  %v1796_v8 = vrot.slane %v7534_v16, 6  ;;  %v8734_v45 = vld [vmem:[#allocation52_spill] sm:$0xff] }
 0x3a7   : > { %5857 = vpow2.f32 %v4795_v41  ;;  %v1800_v56 = vrot.slane %v7534_v16, 7  ;;  %v4801_v23 = vmul.f32 -1.442695, %v1878_v63  ;;  %v4802_v43 = vmul.f32 -1.442695, %v1882_v17  ;;  %v8735_v63 = vld [vmem:[#allocation50_spill] sm:$0xff] }
 0x3a8   : > { %5859 = vpow2.f32 %v4796_v36  ;;  %v1804_v18 = vrot.slane %v7534_v16, 1  ;;  %v1808_v11 = vrot.slane %v7534_v16, 2  ;;  %v1856_v20 = vadd.f32 %v1796_v8, %v7142_v48  ;;  %v8740_v48 = vld [vmem:[#allocation54_spill] sm:$0xff] }
 0x3a9   : > { %5861 = vpow2.f32 %v4798_v46  ;;  %v1860_v1 = vadd.f32 %v1800_v56, %v7153_v5  ;;  %v1864_v41 = vadd.f32 %v7534_v16, %v7158_v53  ;;  %v1812_v42 = vrot.slane %v7534_v16, 3  ;;  %v8738_v53 = vld [vmem:[#allocation47_spill] sm:$0xff] }
 0x3aa   : > { %5863 = vpow2.f32 %v4799_v10  ;;  %v1868_v36 = vadd.f32 %v1804_v18, %v8734_v45  ;;  %v1872_v46 = vadd.f32 %v1808_v11, %v8735_v63  ;;  %v1816_v61 = vrot.slane %v7534_v16, 4  ;;  %v8737_v63 = vld [vmem:[#allocation58_spill] sm:$0xff] }
 0x3ab   : > { %5865 = vpow2.f32 %v4800_v27  ;;  %v1795_v8 = vrot.slane %v7536_v31, 6  ;;  %v1799_v18 = vrot.slane %v7536_v31, 7 }
 0x3ac   : > { %5867 = vpow2.f32 %v4801_v23 }
 0x3ad   : > { %5869 = vpow2.f32 %v4802_v43  ;;  %v1820_v43 = vrot.slane %v7534_v16, 5  ;;  %v1811_v16 = vrot.slane %v7536_v31, 3  ;;  %v1855_v5 = vadd.f32 %v1795_v8, %v8738_v53  ;;  %v8742_v8 = vld [vmem:[#allocation55_spill] sm:$0xff] }
 0x3ae   : > { %5871 = vtanh.f32 %v1856_v20 }
 0x3af   : > { %5873 = vtanh.f32 %v1860_v1  ;;  %v8736_v1 = vld [vmem:[#allocation57_spill] sm:$0xff]  ;;  %v1884_v21 = vadd.f32 %v1820_v43, %v8741_v14  ;;  %v4803_v59 = vmul.f32 -1.442695, %v1855_v5 }
 0x3b0   : > { %v5856_v17 = vpop.eup %5855  ;;  %5875 = vtanh.f32 %v1864_v41  ;;  %v1876_v41 = vadd.f32 %v1812_v42, %v8736_v1  ;;  %v1815_v42 = vrot.slane %v7536_v31, 4  ;;  %v1819_v1 = vrot.slane %v7536_v31, 5 }
 0x3b1   : > { %v5858_v13 = vpop.eup %5857  ;;  %v1912_v9 = vadd.f32 1.0, %v5856_v17  ;;  %5877 = vtanh.f32 %v1868_v36  ;;  %v1880_v17 = vadd.f32 %v1816_v61, %v8737_v63  ;;  %v8739_v61 = vld [vmem:[#allocation53_spill] sm:$0xff] }
 0x3b2   : > { %v5860_v10 = vpop.eup %5859  ;;  %v1910_v27 = vadd.f32 1.0, %v5858_v13  ;;  %5879 = vtanh.f32 %v1872_v46  ;;  %v1803_v46 = vrot.slane %v7536_v31, 1  ;;  %v1807_v13 = vrot.slane %v7536_v31, 2 }
 0x3b3   : > { %v5862_v56 = vpop.eup %5861  ;;  %v1911_v23 = vadd.f32 1.0, %v5860_v10  ;;  %5881 = vrcp.f32 %v1912_v9  ;;  %v1859_v63 = vadd.f32 %v1799_v18, %v8739_v61  ;;  %v1797_v18 = vrot.slane %v7538_v49, 6 }
 0x3b4   : > { %v5864_v11 = vpop.eup %5863  ;;  %v1913_v20 = vadd.f32 1.0, %v5862_v56  ;;  %5883 = vrcp.f32 %v1910_v27  ;;  %v1867_v53 = vadd.f32 %v1803_v46, %v8742_v8  ;;  %v1883_v46 = vadd.f32 %v1819_v1, %v8705_v57 }
 0x3b5   : > { %v5866_v36 = vpop.eup %5865  ;;  %v1914_v45 = vadd.f32 1.0, %v5864_v11  ;;  %5885 = vrcp.f32 %v1911_v23  ;;  %v4804_v61 = vmul.f32 -1.442695, %v1859_v63  ;;  %v1809_v63 = vrot.slane %v7538_v49, 2 }
 0x3b6   : > { %v5868_v10 = vpop.eup %5867  ;;  %v1915_v9 = vadd.f32 1.0, %v5866_v36  ;;  %5887 = vrcp.f32 %v1913_v20  ;;  %v1863_v36 = vadd.f32 %v7536_v31, %v8740_v48  ;;  %v1801_v31 = vrot.slane %v7538_v49, 7 }
 0x3b7   : > { %v5870_v56 = vpop.eup %5869  ;;  %v1916_v27 = vadd.f32 1.0, %v5868_v10  ;;  %5889 = vrcp.f32 %v1914_v45  ;;  %v8743_v10 = vld [vmem:[#allocation56_spill] sm:$0xff] }
 0x3b8   : > { %v5872_v11 = vpop.eup %5871  ;;  %v1917_v23 = vadd.f32 1.0, %v5870_v56  ;;  %5891 = vrcp.f32 %v1915_v9  ;;  %v1871_v45 = vadd.f32 %v1807_v13, %v8743_v10  ;;  %v1875_v9 = vadd.f32 %v1811_v16, %v7224_v55  ;;  %v8745_v16 = vld [vmem:[#allocation51_spill] sm:$0xff] }
 0x3b9   : > { %v5874_v20 = vpop.eup %5873  ;;  %5893 = vrcp.f32 %v1916_v27  ;;  %v8744_v27 = vld [vmem:[#allocation60_spill] sm:$0xff]  ;;  %v4805_v8 = vmul.f32 -1.442695, %v1863_v36  ;;  %v1805_v10 = vrot.slane %v7538_v49, 1  ;;  %v1857_v55 = vadd.f32 %v1797_v18, %v8745_v16 }
 0x3ba   : > { %v5876_v29 = vpop.eup %5875  ;;  %5895 = vrcp.f32 %v1917_v23  ;;  %v1879_v43 = vadd.f32 %v1815_v42, %v8744_v27  ;;  %v4806_v23 = vmul.f32 -1.442695, %v1867_v53  ;;  %v4807_v5 = vmul.f32 -1.442695, %v1871_v45 }
 0x3bb   : > { %v5878_v56 = vpop.eup %5877  ;;  %5897 = vtanh.f32 %v1876_v41  ;;  %v4808_v1 = vmul.f32 -1.442695, %v1875_v9  ;;  %v1861_v42 = vadd.f32 %v1801_v31, %v7183_v25  ;;  %v4810_v45 = vmul.f32 -1.442695, %v1883_v46 }
 0x3bc   : > { %v5880_v48 = vpop.eup %5879  ;;  %5899 = vtanh.f32 %v1880_v17  ;;  %v4809_v36 = vmul.f32 -1.442695, %v1879_v43  ;;  %v1869_v18 = vadd.f32 %v1805_v10, %v7201_v22 }
 0x3bd   : > { %v5882_v13 = vpop.eup %5881  ;;  %5901 = vtanh.f32 %v1884_v21 }
 0x3be   : > { %v5884_v14 = vpop.eup %5883  ;;  %v7583_v41 = vmul.f32 %v5882_v13, %v5876_v29  ;;  %5903 = vpow2.f32 %v4803_v59  ;;  %v1865_v29 = vadd.f32 %v7538_v49, %v7192_v35  ;;  %v4814_v46 = vmul.f32 -1.442695, %v1869_v18 }
 0x3bf   : > { %v5886_v17 = vpop.eup %5885  ;;  %v7587_v34 = vmul.f32 %v5884_v14, %v5872_v11  ;;  %5905 = vpow2.f32 %v4804_v61  ;;  %v1873_v61 = vadd.f32 %v1809_v63, %v7215_v19  ;;  %v4811_v11 = vmul.f32 -1.442695, %v1857_v55 }
 0x3c0   : > { %v5888_v21 = vpop.eup %5887  ;;  %v7590_v53 = vmul.f32 %v5886_v17, %v5874_v20  ;;  %5907 = vpow2.f32 %v4805_v8  ;;  %v4812_v8 = vmul.f32 -1.442695, %v1861_v42  ;;  %v4813_v43 = vmul.f32 -1.442695, %v1865_v29 }
 0x3c1   : > { %v5890_v59 = vpop.eup %5889  ;;  %5909 = vpow2.f32 %v4806_v23  ;;  %v7595_v13 = vmul.f32 %v5888_v21, %v5878_v56  ;;  %v4815_v10 = vmul.f32 -1.442695, %v1873_v61  ;;  %v1813_v63 = vrot.slane %v7538_v49, 3 }
 0x3c2   : > { %v5892_v14 = vpop.eup %5891  ;;  %5911 = vpow2.f32 %v4807_v5  ;;  %v7598_v9 = vmul.f32 %v5890_v59, %v5880_v48 }
 0x3c3   : > { %v5894_v20 = vpop.eup %5893  ;;  %5913 = vpow2.f32 %v4808_v1  ;;  %v1817_v1 = vrot.slane %v7538_v49, 4 }
 0x3c4   : > { %v5896_v31 = vpop.eup %5895  ;;  %5915 = vpow2.f32 %v4809_v36 }
 0x3c5   : > { %v5898_v17 = vpop.eup %5897  ;;  %5917 = vpow2.f32 %v4810_v45 }
 0x3c6   : > { %v5900_v23 = vpop.eup %5899  ;;  %5919 = vpow2.f32 %v4811_v11  ;;  %v7600_v56 = vmul.f32 %v5898_v17, %v5892_v14  ;;  %v1877_v14 = vadd.f32 %v1813_v63, %v7282_v6 }
 0x3c7   : > { %v5902_v5 = vpop.eup %5901  ;;  %5921 = vpow2.f32 %v4812_v8  ;;  %v7603_v48 = vmul.f32 %v5900_v23, %v5894_v20  ;;  %v1881_v20 = vadd.f32 %v1817_v1, %v7289_v12 }
 0x3c8   : > { %v5904_v55 = vpop.eup %5903  ;;  %5923 = vpow2.f32 %v4813_v43  ;;  %v7606_v42 = vmul.f32 %v5902_v5, %v5896_v31  ;;  %v4816_v5 = vmul.f32 -1.442695, %v1877_v14 }
 0x3c9   : > { %v5906_v21 = vpop.eup %5905  ;;  %v1958_v36 = vadd.f32 1.0, %v5904_v55  ;;  %5925 = vpow2.f32 %v4814_v46  ;;  %v1821_v46 = vrot.slane %v7538_v49, 5  ;;  %v4817_v63 = vmul.f32 -1.442695, %v1881_v20 }
 0x3ca   : > { %v5908_v29 = vpop.eup %5907  ;;  %v1959_v59 = vadd.f32 1.0, %v5906_v21  ;;  %5927 = vpow2.f32 %v4815_v10 }
 0x3cb   : > { %v5910_v45 = vpop.eup %5909  ;;  %v1960_v18 = vadd.f32 1.0, %v5908_v29  ;;  %5929 = vrcp.f32 %v1958_v36 }
 0x3cc   : > { %v5912_v61 = vpop.eup %5911  ;;  %v1961_v11 = vadd.f32 1.0, %v5910_v45  ;;  %5931 = vrcp.f32 %v1959_v59  ;;  %v1885_v59 = vadd.f32 %v1821_v46, %v7298_v26 }
 0x3cd   : > { %v5914_v8 = vpop.eup %5913  ;;  %v1962_v43 = vadd.f32 1.0, %v5912_v61  ;;  %5933 = vrcp.f32 %v1960_v18 }
 0x3ce   : > { %v5916_v31 = vpop.eup %5915  ;;  %v1963_v17 = vadd.f32 1.0, %v5914_v8  ;;  %5935 = vrcp.f32 %v1961_v11  ;;  %v2046_v11 = vrot.slane %v7459_v4, 7  ;;  %v2050_v4 = vrot.slane %v7475_v3, 7 }
 0x3cf   : > { %v5918_v23 = vpop.eup %5917  ;;  %v1964_v10 = vadd.f32 1.0, %v5916_v31  ;;  %5937 = vrcp.f32 %v1962_v43  ;;  %v2047_v43 = vrot.slane %v7463_v38, 7 }
 0x3d0   : > { %v5920_v55 = vpop.eup %5919  ;;  %v1965_v21 = vadd.f32 1.0, %v5918_v23  ;;  %5939 = vrcp.f32 %v1963_v17  ;;  %v2048_v17 = vrot.slane %v7467_v51, 7  ;;  %v4818_v23 = vmul.f32 -1.442695, %v1885_v59 }
 0x3d1   : > { %v5922_v36 = vpop.eup %5921  ;;  %5941 = vrcp.f32 %v1964_v10  ;;  %v2014_v29 = vadd.f32 1.0, %v5920_v55 }
 0x3d2   : > { %v5924_v1 = vpop.eup %5923  ;;  %5943 = vrcp.f32 %v1965_v21  ;;  %v2015_v45 = vadd.f32 1.0, %v5922_v36 }
 0x3d3   : > { %v5926_v18 = vpop.eup %5925  ;;  %5945 = vpow2.f32 %v4816_v5  ;;  %v2016_v61 = vadd.f32 1.0, %v5924_v1  ;;  %v2049_v5 = vrot.slane %v7471_v2, 7  ;;  %v2052_v2 = vrot.slane %v7483_v60, 7 }
 0x3d4   : > { %v5928_v49 = vpop.eup %5927  ;;  %5947 = vpow2.f32 %v4817_v63  ;;  %v2017_v14 = vadd.f32 1.0, %v5926_v18 }
 0x3d5   : > { %v5930_v8 = vpop.eup %5929  ;;  %v2018_v20 = vadd.f32 1.0, %v5928_v49  ;;  %5949 = vrcp.f32 %v2014_v29  ;;  %v2051_v29 = vrot.slane %v7479_v47, 7 }
 0x3d6   : > { %v5932_v31 = vpop.eup %5931  ;;  %5951 = vrcp.f32 %v2015_v45  ;;  %v2062_v46 = vmul.f32 %v5930_v8, %v2046_v11 }
 0x3d7   : > { %v5934_v10 = vpop.eup %5933  ;;  %5953 = vrcp.f32 %v2016_v61  ;;  %v2063_v55 = vmul.f32 %v5932_v31, %v2047_v43 }
 0x3d8   : > { %v5936_v21 = vpop.eup %5935  ;;  %5955 = vrcp.f32 %v2017_v14  ;;  %v2064_v63 = vmul.f32 %v5934_v10, %v2048_v17  ;;  %v7618_v38 = vadd.f32 %v7587_v34, %v2062_v46  ;;  %v2053_v34 = vrot.slane %v7487_v52, 7 }
 0x3d9   : > { %v5938_v36 = vpop.eup %5937  ;;  %5957 = vrcp.f32 %v2018_v20  ;;  %v2065_v51 = vmul.f32 %v5936_v21, %v2049_v5  ;;  %v7622_v1 = vadd.f32 %v7590_v53, %v2063_v55 }
 0x3da   : > { %v5940_v59 = vpop.eup %5939  ;;  %5959 = vpow2.f32 %v4818_v23  ;;  %v2066_v45 = vmul.f32 %v5938_v36, %v2050_v4  ;;  %v7626_v3 = vadd.f32 %v7583_v41, %v2064_v63 }
 0x3db   : > { %v5942_v18 = vpop.eup %5941  ;;  %v2067_v61 = vmul.f32 %v5940_v59, %v2051_v29  ;;  %v7630_v49 = vadd.f32 %v7595_v13, %v2065_v51  ;;  %5961 = vtanh.f32 %v7618_v38 }
 0x3dc   : > { %v5944_v47 = vpop.eup %5943  ;;  %v2068_v53 = vmul.f32 %v5942_v18, %v2052_v2  ;;  %v7634_v11 = vadd.f32 %v7598_v9, %v2066_v45  ;;  %5963 = vtanh.f32 %v7622_v1 }
 0x3dd   : > { %v5946_v60 = vpop.eup %5945  ;;  %v2069_v14 = vmul.f32 %v5944_v47, %v2053_v34  ;;  %v7638_v41 = vadd.f32 %v7600_v56, %v2067_v61  ;;  %5965 = vtanh.f32 %v7626_v3 }
 0x3de   : > { %v5948_v52 = vpop.eup %5947  ;;  %v2019_v8 = vadd.f32 1.0, %v5946_v60  ;;  %v7642_v13 = vadd.f32 %v7603_v48, %v2068_v53  ;;  %5967 = vtanh.f32 %v7630_v49 }
 0x3df   : > { %v5950_v43 = vpop.eup %5949  ;;  %v2020_v20 = vadd.f32 1.0, %v5948_v52  ;;  %v7646_v9 = vadd.f32 %v7606_v42, %v2069_v14  ;;  %5969 = vtanh.f32 %v7634_v11 }
 0x3e0   : > { %v5952_v31 = vpop.eup %5951  ;;  %5971 = vrcp.f32 %v2019_v8 }
 0x3e1   : > { %v5954_v56 = vpop.eup %5953  ;;  %5973 = vrcp.f32 %v2020_v20 }
 0x3e2   : > { %v5956_v17 = vpop.eup %5955  ;;  %5975 = vtanh.f32 %v7638_v41 }
 0x3e3   : > { %v5958_v23 = vpop.eup %5957  ;;  %5977 = vtanh.f32 %v7642_v13 }
 0x3e4   : > { %v5960_v48 = vpop.eup %5959  ;;  %5979 = vtanh.f32 %v7646_v9 }
 0x3e5   : > { %v5962_v46 = vpop.eup %5961  ;;  %v2021_v10 = vadd.f32 1.0, %v5960_v48 }
 0x3e6   : > { %v5964_v5 = vpop.eup %5963  ;;  %v2094_v42 = vmul.f32 %v5962_v46, %v5950_v43 }
 0x3e7   : > { %v5966_v55 = vpop.eup %5965  ;;  %5981 = vrcp.f32 %v2021_v10  ;;  %v2095_v21 = vmul.f32 %v5964_v5, %v5952_v31 }
 0x3e8   : > { %v5968_v4 = vpop.eup %5967  ;;  %v2096_v63 = vmul.f32 %v5966_v55, %v5954_v56  ;;  %v2110_v36 = vrot.slane %v2094_v42, 2  ;;  %v8746_v55 = vld [vmem:[#allocation20_spill] sm:$0xff] }
 0x3e9   : > { %v5970_v29 = vpop.eup %5969  ;;  %v2097_v51 = vmul.f32 %v5968_v4, %v5956_v17  ;;  %v2111_v59 = vrot.slane %v2095_v21, 1  ;;  %v8747_v21 = vld [vmem:[#allocation21_spill] sm:$0xff]  ;;  %v8748_v4 = vld [vmem:[#allocation22_spill] sm:$0xff] }
 0x3ea   : > { %v5972_v2 = vpop.eup %5971  ;;  %v2098_v45 = vmul.f32 %v5970_v29, %v5958_v23  ;;  %v8751_v29 = vld [vmem:[#allocation25_spill] sm:$0xff] }
 0x3eb   : > { %v5974_v18 = vpop.eup %5973  ;;  %v2112_v34 = vsel %vm1150_vm1, %v2111_v59, %v2110_v36  ;;  %v2114_v61 = vrot.slane %v2097_v51, 7  ;;  %v8750_v36 = vld [vmem:[#allocation24_spill] sm:$0xff]  ;;  %v8752_v51 = vld [vmem:[#allocation26_spill] sm:$0xff]  ;;  %v8753_v59 = vld [vmem:[#allocation27_spill] sm:$0xff] }
 0x3ec   : > { %v5976_v47 = vpop.eup %5975  ;;  %v2113_v53 = vsel %vm1153_vm2, %v2096_v63, %v2112_v34  ;;  %v2116_v60 = vrot.slane %v2098_v45, 6  ;;  %v8749_v63 = vld [vmem:[#allocation23_spill] sm:$0xff]  ;;  %v8755_v45 = vld [vmem:[#allocation29_spill] sm:$0xff] }
 0x3ed   : > { %v5978_v14 = vpop.eup %5977  ;;  %v2099_v52 = vmul.f32 %v5976_v47, %v5972_v2  ;;  %v2115_v8 = vsel %vm1156_vm3, %v2114_v61, %v2113_v53  ;;  %v8754_v2 = vld [vmem:[#allocation28_spill] sm:$0xff]  ;;  %v8757_v34 = vld [vmem:[#allocation31_spill] sm:$0xff]  ;;  %v8759_v47 = vld [vmem:[#allocation33_spill] sm:$0xff] }
 0x3ee   : > { %v2100_v43 = vmul.f32 %v5978_v14, %v5974_v18  ;;  %v2117_v20 = vsel %vm1159_vm4, %v2116_v60, %v2115_v8  ;;  %v5980_v31 = vpop.eup %5979  ;;  %v8756_v18 = vld [vmem:[#allocation30_spill] sm:$0xff]  ;;  %v8758_v61 = vld [vmem:[#allocation32_spill] sm:$0xff]  ;;  %v8761_v60 = vld [vmem:[#allocation35_spill] sm:$0xff] }
 0x3ef   : > { %v2118_v56 = vrot.slane %v2099_v52, 5  ;;  %v8760_v53 = vld [vmem:[#allocation34_spill] sm:$0xff]  ;;  %v8762_v14 = vld [vmem:[#allocation36_spill] sm:$0xff]  ;;  %v8763_v52 = vld [vmem:[#allocation37_spill] sm:$0xff] }
 0x3f0   : > { %v2120_v17 = vrot.slane %v2100_v43, 4  ;;  %v8764_v8 = vld [vmem:[#allocation11_spill] sm:$0xff]  ;;  %v8765_v43 = vld [vmem:[#allocation12_spill] sm:$0xff] }
 0x3f1   : > { %v5982_v48 = vpop.eup %5981  ;;  %v2119_v23 = vsel %vm1162_vm5, %v2118_v56, %v2117_v20 }
 0x3f2   : > { %v2101_v46 = vmul.f32 %v5982_v48, %v5980_v31  ;;  %v2121_v10 = vsel %vm1165_vm6, %v2120_v17, %v2119_v23 }
 0x3f4   : > { %v2122_v5 = vrot.slane %v2101_v46, 3 }
 0x3f6   : > { %v2123_v42 = vsel %vm1168_vm7, %v2122_v5, %v2121_v10 }
 0x3f7   : > { %2190 = vmatmul.mubr.f32.vlgmr.msra.gmra.mrb[22].mxu0 %v2123_v42  ;;  %2261 = vmatmul.mubr.f32.vlgmr.msra.gmra.mrb[22].mxu1 %v2123_v42 }
 0x3f8   : > { %5257 = vmatpush1.bf16.msra.mxu0 %v6890_v24  ;;  %5289 = vmatpush1.bf16.msra.mxu1 %v6895_v28 }
 0x3f9   : > { %5259 = vmatprep.subr.bf16.mxu0 %v6899_v32  ;;  %5291 = vmatprep.subr.bf16.mxu1 %v6901_v33 }
 0x3fa   : > { %2666 = vmatprep.mubr.f32.mxu0 %v8674_v7  ;;  %2737 = vmatprep.mubr.f32.mxu1 %v8674_v7 }
 0x3fc   : > { %5261 = vmatpush1.bf16.msra.mxu0 %v6905_v37  ;;  %5293 = vmatpush1.bf16.msra.mxu1 %v8707_v58 }
 0x3fd   : > { %5263 = vmatprep.subr.bf16.mxu0 %v8708_v50  ;;  %5295 = vmatprep.subr.bf16.mxu1 %v8709_v40 }
 0x400   : > { %5265 = vmatpush1.bf16.msra.mxu0 %v8710_v0  ;;  %5297 = vmatpush1.bf16.msra.mxu1 %v8711_v15 }
 0x401   : > { %5267 = vmatprep.subr.bf16.mxu0 %v8712_v62  ;;  %5299 = vmatprep.subr.bf16.mxu1 %v8713_v54 }
 0x404   : > { %5269 = vmatpush1.bf16.msra.mxu0 %v8746_v55  ;;  %5301 = vmatpush1.bf16.msra.mxu1 %v8747_v21 }
 0x405   : > { %5271 = vmatprep.subr.bf16.mxu0 %v8748_v4  ;;  %5303 = vmatprep.subr.bf16.mxu1 %v8749_v63 }
 0x408   : > { %5273 = vmatpush1.bf16.msra.mxu0 %v8750_v36  ;;  %5305 = vmatpush1.bf16.msra.mxu1 %v8751_v29 }
 0x409   : > { %5275 = vmatprep.subr.bf16.mxu0 %v8752_v51  ;;  %5307 = vmatprep.subr.bf16.mxu1 %v8753_v59  ;;  %v8770_v51 = vld [vmem:[#allocation45_spill] sm:$0xff] }
 0x40c   : > { %5277 = vmatpush1.bf16.msra.mxu0 %v8754_v2  ;;  %5309 = vmatpush1.bf16.msra.mxu1 %v8755_v45  ;;  %v8769_v45 = vld [vmem:[#allocation44_spill] sm:$0xff] }
 0x40d   : > { %5279 = vmatprep.subr.bf16.mxu0 %v8756_v18  ;;  %5311 = vmatprep.subr.bf16.mxu1 %v8757_v34  ;;  %v8768_v34 = vld [vmem:[#allocation43_spill] sm:$0xff] }
 0x410   : > { %5281 = vmatpush1.bf16.msra.mxu0 %v8758_v61  ;;  %5313 = vmatpush1.bf16.msra.mxu1 %v8759_v47  ;;  %v8767_v47 = vld [vmem:[#allocation42_spill] sm:$0xff] }
 0x411   : > { %5283 = vmatprep.subr.bf16.mxu0 %v8760_v53  ;;  %5315 = vmatprep.subr.bf16.mxu1 %v8761_v60  ;;  %v8766_v60 = vld [vmem:[#allocation40_spill] sm:$0xff] }
 0x414   : > { %5285 = vmatpush1.bf16.msra.mxu0 %v8762_v14  ;;  %5317 = vmatpush1.bf16.msra.mxu1 %v8763_v52 }
 0x415   : > { %5319 = vmatprep.subr.bf16.mxu0 %v8764_v8  ;;  %5351 = vmatprep.subr.bf16.mxu1 %v8765_v43 }
 0x4ca   : > { %v2191_v20 = vpop.f32.mrb[22].mxu0  ;;  %v7693_v31 = vpop.f32.mrb[22].mxu1 }
 0x4cb   : > { %v2271_v56 = vrot.slane %v2191_v20, 5  ;;  %v2275_v17 = vrot.slane %v2191_v20, 6  ;;  %v2279_v48 = vrot.slane %v2191_v20, 7  ;;  %v2283_v23 = vrot.slane %v2191_v20, 1  ;;  %v7695_v46 = vpop.f32.mrb[23].mxu0  ;;  %v7697_v10 = vpop.f32.mrb[23].mxu1 }
 0x4cc   : > { %v2287_v5 = vrot.slane %v2191_v20, 2  ;;  %v2291_v42 = vrot.slane %v2191_v20, 3  ;;  %v2295_v14 = vrot.slane %v2191_v20, 4  ;;  %v2343_v52 = vadd.f32 %v2191_v20, %v7116_v30 }
 0x4cd   : > { %v2331_v8 = vadd.f32 %v2271_v56, %v8701_v44  ;;  %v2335_v43 = vadd.f32 %v2275_v17, %v7112_v39  ;;  %v2339_v53 = vadd.f32 %v2279_v48, %v8766_v60  ;;  %v2347_v61 = vadd.f32 %v2283_v23, %v8767_v47 }
 0x4ce   : > { %v2351_v18 = vadd.f32 %v2287_v5, %v8768_v34  ;;  %v2355_v2 = vadd.f32 %v2291_v42, %v8769_v45  ;;  %v4822_v59 = vmul.f32 -1.442695, %v2343_v52  ;;  %v2359_v29 = vadd.f32 %v2295_v14, %v8770_v51  ;;  %v8771_v52 = vld [vmem:[#allocation46_spill] sm:$0xff]  ;;  %v8779_v45 = vld [vmem:[#allocation47_spill] sm:$0xff] }
 0x4cf   : > { %v4819_v36 = vmul.f32 -1.442695, %v2331_v8  ;;  %v4820_v63 = vmul.f32 -1.442695, %v2335_v43  ;;  %v4821_v4 = vmul.f32 -1.442695, %v2339_v53 }
 0x4d0   : > { %5983 = vpow2.f32 %v4822_v59  ;;  %v4823_v20 = vmul.f32 -1.442695, %v2347_v61  ;;  %v4824_v56 = vmul.f32 -1.442695, %v2351_v18  ;;  %v2273_v17 = vrot.slane %v7693_v31, 5  ;;  %v8772_v59 = vld [vmem:[#allocation48_spill] sm:$0xff] }
 0x4d1   : > { %5985 = vpow2.f32 %v4819_v36  ;;  %v2277_v48 = vrot.slane %v7693_v31, 6  ;;  %v4825_v23 = vmul.f32 -1.442695, %v2355_v2  ;;  %v2281_v5 = vrot.slane %v7693_v31, 7  ;;  %v8773_v36 = vld [vmem:[#allocation49_spill] sm:$0xff]  ;;  %v8774_v53 = vld [vmem:[#allocation52_spill] sm:$0xff] }
 0x4d2   : > { %5987 = vpow2.f32 %v4820_v63  ;;  %v4826_v42 = vmul.f32 -1.442695, %v2359_v29  ;;  %v2285_v14 = vrot.slane %v7693_v31, 1  ;;  %v2333_v8 = vadd.f32 %v2273_v17, %v8771_v52  ;;  %v8775_v2 = vld [vmem:[#allocation50_spill] sm:$0xff] }
 0x4d3   : > { %5989 = vpow2.f32 %v4821_v4  ;;  %v2337_v61 = vadd.f32 %v2277_v48, %v8772_v59  ;;  %v2341_v18 = vadd.f32 %v2281_v5, %v8773_v36  ;;  %v2345_v63 = vadd.f32 %v7693_v31, %v8774_v53 }
 0x4d4   : > { %5991 = vpow2.f32 %v4823_v20  ;;  %v2349_v43 = vadd.f32 %v2285_v14, %v8775_v2  ;;  %v2289_v29 = vrot.slane %v7693_v31, 2  ;;  %v2297_v5 = vrot.slane %v7693_v31, 4 }
 0x4d5   : > { %5993 = vpow2.f32 %v4824_v56  ;;  %v2293_v56 = vrot.slane %v7693_v31, 3  ;;  %v2280_v36 = vrot.slane %v7695_v46, 7 }
 0x4d6   : > { %5995 = vpow2.f32 %v4825_v23 }
 0x4d7   : > { %5997 = vpow2.f32 %v4826_v42  ;;  %v2272_v42 = vrot.slane %v7695_v46, 5 }
 0x4d8   : > { %5999 = vtanh.f32 %v2333_v8  ;;  %v2276_v8 = vrot.slane %v7695_v46, 6 }
 0x4d9   : > { %6001 = vtanh.f32 %v2337_v61  ;;  %v2332_v34 = vadd.f32 %v2272_v42, %v8779_v45 }
 0x4da   : > { %v5984_v4 = vpop.eup %5983  ;;  %6003 = vtanh.f32 %v2341_v18  ;;  %v8776_v18 = vld [vmem:[#allocation57_spill] sm:$0xff] }
 0x4db   : > { %v5986_v20 = vpop.eup %5985  ;;  %v2390_v17 = vadd.f32 1.0, %v5984_v4  ;;  %6005 = vtanh.f32 %v2345_v63  ;;  %v2353_v4 = vadd.f32 %v2289_v29, %v8776_v18  ;;  %v2288_v29 = vrot.slane %v7695_v46, 2  ;;  %v8780_v18 = vld [vmem:[#allocation53_spill] sm:$0xff] }
 0x4dc   : > { %v5988_v48 = vpop.eup %5987  ;;  %v2387_v23 = vadd.f32 1.0, %v5986_v20  ;;  %6007 = vtanh.f32 %v2349_v43  ;;  %v8777_v20 = vld [vmem:[#allocation58_spill] sm:$0xff]  ;;  %v2284_v43 = vrot.slane %v7695_v46, 1  ;;  %v2336_v30 = vadd.f32 %v2276_v8, %v8780_v18 }
 0x4dd   : > { %v5990_v53 = vpop.eup %5989  ;;  %v2388_v14 = vadd.f32 1.0, %v5988_v48  ;;  %6009 = vrcp.f32 %v2390_v17  ;;  %v2357_v31 = vadd.f32 %v2293_v56, %v8777_v20  ;;  %v8778_v17 = vld [vmem:[#allocation61_spill] sm:$0xff]  ;;  %v2292_v56 = vrot.slane %v7695_v46, 3  ;;  %v8781_v20 = vld [vmem:[#allocation54_spill] sm:$0xff] }
 0x4de   : > { %v5992_v61 = vpop.eup %5991  ;;  %v2389_v2 = vadd.f32 1.0, %v5990_v53  ;;  %6011 = vrcp.f32 %v2387_v23  ;;  %v2361_v48 = vadd.f32 %v2297_v5, %v8778_v17  ;;  %v2340_v60 = vadd.f32 %v2280_v36, %v8781_v20  ;;  %v8782_v5 = vld [vmem:[#allocation55_spill] sm:$0xff] }
 0x4df   : > { %v5994_v63 = vpop.eup %5993  ;;  %v2391_v59 = vadd.f32 1.0, %v5992_v61  ;;  %6013 = vrcp.f32 %v2388_v14  ;;  %v2344_v42 = vadd.f32 %v7695_v46, %v8782_v5  ;;  %v4827_v45 = vmul.f32 -1.442695, %v2332_v34 }
 0x4e0   : > { %v5996_v52 = vpop.eup %5995  ;;  %v2392_v51 = vadd.f32 1.0, %v5994_v63  ;;  %6015 = vrcp.f32 %v2389_v2  ;;  %v2296_v2 = vrot.slane %v7695_v46, 4  ;;  %v2274_v8 = vrot.slane %v7697_v10, 5 }
 0x4e1   : > { %v5998_v53 = vpop.eup %5997  ;;  %v2393_v23 = vadd.f32 1.0, %v5996_v52  ;;  %6017 = vrcp.f32 %v2391_v59  ;;  %v8783_v52 = vld [vmem:[#allocation56_spill] sm:$0xff]  ;;  %v4828_v39 = vmul.f32 -1.442695, %v2336_v30  ;;  %v2278_v36 = vrot.slane %v7697_v10, 6 }
 0x4e2   : > { %v6000_v61 = vpop.eup %5999  ;;  %v2394_v14 = vadd.f32 1.0, %v5998_v53  ;;  %6019 = vrcp.f32 %v2392_v51  ;;  %v2348_v59 = vadd.f32 %v2284_v43, %v8783_v52  ;;  %v8784_v51 = vld [vmem:[#allocation59_spill] sm:$0xff]  ;;  %v2356_v20 = vadd.f32 %v2292_v56, %v8744_v27 }
 0x4e3   : > { %v6002_v63 = vpop.eup %6001  ;;  %6021 = vrcp.f32 %v2393_v23  ;;  %v2352_v18 = vadd.f32 %v2288_v29, %v8784_v51  ;;  %v4829_v44 = vmul.f32 -1.442695, %v2340_v60  ;;  %v2282_v46 = vrot.slane %v7697_v10, 7 }
 0x4e4   : > { %v6004_v17 = vpop.eup %6003  ;;  %6023 = vrcp.f32 %v2394_v14  ;;  %v2360_v34 = vadd.f32 %v2296_v2, %v8705_v57  ;;  %v4830_v14 = vmul.f32 -1.442695, %v2344_v42  ;;  %v4831_v52 = vmul.f32 -1.442695, %v2348_v59 }
 0x4e5   : > { %v6006_v53 = vpop.eup %6005  ;;  %6025 = vtanh.f32 %v2353_v4  ;;  %v2286_v30 = vrot.slane %v7697_v10, 1  ;;  %v2334_v29 = vadd.f32 %v2274_v8, %v8745_v16  ;;  %v4832_v60 = vmul.f32 -1.442695, %v2352_v18 }
 0x4e6   : > { %v6008_v23 = vpop.eup %6007  ;;  %6027 = vtanh.f32 %v2357_v31  ;;  %v2338_v56 = vadd.f32 %v2278_v36, %v7183_v25  ;;  %v4833_v2 = vmul.f32 -1.442695, %v2356_v20  ;;  %v2342_v42 = vadd.f32 %v2282_v46, %v7192_v35 }
 0x4e7   : > { %v6010_v43 = vpop.eup %6009  ;;  %6029 = vtanh.f32 %v2361_v48  ;;  %v4835_v18 = vmul.f32 -1.442695, %v2334_v29 }
 0x4e8   : > { %v6012_v5 = vpop.eup %6011  ;;  %v7742_v4 = vmul.f32 %v6010_v43, %v6006_v53  ;;  %6031 = vpow2.f32 %v4827_v45  ;;  %v4834_v53 = vmul.f32 -1.442695, %v2360_v34  ;;  %v4837_v36 = vmul.f32 -1.442695, %v2342_v42 }
 0x4e9   : > { %v6014_v31 = vpop.eup %6013  ;;  %v7746_v51 = vmul.f32 %v6012_v5, %v6000_v61  ;;  %6033 = vpow2.f32 %v4828_v39  ;;  %v2346_v61 = vadd.f32 %v7697_v10, %v7201_v22  ;;  %v2350_v39 = vadd.f32 %v2286_v30, %v7215_v19 }
 0x4ea   : > { %v6016_v48 = vpop.eup %6015  ;;  %v7749_v27 = vmul.f32 %v6014_v31, %v6002_v63  ;;  %6035 = vpow2.f32 %v4829_v44  ;;  %v4836_v44 = vmul.f32 -1.442695, %v2338_v56  ;;  %v2290_v30 = vrot.slane %v7697_v10, 2 }
 0x4eb   : > { %v6018_v59 = vpop.eup %6017  ;;  %v7752_v45 = vmul.f32 %v6016_v48, %v6004_v17  ;;  %6037 = vpow2.f32 %v4830_v14  ;;  %v4838_v46 = vmul.f32 -1.442695, %v2346_v61  ;;  %v4839_v34 = vmul.f32 -1.442695, %v2350_v39 }
 0x4ec   : > { %v6020_v5 = vpop.eup %6019  ;;  %6039 = vpow2.f32 %v4831_v52  ;;  %v7757_v8 = vmul.f32 %v6018_v59, %v6008_v23  ;;  %v2294_v31 = vrot.slane %v7697_v10, 3  ;;  %v2354_v61 = vadd.f32 %v2290_v30, %v7282_v6 }
 0x4ed   : > { %v6022_v63 = vpop.eup %6021  ;;  %6041 = vpow2.f32 %v4832_v60 }
 0x4ee   : > { %v6024_v20 = vpop.eup %6023  ;;  %6043 = vpow2.f32 %v4833_v2 }
 0x4ef   : > { %v6026_v17 = vpop.eup %6025  ;;  %6045 = vpow2.f32 %v4834_v53 }
 0x4f0   : > { %v6028_v43 = vpop.eup %6027  ;;  %6047 = vpow2.f32 %v4835_v18  ;;  %v7759_v14 = vmul.f32 %v6026_v17, %v6020_v5  ;;  %v2358_v18 = vadd.f32 %v2294_v31, %v7289_v12  ;;  %v2298_v17 = vrot.slane %v7697_v10, 4 }
 0x4f1   : > { %v6030_v52 = vpop.eup %6029  ;;  %6049 = vpow2.f32 %v4836_v44  ;;  %v7762_v23 = vmul.f32 %v6028_v43, %v6022_v63 }
 0x4f2   : > { %v6032_v29 = vpop.eup %6031  ;;  %6051 = vpow2.f32 %v4837_v36  ;;  %v7765_v60 = vmul.f32 %v6030_v52, %v6024_v20  ;;  %v4841_v30 = vmul.f32 -1.442695, %v2358_v18 }
 0x4f3   : > { %v6034_v56 = vpop.eup %6033  ;;  %v2435_v48 = vadd.f32 1.0, %v6032_v29  ;;  %6053 = vpow2.f32 %v4838_v46 }
 0x4f4   : > { %v6036_v2 = vpop.eup %6035  ;;  %v2436_v42 = vadd.f32 1.0, %v6034_v56  ;;  %6055 = vpow2.f32 %v4839_v34  ;;  %v4840_v34 = vmul.f32 -1.442695, %v2354_v61 }
 0x4f5   : > { %v6038_v59 = vpop.eup %6037  ;;  %v2437_v53 = vadd.f32 1.0, %v6036_v2  ;;  %6057 = vrcp.f32 %v2435_v48  ;;  %v2362_v2 = vadd.f32 %v2298_v17, %v7298_v26 }
 0x4f6   : > { %v6040_v5 = vpop.eup %6039  ;;  %v2438_v39 = vadd.f32 1.0, %v6038_v59  ;;  %6059 = vrcp.f32 %v2436_v42 }
 0x4f7   : > { %v6042_v63 = vpop.eup %6041  ;;  %v2439_v44 = vadd.f32 1.0, %v6040_v5  ;;  %6061 = vrcp.f32 %v2437_v53  ;;  %v2523_v5 = vrot.slane %v7618_v38, 7  ;;  %v2527_v38 = vrot.slane %v7634_v11, 7 }
 0x4f8   : > { %v6044_v20 = vpop.eup %6043  ;;  %v2440_v36 = vadd.f32 1.0, %v6042_v63  ;;  %6063 = vrcp.f32 %v2438_v39  ;;  %v2524_v63 = vrot.slane %v7622_v1, 7 }
 0x4f9   : > { %v6046_v46 = vpop.eup %6045  ;;  %v2441_v43 = vadd.f32 1.0, %v6044_v20  ;;  %6065 = vrcp.f32 %v2439_v44  ;;  %v2525_v20 = vrot.slane %v7626_v3, 7 }
 0x4fa   : > { %v6048_v52 = vpop.eup %6047  ;;  %v2442_v29 = vadd.f32 1.0, %v6046_v46  ;;  %6067 = vrcp.f32 %v2440_v36  ;;  %v4842_v36 = vmul.f32 -1.442695, %v2362_v2 }
 0x4fb   : > { %v6050_v56 = vpop.eup %6049  ;;  %6069 = vrcp.f32 %v2441_v43  ;;  %v2491_v48 = vadd.f32 1.0, %v6048_v52  ;;  %v2526_v43 = vrot.slane %v7630_v49, 7  ;;  %v2529_v49 = vrot.slane %v7642_v13, 7 }
 0x4fc   : > { %v6052_v31 = vpop.eup %6051  ;;  %6071 = vrcp.f32 %v2442_v29  ;;  %v2492_v42 = vadd.f32 1.0, %v6050_v56  ;;  %v2528_v56 = vrot.slane %v7638_v41, 7 }
 0x4fd   : > { %v6054_v59 = vpop.eup %6053  ;;  %6073 = vpow2.f32 %v4840_v34  ;;  %v2493_v53 = vadd.f32 1.0, %v6052_v31 }
 0x4fe   : > { %v6056_v10 = vpop.eup %6055  ;;  %6075 = vpow2.f32 %v4841_v30  ;;  %v2494_v61 = vadd.f32 1.0, %v6054_v59 }
 0x4ff   : > { %v6058_v39 = vpop.eup %6057  ;;  %v2495_v18 = vadd.f32 1.0, %v6056_v10  ;;  %6077 = vrcp.f32 %v2491_v48 }
 0x500   : > { %v6060_v44 = vpop.eup %6059  ;;  %6079 = vrcp.f32 %v2492_v42  ;;  %v2539_v17 = vmul.f32 %v6058_v39, %v2523_v5 }
 0x501   : > { %v6062_v46 = vpop.eup %6061  ;;  %6081 = vrcp.f32 %v2493_v53  ;;  %v2540_v34 = vmul.f32 %v6060_v44, %v2524_v63 }
 0x502   : > { %v6064_v52 = vpop.eup %6063  ;;  %6083 = vrcp.f32 %v2494_v61  ;;  %v2541_v29 = vmul.f32 %v6062_v46, %v2525_v20  ;;  %v7777_v1 = vadd.f32 %v7746_v51, %v2539_v17  ;;  %v2530_v51 = vrot.slane %v7646_v9, 7 }
 0x503   : > { %v6066_v30 = vpop.eup %6065  ;;  %6085 = vrcp.f32 %v2495_v18  ;;  %v2542_v3 = vmul.f32 %v6064_v52, %v2526_v43  ;;  %v7781_v48 = vadd.f32 %v7749_v27, %v2540_v34 }
 0x504   : > { %v6068_v31 = vpop.eup %6067  ;;  %6087 = vpow2.f32 %v4842_v36  ;;  %v2543_v2 = vmul.f32 %v6066_v30, %v2527_v38  ;;  %v7785_v11 = vadd.f32 %v7752_v45, %v2541_v29 }
 0x505   : > { %v6070_v42 = vpop.eup %6069  ;;  %v2544_v59 = vmul.f32 %v6068_v31, %v2528_v56  ;;  %v7789_v53 = vadd.f32 %v7742_v4, %v2542_v3  ;;  %6089 = vtanh.f32 %v7777_v1 }
 0x506   : > { %v6072_v41 = vpop.eup %6071  ;;  %v2545_v27 = vmul.f32 %v6070_v42, %v2529_v49  ;;  %v7793_v10 = vadd.f32 %v7757_v8, %v2543_v2  ;;  %6091 = vtanh.f32 %v7781_v48 }
 0x507   : > { %v6074_v13 = vpop.eup %6073  ;;  %v2546_v5 = vmul.f32 %v6072_v41, %v2530_v51  ;;  %v7797_v45 = vadd.f32 %v7759_v14, %v2544_v59  ;;  %6093 = vtanh.f32 %v7785_v11 }
 0x508   : > { %v6076_v9 = vpop.eup %6075  ;;  %v2496_v61 = vadd.f32 1.0, %v6074_v13  ;;  %v7801_v4 = vadd.f32 %v7762_v23, %v2545_v27  ;;  %6095 = vtanh.f32 %v7789_v53 }
 0x509   : > { %v6078_v39 = vpop.eup %6077  ;;  %v2497_v63 = vadd.f32 1.0, %v6076_v9  ;;  %v7805_v8 = vadd.f32 %v7765_v60, %v2546_v5  ;;  %6097 = vtanh.f32 %v7793_v10 }
 0x50a   : > { %v6080_v18 = vpop.eup %6079  ;;  %6099 = vrcp.f32 %v2496_v61 }
 0x50b   : > { %v6082_v14 = vpop.eup %6081  ;;  %6101 = vrcp.f32 %v2497_v63 }
 0x50c   : > { %v6084_v44 = vpop.eup %6083  ;;  %6103 = vtanh.f32 %v7797_v45 }
 0x50d   : > { %v6086_v20 = vpop.eup %6085  ;;  %6105 = vtanh.f32 %v7801_v4 }
 0x50e   : > { %v6088_v23 = vpop.eup %6087  ;;  %6107 = vtanh.f32 %v7805_v8 }
 0x50f   : > { %v6090_v36 = vpop.eup %6089  ;;  %v2498_v17 = vadd.f32 1.0, %v6088_v23 }
 0x510   : > { %v6092_v46 = vpop.eup %6091  ;;  %v2571_v60 = vmul.f32 %v6090_v36, %v6078_v39 }
 0x511   : > { %v6094_v43 = vpop.eup %6093  ;;  %6109 = vrcp.f32 %v2498_v17  ;;  %v2572_v34 = vmul.f32 %v6092_v46, %v6080_v18 }
 0x512   : > { %v6096_v52 = vpop.eup %6095  ;;  %v2573_v38 = vmul.f32 %v6094_v43, %v6082_v14  ;;  %v2587_v29 = vrot.slane %v2571_v60, 3  ;;  %v8785_v60 = vld [vmem:[#allocation22_spill] sm:$0xff]  ;;  %v8786_v43 = vld [vmem:[#allocation23_spill] sm:$0xff] }
 0x513   : > { %v6098_v30 = vpop.eup %6097  ;;  %v2574_v56 = vmul.f32 %v6096_v52, %v6084_v44  ;;  %v2588_v3 = vrot.slane %v2572_v34, 2  ;;  %v8787_v34 = vld [vmem:[#allocation24_spill] sm:$0xff]  ;;  %v8788_v52 = vld [vmem:[#allocation25_spill] sm:$0xff] }
 0x514   : > { %v6100_v31 = vpop.eup %6099  ;;  %v2575_v49 = vmul.f32 %v6098_v30, %v6086_v20  ;;  %v2590_v2 = vrot.slane %v2573_v38, 1  ;;  %v8789_v38 = vld [vmem:[#allocation26_spill] sm:$0xff]  ;;  %v8791_v30 = vld [vmem:[#allocation28_spill] sm:$0xff] }
 0x515   : > { %v6102_v42 = vpop.eup %6101  ;;  %v2589_v51 = vsel %vm1150_vm1, %v2588_v3, %v2587_v29  ;;  %v8790_v29 = vld [vmem:[#allocation27_spill] sm:$0xff]  ;;  %v8793_v3 = vld [vmem:[#allocation30_spill] sm:$0xff] }
 0x516   : > { %v6104_v59 = vpop.eup %6103  ;;  %v2591_v41 = vsel %vm1153_vm2, %v2590_v2, %v2589_v51  ;;  %v2593_v27 = vrot.slane %v2575_v49, 7  ;;  %v8795_v49 = vld [vmem:[#allocation32_spill] sm:$0xff]  ;;  %v8796_v2 = vld [vmem:[#allocation33_spill] sm:$0xff]  ;;  %v8798_v51 = vld [vmem:[#allocation35_spill] sm:$0xff] }
 0x517   : > { %v6106_v13 = vpop.eup %6105  ;;  %v2576_v5 = vmul.f32 %v6104_v59, %v6100_v31  ;;  %v2592_v9 = vsel %vm1156_vm3, %v2574_v56, %v2591_v41  ;;  %v8792_v56 = vld [vmem:[#allocation29_spill] sm:$0xff]  ;;  %v8794_v31 = vld [vmem:[#allocation31_spill] sm:$0xff]  ;;  %v8799_v59 = vld [vmem:[#allocation36_spill] sm:$0xff] }
 0x518   : > { %v2577_v61 = vmul.f32 %v6106_v13, %v6102_v42  ;;  %v2594_v39 = vsel %vm1159_vm4, %v2593_v27, %v2592_v9  ;;  %v6108_v63 = vpop.eup %6107  ;;  %v8797_v42 = vld [vmem:[#allocation34_spill] sm:$0xff]  ;;  %v8800_v41 = vld [vmem:[#allocation37_spill] sm:$0xff]  ;;  %v8801_v27 = vld [vmem:[#allocation11_spill] sm:$0xff] }
 0x519   : > { %v2595_v18 = vrot.slane %v2576_v5, 6  ;;  %v8802_v13 = vld [vmem:[#allocation12_spill] sm:$0xff] }
 0x51a   : > { %v2597_v14 = vrot.slane %v2577_v61, 5 }
 0x51b   : > { %v6110_v44 = vpop.eup %6109  ;;  %v2596_v20 = vsel %vm1162_vm5, %v2595_v18, %v2594_v39 }
 0x51c   : > { %v2578_v23 = vmul.f32 %v6110_v44, %v6108_v63  ;;  %v2598_v36 = vsel %vm1165_vm6, %v2597_v14, %v2596_v20 }
 0x51e   : > { %v2599_v17 = vrot.slane %v2578_v23, 4 }
 0x520   : > { %v2600_v46 = vsel %vm1168_vm7, %v2599_v17, %v2598_v36 }
 0x521   : > { %2667 = vmatmul.mubr.f32.vlgmr.msra.gmra.mrb[24].mxu0 %v2600_v46  ;;  %2738 = vmatmul.mubr.f32.vlgmr.msra.gmra.mrb[24].mxu1 %v2600_v46  ;;  %v8803_v46 = vld [vmem:[#allocation38_spill] sm:$0xff] }
 0x522   : > { %5321 = vmatpush1.bf16.msra.mxu0 %v6890_v24  ;;  %5353 = vmatpush1.bf16.msra.mxu1 %v6895_v28 }
 0x523   : > { %5323 = vmatprep.subr.bf16.mxu0 %v6899_v32  ;;  %5355 = vmatprep.subr.bf16.mxu1 %v6901_v33 }
 0x524   : > { %3143 = vmatprep.mubr.f32.mxu0 %v8674_v7  ;;  %3214 = vmatprep.mubr.f32.mxu1 %v8674_v7 }
 0x526   : > { %5325 = vmatpush1.bf16.msra.mxu0 %v6905_v37  ;;  %5357 = vmatpush1.bf16.msra.mxu1 %v8707_v58 }
 0x527   : > { %5327 = vmatprep.subr.bf16.mxu0 %v8708_v50  ;;  %5359 = vmatprep.subr.bf16.mxu1 %v8709_v40 }
 0x52a   : > { %5329 = vmatpush1.bf16.msra.mxu0 %v8710_v0  ;;  %5361 = vmatpush1.bf16.msra.mxu1 %v8711_v15 }
 0x52b   : > { %5331 = vmatprep.subr.bf16.mxu0 %v8712_v62  ;;  %5363 = vmatprep.subr.bf16.mxu1 %v8713_v54 }
 0x52e   : > { %5333 = vmatpush1.bf16.msra.mxu0 %v8746_v55  ;;  %5365 = vmatpush1.bf16.msra.mxu1 %v8747_v21 }
 0x52f   : > { %5335 = vmatprep.subr.bf16.mxu0 %v8785_v60  ;;  %5367 = vmatprep.subr.bf16.mxu1 %v8786_v43 }
 0x532   : > { %5337 = vmatpush1.bf16.msra.mxu0 %v8787_v34  ;;  %5369 = vmatpush1.bf16.msra.mxu1 %v8788_v52 }
 0x533   : > { %5339 = vmatprep.subr.bf16.mxu0 %v8789_v38  ;;  %5371 = vmatprep.subr.bf16.mxu1 %v8790_v29  ;;  %v8809_v29 = vld [vmem:[#allocation45_spill] sm:$0xff] }
 0x536   : > { %5341 = vmatpush1.bf16.msra.mxu0 %v8791_v30  ;;  %5373 = vmatpush1.bf16.msra.mxu1 %v8792_v56 }
 0x537   : > { %5343 = vmatprep.subr.bf16.mxu0 %v8793_v3  ;;  %5375 = vmatprep.subr.bf16.mxu1 %v8794_v31  ;;  %v8808_v3 = vld [vmem:[#allocation44_spill] sm:$0xff] }
 0x53a   : > { %5345 = vmatpush1.bf16.msra.mxu0 %v8795_v49  ;;  %5377 = vmatpush1.bf16.msra.mxu1 %v8796_v2  ;;  %v8807_v49 = vld [vmem:[#allocation43_spill] sm:$0xff] }
 0x53b   : > { %5347 = vmatprep.subr.bf16.mxu0 %v8797_v42  ;;  %5379 = vmatprep.subr.bf16.mxu1 %v8798_v51  ;;  %v8806_v42 = vld [vmem:[#allocation41_spill] sm:$0xff] }
 0x53e   : > { %5349 = vmatpush1.bf16.msra.mxu0 %v8799_v59  ;;  %5381 = vmatpush1.bf16.msra.mxu1 %v8800_v41  ;;  %v8804_v41 = vld [vmem:[#allocation39_spill] sm:$0xff]  ;;  %v8805_v59 = vld [vmem:[#allocation40_spill] sm:$0xff] }
 0x53f   : > { %5383 = vmatprep.subr.bf16.mxu0 %v8801_v27  ;;  %5415 = vmatprep.subr.bf16.mxu1 %v8802_v13 }
 0x5f4   : > { %v2668_v5 = vpop.f32.mrb[24].mxu0  ;;  %v7852_v9 = vpop.f32.mrb[24].mxu1 }
 0x5f5   : > { %v2748_v61 = vrot.slane %v2668_v5, 4  ;;  %v2752_v39 = vrot.slane %v2668_v5, 5  ;;  %v2756_v63 = vrot.slane %v2668_v5, 6  ;;  %v2760_v18 = vrot.slane %v2668_v5, 7  ;;  %v7854_v14 = vpop.f32.mrb[25].mxu0  ;;  %v7856_v44 = vpop.f32.mrb[25].mxu1 }
 0x5f6   : > { %v2764_v20 = vrot.slane %v2668_v5, 1  ;;  %v2768_v23 = vrot.slane %v2668_v5, 2  ;;  %v2772_v36 = vrot.slane %v2668_v5, 3  ;;  %v2824_v17 = vadd.f32 %v2668_v5, %v8767_v47 }
 0x5f7   : > { %v2808_v27 = vadd.f32 %v2748_v61, %v8803_v46  ;;  %v2812_v13 = vadd.f32 %v2752_v39, %v8804_v41  ;;  %v2816_v51 = vadd.f32 %v2756_v63, %v8805_v59  ;;  %v2820_v2 = vadd.f32 %v2760_v18, %v8806_v42  ;;  %v8823_v59 = vld [vmem:[#allocation59_spill] sm:$0xff] }
 0x5f8   : > { %v2828_v31 = vadd.f32 %v2764_v20, %v8807_v49  ;;  %v2832_v56 = vadd.f32 %v2768_v23, %v8808_v3  ;;  %v4847_v30 = vmul.f32 -1.442695, %v2824_v17  ;;  %v2836_v38 = vadd.f32 %v2772_v36, %v8809_v29  ;;  %v8818_v3 = vld [vmem:[#allocation53_spill] sm:$0xff] }
 0x5f9   : > { %v4843_v52 = vmul.f32 -1.442695, %v2808_v27  ;;  %v4844_v34 = vmul.f32 -1.442695, %v2812_v13  ;;  %v4845_v43 = vmul.f32 -1.442695, %v2816_v51 }
 0x5fa   : > { %v4846_v60 = vmul.f32 -1.442695, %v2820_v2  ;;  %6111 = vpow2.f32 %v4847_v30  ;;  %v4848_v5 = vmul.f32 -1.442695, %v2828_v31  ;;  %v2750_v61 = vrot.slane %v7852_v9, 4  ;;  %v8810_v27 = vld [vmem:[#allocation46_spill] sm:$0xff] }
 0x5fb   : > { %6113 = vpow2.f32 %v4843_v52  ;;  %v2754_v39 = vrot.slane %v7852_v9, 5  ;;  %v4849_v63 = vmul.f32 -1.442695, %v2832_v56  ;;  %v2758_v18 = vrot.slane %v7852_v9, 6  ;;  %v8811_v2 = vld [vmem:[#allocation48_spill] sm:$0xff]  ;;  %v8812_v52 = vld [vmem:[#allocation49_spill] sm:$0xff] }
 0x5fc   : > { %6115 = vpow2.f32 %v4844_v34  ;;  %v4850_v20 = vmul.f32 -1.442695, %v2836_v38  ;;  %v2762_v23 = vrot.slane %v7852_v9, 7  ;;  %v2810_v13 = vadd.f32 %v2750_v61, %v8810_v27  ;;  %v8813_v51 = vld [vmem:[#allocation52_spill] sm:$0xff]  ;;  %v8814_v34 = vld [vmem:[#allocation50_spill] sm:$0xff]  ;;  %v8817_v27 = vld [vmem:[#allocation47_spill] sm:$0xff] }
 0x5fd   : > { %6117 = vpow2.f32 %v4845_v43  ;;  %v2814_v30 = vadd.f32 %v2754_v39, %v8811_v2  ;;  %v2818_v31 = vadd.f32 %v2758_v18, %v8812_v52  ;;  %v2826_v56 = vadd.f32 %v7852_v9, %v8814_v34 }
 0x5fe   : > { %6119 = vpow2.f32 %v4846_v60  ;;  %v2822_v36 = vadd.f32 %v2762_v23, %v8813_v51  ;;  %v2766_v17 = vrot.slane %v7852_v9, 1  ;;  %v2770_v39 = vrot.slane %v7852_v9, 2 }
 0x5ff   : > { %6121 = vpow2.f32 %v4848_v5  ;;  %v2753_v23 = vrot.slane %v7854_v14, 5 }
 0x600   : > { %6123 = vpow2.f32 %v4849_v63  ;;  %v2749_v63 = vrot.slane %v7854_v14, 4 }
 0x601   : > { %6125 = vpow2.f32 %v4850_v20  ;;  %v2813_v47 = vadd.f32 %v2753_v23, %v8818_v3 }
 0x602   : > { %6127 = vtanh.f32 %v2810_v13  ;;  %v2809_v29 = vadd.f32 %v2749_v63, %v8817_v27  ;;  %v2773_v63 = vrot.slane %v7854_v14, 3  ;;  %v8822_v27 = vld [vmem:[#allocation56_spill] sm:$0xff] }
 0x603   : > { %6129 = vtanh.f32 %v2814_v30  ;;  %v2825_v23 = vadd.f32 %v7854_v14, %v8822_v27  ;;  %v2763_v27 = vrot.slane %v7856_v44, 7 }
 0x604   : > { %v6112_v43 = vpop.eup %6111  ;;  %6131 = vtanh.f32 %v2818_v31  ;;  %v2774_v31 = vrot.slane %v7852_v9, 3  ;;  %v2765_v9 = vrot.slane %v7854_v14, 1  ;;  %v4851_v3 = vmul.f32 -1.442695, %v2809_v29 }
 0x605   : > { %v6114_v38 = vpop.eup %6113  ;;  %v2868_v60 = vadd.f32 1.0, %v6112_v43  ;;  %6133 = vtanh.f32 %v2822_v36  ;;  %v2757_v43 = vrot.slane %v7854_v14, 6  ;;  %v2837_v29 = vadd.f32 %v2773_v63, %v8705_v57 }
 0x606   : > { %v6116_v5 = vpop.eup %6115  ;;  %v2864_v61 = vadd.f32 1.0, %v6114_v38  ;;  %6135 = vtanh.f32 %v2826_v56  ;;  %v8815_v38 = vld [vmem:[#allocation57_spill] sm:$0xff]  ;;  %v2761_v56 = vrot.slane %v7854_v14, 7 }
 0x607   : > { %v6118_v18 = vpop.eup %6117  ;;  %v2865_v20 = vadd.f32 1.0, %v6116_v5  ;;  %6137 = vrcp.f32 %v2868_v60  ;;  %v2830_v51 = vadd.f32 %v2766_v17, %v8815_v38  ;;  %v8816_v60 = vld [vmem:[#allocation58_spill] sm:$0xff]  ;;  %v2769_v17 = vrot.slane %v7854_v14, 2 }
 0x608   : > { %v6120_v13 = vpop.eup %6119  ;;  %v2866_v30 = vadd.f32 1.0, %v6118_v18  ;;  %6139 = vrcp.f32 %v2864_v61  ;;  %v2834_v5 = vadd.f32 %v2770_v39, %v8816_v60  ;;  %v8819_v38 = vld [vmem:[#allocation54_spill] sm:$0xff]  ;;  %v8821_v60 = vld [vmem:[#allocation55_spill] sm:$0xff] }
 0x609   : > { %v6122_v36 = vpop.eup %6121  ;;  %v2867_v34 = vadd.f32 1.0, %v6120_v13  ;;  %6141 = vrcp.f32 %v2865_v20  ;;  %v2817_v42 = vadd.f32 %v2757_v43, %v8819_v38  ;;  %v2829_v43 = vadd.f32 %v2765_v9, %v8823_v59 }
 0x60a   : > { %v6124_v52 = vpop.eup %6123  ;;  %v2869_v2 = vadd.f32 1.0, %v6122_v36  ;;  %6143 = vrcp.f32 %v2866_v30  ;;  %v8820_v30 = vld [vmem:[#allocation61_spill] sm:$0xff]  ;;  %v4852_v38 = vmul.f32 -1.442695, %v2813_v47  ;;  %v4855_v9 = vmul.f32 -1.442695, %v2825_v23 }
 0x60b   : > { %v6126_v18 = vpop.eup %6125  ;;  %v2870_v61 = vadd.f32 1.0, %v6124_v52  ;;  %6145 = vrcp.f32 %v2867_v34  ;;  %v2838_v39 = vadd.f32 %v2774_v31, %v8820_v30  ;;  %v2821_v52 = vadd.f32 %v2761_v56, %v8821_v60  ;;  %v8824_v30 = vld [vmem:[#allocation60_spill] sm:$0xff] }
 0x60c   : > { %v6128_v13 = vpop.eup %6127  ;;  %v2871_v20 = vadd.f32 1.0, %v6126_v18  ;;  %6147 = vrcp.f32 %v2869_v2  ;;  %v2751_v2 = vrot.slane %v7856_v44, 4  ;;  %v2833_v41 = vadd.f32 %v2769_v17, %v8824_v30 }
 0x60d   : > { %v6130_v36 = vpop.eup %6129  ;;  %6149 = vrcp.f32 %v2870_v61  ;;  %v2755_v61 = vrot.slane %v7856_v44, 5  ;;  %v4853_v56 = vmul.f32 -1.442695, %v2817_v42  ;;  %v4854_v14 = vmul.f32 -1.442695, %v2821_v52 }
 0x60e   : > { %v6132_v34 = vpop.eup %6131  ;;  %6151 = vrcp.f32 %v2871_v20  ;;  %v2759_v20 = vrot.slane %v7856_v44, 6  ;;  %v2811_v47 = vadd.f32 %v2751_v2, %v8745_v16  ;;  %v4856_v42 = vmul.f32 -1.442695, %v2829_v43 }
 0x60f   : > { %v6134_v18 = vpop.eup %6133  ;;  %6153 = vtanh.f32 %v2830_v51  ;;  %v2815_v17 = vadd.f32 %v2755_v61, %v7183_v25  ;;  %v4857_v63 = vmul.f32 -1.442695, %v2833_v41  ;;  %v2823_v2 = vadd.f32 %v2763_v27, %v7201_v22 }
 0x610   : > { %v6136_v31 = vpop.eup %6135  ;;  %6155 = vtanh.f32 %v2834_v5  ;;  %v2819_v52 = vadd.f32 %v2759_v20, %v7192_v35  ;;  %v4859_v43 = vmul.f32 -1.442695, %v2811_v47 }
 0x611   : > { %v6138_v60 = vpop.eup %6137  ;;  %6157 = vtanh.f32 %v2838_v39  ;;  %v4860_v41 = vmul.f32 -1.442695, %v2815_v17  ;;  %v4862_v20 = vmul.f32 -1.442695, %v2823_v2 }
 0x612   : > { %v6140_v51 = vpop.eup %6139  ;;  %6159 = vpow2.f32 %v4851_v3  ;;  %v7903_v59 = vmul.f32 %v6138_v60, %v6136_v31  ;;  %v4858_v60 = vmul.f32 -1.442695, %v2837_v29 }
 0x613   : > { %v6142_v5 = vpop.eup %6141  ;;  %v7905_v46 = vmul.f32 %v6140_v51, %v6128_v13  ;;  %6161 = vpow2.f32 %v4852_v38  ;;  %v2827_v38 = vadd.f32 %v7856_v44, %v7215_v19 }
 0x614   : > { %v6144_v39 = vpop.eup %6143  ;;  %v7908_v30 = vmul.f32 %v6142_v5, %v6130_v36  ;;  %6163 = vpow2.f32 %v4853_v56  ;;  %v4861_v56 = vmul.f32 -1.442695, %v2819_v52  ;;  %v2771_v5 = vrot.slane %v7856_v44, 2 }
 0x615   : > { %v6146_v3 = vpop.eup %6145  ;;  %v7911_v23 = vmul.f32 %v6144_v39, %v6132_v34  ;;  %6165 = vpow2.f32 %v4854_v14  ;;  %v4863_v27 = vmul.f32 -1.442695, %v2827_v38 }
 0x616   : > { %v6148_v13 = vpop.eup %6147  ;;  %6167 = vpow2.f32 %v4855_v9  ;;  %v7916_v61 = vmul.f32 %v6146_v3, %v6134_v18  ;;  %v2767_v9 = vrot.slane %v7856_v44, 1 }
 0x617   : > { %v6150_v36 = vpop.eup %6149  ;;  %6169 = vpow2.f32 %v4856_v42 }
 0x618   : > { %v6152_v31 = vpop.eup %6151  ;;  %6171 = vpow2.f32 %v4857_v63  ;;  %v2831_v2 = vadd.f32 %v2767_v9, %v7282_v6 }
 0x619   : > { %v6154_v34 = vpop.eup %6153  ;;  %6173 = vpow2.f32 %v4858_v60 }
 0x61a   : > { %v6156_v29 = vpop.eup %6155  ;;  %6175 = vpow2.f32 %v4859_v43  ;;  %v7918_v14 = vmul.f32 %v6154_v34, %v6148_v13  ;;  %v2835_v43 = vadd.f32 %v2771_v5, %v7289_v12  ;;  %v2775_v34 = vrot.slane %v7856_v44, 3 }
 0x61b   : > { %v6158_v51 = vpop.eup %6157  ;;  %6177 = vpow2.f32 %v4860_v41  ;;  %v7921_v18 = vmul.f32 %v6156_v29, %v6150_v36 }
 0x61c   : > { %v6160_v47 = vpop.eup %6159  ;;  %6179 = vpow2.f32 %v4861_v56  ;;  %v7924_v42 = vmul.f32 %v6158_v51, %v6152_v31  ;;  %v4865_v9 = vmul.f32 -1.442695, %v2835_v43 }
 0x61d   : > { %v6162_v17 = vpop.eup %6161  ;;  %v2912_v39 = vadd.f32 1.0, %v6160_v47  ;;  %6181 = vpow2.f32 %v4862_v20 }
 0x61e   : > { %v6164_v63 = vpop.eup %6163  ;;  %v2913_v52 = vadd.f32 1.0, %v6162_v17  ;;  %6183 = vpow2.f32 %v4863_v27  ;;  %v4864_v27 = vmul.f32 -1.442695, %v2831_v2 }
 0x61f   : > { %v6166_v3 = vpop.eup %6165  ;;  %v2914_v60 = vadd.f32 1.0, %v6164_v63  ;;  %6185 = vrcp.f32 %v2912_v39  ;;  %v2839_v63 = vadd.f32 %v2775_v34, %v7298_v26 }
 0x620   : > { %v6168_v13 = vpop.eup %6167  ;;  %v2915_v38 = vadd.f32 1.0, %v6166_v3  ;;  %6187 = vrcp.f32 %v2913_v52 }
 0x621   : > { %v6170_v36 = vpop.eup %6169  ;;  %v2916_v41 = vadd.f32 1.0, %v6168_v13  ;;  %6189 = vrcp.f32 %v2914_v60  ;;  %v3000_v13 = vrot.slane %v7777_v1, 7  ;;  %v3004_v1 = vrot.slane %v7793_v10, 7 }
 0x622   : > { %v6172_v31 = vpop.eup %6171  ;;  %v2917_v56 = vadd.f32 1.0, %v6170_v36  ;;  %6191 = vrcp.f32 %v2915_v38  ;;  %v3001_v36 = vrot.slane %v7781_v48, 7 }
 0x623   : > { %v6174_v20 = vpop.eup %6173  ;;  %v2918_v29 = vadd.f32 1.0, %v6172_v31  ;;  %6193 = vrcp.f32 %v2916_v41  ;;  %v3002_v31 = vrot.slane %v7785_v11, 7 }
 0x624   : > { %v6176_v51 = vpop.eup %6175  ;;  %v2919_v47 = vadd.f32 1.0, %v6174_v20  ;;  %6195 = vrcp.f32 %v2917_v56  ;;  %v4866_v56 = vmul.f32 -1.442695, %v2839_v63 }
 0x625   : > { %v6178_v17 = vpop.eup %6177  ;;  %6197 = vrcp.f32 %v2918_v29  ;;  %v2968_v39 = vadd.f32 1.0, %v6176_v51  ;;  %v3003_v29 = vrot.slane %v7789_v53, 7  ;;  %v3006_v53 = vrot.slane %v7801_v4, 7 }
 0x626   : > { %v6180_v5 = vpop.eup %6179  ;;  %6199 = vrcp.f32 %v2919_v47  ;;  %v2969_v52 = vadd.f32 1.0, %v6178_v17  ;;  %v3005_v17 = vrot.slane %v7797_v45, 7 }
 0x627   : > { %v6182_v3 = vpop.eup %6181  ;;  %6201 = vpow2.f32 %v4864_v27  ;;  %v2970_v60 = vadd.f32 1.0, %v6180_v5 }
 0x628   : > { %v6184_v44 = vpop.eup %6183  ;;  %6203 = vpow2.f32 %v4865_v9  ;;  %v2971_v2 = vadd.f32 1.0, %v6182_v3 }
 0x629   : > { %v6186_v38 = vpop.eup %6185  ;;  %v2972_v43 = vadd.f32 1.0, %v6184_v44  ;;  %6205 = vrcp.f32 %v2968_v39 }
 0x62a   : > { %v6188_v41 = vpop.eup %6187  ;;  %6207 = vrcp.f32 %v2969_v52  ;;  %v3016_v34 = vmul.f32 %v6186_v38, %v3000_v13 }
 0x62b   : > { %v6190_v20 = vpop.eup %6189  ;;  %6209 = vrcp.f32 %v2970_v60  ;;  %v3017_v27 = vmul.f32 %v6188_v41, %v3001_v36 }
 0x62c   : > { %v6192_v51 = vpop.eup %6191  ;;  %6211 = vrcp.f32 %v2971_v2  ;;  %v3018_v47 = vmul.f32 %v6190_v20, %v3002_v31  ;;  %v7936_v48 = vadd.f32 %v7905_v46, %v3016_v34  ;;  %v3007_v46 = vrot.slane %v7805_v8, 7 }
 0x62d   : > { %v6194_v9 = vpop.eup %6193  ;;  %6213 = vrcp.f32 %v2972_v43  ;;  %v3019_v11 = vmul.f32 %v6192_v51, %v3003_v29  ;;  %v7940_v39 = vadd.f32 %v7908_v30, %v3017_v27 }
 0x62e   : > { %v6196_v5 = vpop.eup %6195  ;;  %6215 = vpow2.f32 %v4866_v56  ;;  %v3020_v63 = vmul.f32 %v6194_v9, %v3004_v1  ;;  %v7944_v10 = vadd.f32 %v7911_v23, %v3018_v47 }
 0x62f   : > { %v6198_v52 = vpop.eup %6197  ;;  %v3021_v3 = vmul.f32 %v6196_v5, %v3005_v17  ;;  %v7948_v60 = vadd.f32 %v7916_v61, %v3019_v11  ;;  %6217 = vtanh.f32 %v7936_v48 }
 0x630   : > { %v6200_v45 = vpop.eup %6199  ;;  %v3022_v30 = vmul.f32 %v6198_v52, %v3006_v53  ;;  %v7952_v44 = vadd.f32 %v7903_v59, %v3020_v63  ;;  %6219 = vtanh.f32 %v7940_v39 }
 0x631   : > { %v6202_v4 = vpop.eup %6201  ;;  %v3023_v13 = vmul.f32 %v6200_v45, %v3007_v46  ;;  %v7956_v23 = vadd.f32 %v7918_v14, %v3021_v3  ;;  %6221 = vtanh.f32 %v7944_v10 }
 0x632   : > { %v6204_v8 = vpop.eup %6203  ;;  %v2973_v2 = vadd.f32 1.0, %v6202_v4  ;;  %v7960_v61 = vadd.f32 %v7921_v18, %v3022_v30  ;;  %6223 = vtanh.f32 %v7948_v60 }
 0x633   : > { %v6206_v38 = vpop.eup %6205  ;;  %v2974_v36 = vadd.f32 1.0, %v6204_v8  ;;  %v7964_v59 = vadd.f32 %v7924_v42, %v3023_v13  ;;  %6225 = vtanh.f32 %v7952_v44 }
 0x634   : > { %v6208_v43 = vpop.eup %6207  ;;  %6227 = vrcp.f32 %v2973_v2 }
 0x635   : > { %v6210_v14 = vpop.eup %6209  ;;  %6229 = vrcp.f32 %v2974_v36 }
 0x636   : > { %v6212_v41 = vpop.eup %6211  ;;  %6231 = vtanh.f32 %v7956_v23 }
 0x637   : > { %v6214_v31 = vpop.eup %6213  ;;  %6233 = vtanh.f32 %v7960_v61 }
 0x638   : > { %v6216_v18 = vpop.eup %6215  ;;  %6235 = vtanh.f32 %v7964_v59 }
 0x639   : > { %v6218_v56 = vpop.eup %6217  ;;  %v2975_v34 = vadd.f32 1.0, %v6216_v18 }
 0x63a   : > { %v6220_v20 = vpop.eup %6219  ;;  %v3048_v42 = vmul.f32 %v6218_v56, %v6206_v38 }
 0x63b   : > { %v6222_v29 = vpop.eup %6221  ;;  %6237 = vrcp.f32 %v2975_v34  ;;  %v3049_v27 = vmul.f32 %v6220_v20, %v6208_v43 }
 0x63c   : > { %v6224_v51 = vpop.eup %6223  ;;  %v3050_v1 = vmul.f32 %v6222_v29, %v6210_v14  ;;  %v3064_v47 = vrot.slane %v3048_v42, 4  ;;  %v8825_v42 = vld [vmem:[#allocation22_spill] sm:$0xff]  ;;  %v8826_v29 = vld [vmem:[#allocation23_spill] sm:$0xff] }
 0x63d   : > { %v6226_v9 = vpop.eup %6225  ;;  %v3051_v17 = vmul.f32 %v6224_v51, %v6212_v41  ;;  %v3065_v11 = vrot.slane %v3049_v27, 3  ;;  %v8827_v27 = vld [vmem:[#allocation24_spill] sm:$0xff]  ;;  %v8828_v51 = vld [vmem:[#allocation25_spill] sm:$0xff] }
 0x63e   : > { %v6228_v5 = vpop.eup %6227  ;;  %v3052_v53 = vmul.f32 %v6226_v9, %v6214_v31  ;;  %v3067_v63 = vrot.slane %v3050_v1, 2  ;;  %v8829_v1 = vld [vmem:[#allocation26_spill] sm:$0xff]  ;;  %v8831_v9 = vld [vmem:[#allocation28_spill] sm:$0xff] }
 0x63f   : > { %v6230_v52 = vpop.eup %6229  ;;  %v3066_v46 = vsel %vm1150_vm1, %v3065_v11, %v3064_v47  ;;  %v3069_v3 = vrot.slane %v3051_v17, 1  ;;  %v8830_v47 = vld [vmem:[#allocation27_spill] sm:$0xff]  ;;  %v8832_v17 = vld [vmem:[#allocation29_spill] sm:$0xff]  ;;  %v8833_v11 = vld [vmem:[#allocation30_spill] sm:$0xff] }
 0x640   : > { %v6232_v45 = vpop.eup %6231  ;;  %v3068_v30 = vsel %vm1153_vm2, %v3067_v63, %v3066_v46  ;;  %v8836_v63 = vld [vmem:[#allocation33_spill] sm:$0xff]  ;;  %v8838_v46 = vld [vmem:[#allocation35_spill] sm:$0xff] }
 0x641   : > { %v6234_v4 = vpop.eup %6233  ;;  %v3053_v13 = vmul.f32 %v6232_v45, %v6228_v5  ;;  %v3070_v8 = vsel %vm1156_vm3, %v3069_v3, %v3068_v30  ;;  %v8834_v5 = vld [vmem:[#allocation31_spill] sm:$0xff]  ;;  %v8839_v3 = vld [vmem:[#allocation36_spill] sm:$0xff]  ;;  %v8840_v45 = vld [vmem:[#allocation37_spill] sm:$0xff] }
 0x642   : > { %v3054_v2 = vmul.f32 %v6234_v4, %v6230_v52  ;;  %v3071_v38 = vsel %vm1159_vm4, %v3052_v53, %v3070_v8  ;;  %v6236_v36 = vpop.eup %6235  ;;  %v8835_v53 = vld [vmem:[#allocation32_spill] sm:$0xff]  ;;  %v8837_v52 = vld [vmem:[#allocation34_spill] sm:$0xff]  ;;  %v8841_v30 = vld [vmem:[#allocation11_spill] sm:$0xff] }
 0x643   : > { %v3072_v43 = vrot.slane %v3053_v13, 7  ;;  %v8842_v4 = vld [vmem:[#allocation12_spill] sm:$0xff] }
 0x644   : > { %v3074_v14 = vrot.slane %v3054_v2, 6 }
 0x645   : > { %v6238_v41 = vpop.eup %6237  ;;  %v3073_v31 = vsel %vm1162_vm5, %v3072_v43, %v3071_v38 }
 0x646   : > { %v3055_v18 = vmul.f32 %v6238_v41, %v6236_v36  ;;  %v3075_v56 = vsel %vm1165_vm6, %v3074_v14, %v3073_v31 }
 0x648   : > { %v3076_v34 = vrot.slane %v3055_v18, 5 }
 0x64a   : > { %v3077_v20 = vsel %vm1168_vm7, %v3076_v34, %v3075_v56 }
 0x64b   : > { %3144 = vmatmul.mubr.f32.vlgmr.msra.gmra.mrb[26].mxu0 %v3077_v20  ;;  %3215 = vmatmul.mubr.f32.vlgmr.msra.gmra.mrb[26].mxu1 %v3077_v20  ;;  %v8843_v20 = vld [vmem:[#allocation38_spill] sm:$0xff] }
 0x64c   : > { %5385 = vmatpush1.bf16.msra.mxu0 %v6890_v24  ;;  %5417 = vmatpush1.bf16.msra.mxu1 %v6895_v28 }
 0x64d   : > { %5387 = vmatprep.subr.bf16.mxu0 %v6899_v32  ;;  %5419 = vmatprep.subr.bf16.mxu1 %v6901_v33 }
 0x64e   : > { %3620 = vmatprep.mubr.f32.mxu0 %v8674_v7  ;;  %3691 = vmatprep.mubr.f32.mxu1 %v8674_v7 }
 0x650   : > { %5389 = vmatpush1.bf16.msra.mxu0 %v6905_v37  ;;  %5421 = vmatpush1.bf16.msra.mxu1 %v8707_v58 }
 0x651   : > { %5391 = vmatprep.subr.bf16.mxu0 %v8708_v50  ;;  %5423 = vmatprep.subr.bf16.mxu1 %v8709_v40 }
 0x654   : > { %5393 = vmatpush1.bf16.msra.mxu0 %v8710_v0  ;;  %5425 = vmatpush1.bf16.msra.mxu1 %v8711_v15 }
 0x655   : > { %5395 = vmatprep.subr.bf16.mxu0 %v8712_v62  ;;  %5427 = vmatprep.subr.bf16.mxu1 %v8713_v54 }
 0x658   : > { %5397 = vmatpush1.bf16.msra.mxu0 %v8746_v55  ;;  %5429 = vmatpush1.bf16.msra.mxu1 %v8747_v21 }
 0x659   : > { %5399 = vmatprep.subr.bf16.mxu0 %v8825_v42  ;;  %5431 = vmatprep.subr.bf16.mxu1 %v8826_v29 }
 0x65c   : > { %5401 = vmatpush1.bf16.msra.mxu0 %v8827_v27  ;;  %5433 = vmatpush1.bf16.msra.mxu1 %v8828_v51 }
 0x65d   : > { %5403 = vmatprep.subr.bf16.mxu0 %v8829_v1  ;;  %5435 = vmatprep.subr.bf16.mxu1 %v8830_v47  ;;  %v8849_v47 = vld [vmem:[#allocation45_spill] sm:$0xff] }
 0x660   : > { %5405 = vmatpush1.bf16.msra.mxu0 %v8831_v9  ;;  %5437 = vmatpush1.bf16.msra.mxu1 %v8832_v17 }
 0x661   : > { %5407 = vmatprep.subr.bf16.mxu0 %v8833_v11  ;;  %5439 = vmatprep.subr.bf16.mxu1 %v8834_v5  ;;  %v8848_v11 = vld [vmem:[#allocation44_spill] sm:$0xff] }
 0x664   : > { %5409 = vmatpush1.bf16.msra.mxu0 %v8835_v53  ;;  %5441 = vmatpush1.bf16.msra.mxu1 %v8836_v63  ;;  %v8847_v53 = vld [vmem:[#allocation42_spill] sm:$0xff] }
 0x665   : > { %5411 = vmatprep.subr.bf16.mxu0 %v8837_v52  ;;  %5443 = vmatprep.subr.bf16.mxu1 %v8838_v46  ;;  %v8846_v52 = vld [vmem:[#allocation41_spill] sm:$0xff] }
 0x668   : > { %5413 = vmatpush1.bf16.msra.mxu0 %v8839_v3  ;;  %5445 = vmatpush1.bf16.msra.mxu1 %v8840_v45  ;;  %v8844_v45 = vld [vmem:[#allocation39_spill] sm:$0xff]  ;;  %v8845_v3 = vld [vmem:[#allocation40_spill] sm:$0xff] }
 0x669   : > { %5447 = vmatprep.subr.bf16.mxu0 %v8841_v30  ;;  %5479 = vmatprep.subr.bf16.mxu1 %v8842_v4 }
 0x71e   : > { %v3145_v13 = vpop.f32.mrb[26].mxu0  ;;  %v8011_v8 = vpop.f32.mrb[26].mxu1 }
 0x71f   : > { %v3225_v2 = vrot.slane %v3145_v13, 3  ;;  %v3229_v38 = vrot.slane %v3145_v13, 4  ;;  %v3233_v36 = vrot.slane %v3145_v13, 5  ;;  %v3237_v43 = vrot.slane %v3145_v13, 6  ;;  %v8013_v14 = vpop.f32.mrb[27].mxu0  ;;  %v8015_v41 = vpop.f32.mrb[27].mxu1 }
 0x720   : > { %v3241_v31 = vrot.slane %v3145_v13, 7  ;;  %v3245_v18 = vrot.slane %v3145_v13, 1  ;;  %v3249_v56 = vrot.slane %v3145_v13, 2  ;;  %v3305_v34 = vadd.f32 %v3145_v13, %v8807_v49 }
 0x721   : > { %v3285_v30 = vadd.f32 %v3225_v2, %v8843_v20  ;;  %v3289_v4 = vadd.f32 %v3229_v38, %v8844_v45  ;;  %v3293_v46 = vadd.f32 %v3233_v36, %v8845_v3  ;;  %v3297_v63 = vadd.f32 %v3237_v43, %v8846_v52 }
 0x722   : > { %v3301_v5 = vadd.f32 %v3241_v31, %v8847_v53  ;;  %v3309_v17 = vadd.f32 %v3245_v18, %v8848_v11  ;;  %v4872_v9 = vmul.f32 -1.442695, %v3305_v34  ;;  %v3313_v1 = vadd.f32 %v3249_v56, %v8849_v47  ;;  %v8859_v53 = vld [vmem:[#allocation54_spill] sm:$0xff] }
 0x723   : > { %v4867_v51 = vmul.f32 -1.442695, %v3285_v30  ;;  %v4868_v27 = vmul.f32 -1.442695, %v3289_v4  ;;  %v4869_v29 = vmul.f32 -1.442695, %v3293_v46 }
 0x724   : > { %v4870_v42 = vmul.f32 -1.442695, %v3297_v63  ;;  %6239 = vpow2.f32 %v4872_v9  ;;  %v4871_v13 = vmul.f32 -1.442695, %v3301_v5  ;;  %v3227_v2 = vrot.slane %v8011_v8, 3  ;;  %v8850_v46 = vld [vmem:[#allocation46_spill] sm:$0xff] }
 0x725   : > { %6241 = vpow2.f32 %v4867_v51  ;;  %v3231_v38 = vrot.slane %v8011_v8, 4  ;;  %v4873_v36 = vmul.f32 -1.442695, %v3309_v17  ;;  %v3235_v43 = vrot.slane %v8011_v8, 5  ;;  %v8851_v51 = vld [vmem:[#allocation48_spill] sm:$0xff]  ;;  %v8852_v5 = vld [vmem:[#allocation49_spill] sm:$0xff] }
 0x726   : > { %6243 = vpow2.f32 %v4868_v27  ;;  %v4874_v31 = vmul.f32 -1.442695, %v3313_v1  ;;  %v3239_v18 = vrot.slane %v8011_v8, 6  ;;  %v3243_v56 = vrot.slane %v8011_v8, 7  ;;  %v8853_v27 = vld [vmem:[#allocation52_spill] sm:$0xff]  ;;  %v8854_v30 = vld [vmem:[#allocation50_spill] sm:$0xff] }
 0x727   : > { %6245 = vpow2.f32 %v4869_v29  ;;  %v3287_v63 = vadd.f32 %v3227_v2, %v8850_v46  ;;  %v3291_v9 = vadd.f32 %v3231_v38, %v8851_v51  ;;  %v3295_v34 = vadd.f32 %v3235_v43, %v8852_v5  ;;  %v8858_v46 = vld [vmem:[#allocation53_spill] sm:$0xff] }
 0x728   : > { %6247 = vpow2.f32 %v4870_v42  ;;  %v3299_v17 = vadd.f32 %v3239_v18, %v8853_v27  ;;  %v3303_v4 = vadd.f32 %v3243_v56, %v8854_v30  ;;  %v3247_v43 = vrot.slane %v8011_v8, 1  ;;  %v8856_v27 = vld [vmem:[#allocation47_spill] sm:$0xff] }
 0x729   : > { %6249 = vpow2.f32 %v4871_v13  ;;  %v3226_v13 = vrot.slane %v8013_v14, 3  ;;  %v3242_v30 = vrot.slane %v8013_v14, 7 }
 0x72a   : > { %6251 = vpow2.f32 %v4873_v36 }
 0x72b   : > { %6253 = vpow2.f32 %v4874_v31  ;;  %v3230_v31 = vrot.slane %v8013_v14, 4 }
 0x72c   : > { %6255 = vtanh.f32 %v3287_v63  ;;  %v8855_v63 = vld [vmem:[#allocation57_spill] sm:$0xff] }
 0x72d   : > { %6257 = vtanh.f32 %v3291_v9  ;;  %v3307_v9 = vadd.f32 %v8011_v8, %v8855_v63  ;;  %v8857_v63 = vld [vmem:[#allocation58_spill] sm:$0xff]  ;;  %v3290_v49 = vadd.f32 %v3230_v31, %v8858_v46  ;;  %v8863_v46 = vld [vmem:[#allocation59_spill] sm:$0xff] }
 0x72e   : > { %v6240_v29 = vpop.eup %6239  ;;  %6259 = vtanh.f32 %v3295_v34  ;;  %v3234_v34 = vrot.slane %v8013_v14, 5  ;;  %v3311_v51 = vadd.f32 %v3247_v43, %v8857_v63  ;;  %v8862_v43 = vld [vmem:[#allocation56_spill] sm:$0xff] }
 0x72f   : > { %v6242_v42 = vpop.eup %6241  ;;  %v3346_v1 = vadd.f32 1.0, %v6240_v29  ;;  %6261 = vtanh.f32 %v3299_v17  ;;  %v3302_v63 = vadd.f32 %v3242_v30, %v8862_v43 }
 0x730   : > { %v6244_v47 = vpop.eup %6243  ;;  %v3341_v2 = vadd.f32 1.0, %v6242_v42  ;;  %6263 = vtanh.f32 %v3303_v4  ;;  %v3251_v4 = vrot.slane %v8011_v8, 2  ;;  %v3246_v8 = vrot.slane %v8013_v14, 1 }
 0x731   : > { %v6246_v38 = vpop.eup %6245  ;;  %v3342_v36 = vadd.f32 1.0, %v6244_v47  ;;  %6265 = vrcp.f32 %v3346_v1  ;;  %v3238_v47 = vrot.slane %v8013_v14, 6  ;;  %v3294_v52 = vadd.f32 %v3234_v34, %v8859_v53 }
 0x732   : > { %v6248_v18 = vpop.eup %6247  ;;  %v3343_v56 = vadd.f32 1.0, %v6246_v38  ;;  %6267 = vrcp.f32 %v3341_v2  ;;  %v3286_v38 = vadd.f32 %v3226_v13, %v8856_v27  ;;  %v3250_v13 = vrot.slane %v8013_v14, 2  ;;  %v8861_v27 = vld [vmem:[#allocation55_spill] sm:$0xff] }
 0x733   : > { %v6250_v17 = vpop.eup %6249  ;;  %v3344_v29 = vadd.f32 1.0, %v6248_v18  ;;  %6269 = vrcp.f32 %v3342_v36  ;;  %v3306_v34 = vadd.f32 %v8013_v14, %v8863_v46  ;;  %v4876_v53 = vmul.f32 -1.442695, %v3290_v49 }
 0x734   : > { %v6252_v42 = vpop.eup %6251  ;;  %v3345_v1 = vadd.f32 1.0, %v6250_v17  ;;  %6271 = vrcp.f32 %v3343_v56  ;;  %v8860_v56 = vld [vmem:[#allocation61_spill] sm:$0xff]  ;;  %v4875_v31 = vmul.f32 -1.442695, %v3286_v38  ;;  %v3314_v30 = vadd.f32 %v3250_v13, %v8705_v57 }
 0x735   : > { %v6254_v2 = vpop.eup %6253  ;;  %v3347_v5 = vadd.f32 1.0, %v6252_v42  ;;  %6273 = vrcp.f32 %v3344_v29  ;;  %v3315_v3 = vadd.f32 %v3251_v4, %v8860_v56  ;;  %v3298_v42 = vadd.f32 %v3238_v47, %v8861_v27  ;;  %v8864_v56 = vld [vmem:[#allocation60_spill] sm:$0xff] }
 0x736   : > { %v6256_v18 = vpop.eup %6255  ;;  %v3348_v36 = vadd.f32 1.0, %v6254_v2  ;;  %6275 = vrcp.f32 %v3345_v1  ;;  %v3228_v2 = vrot.slane %v8015_v41, 3  ;;  %v3310_v45 = vadd.f32 %v3246_v8, %v8864_v56 }
 0x737   : > { %v6258_v17 = vpop.eup %6257  ;;  %6277 = vrcp.f32 %v3347_v5  ;;  %v3232_v5 = vrot.slane %v8015_v41, 4  ;;  %v4877_v47 = vmul.f32 -1.442695, %v3294_v52  ;;  %v4878_v38 = vmul.f32 -1.442695, %v3298_v42 }
 0x738   : > { %v6260_v29 = vpop.eup %6259  ;;  %6279 = vrcp.f32 %v3348_v36  ;;  %v3236_v36 = vrot.slane %v8015_v41, 5  ;;  %v4879_v14 = vmul.f32 -1.442695, %v3302_v63  ;;  %v3244_v49 = vrot.slane %v8015_v41, 7 }
 0x739   : > { %v6262_v1 = vpop.eup %6261  ;;  %6281 = vtanh.f32 %v3307_v9  ;;  %v3240_v9 = vrot.slane %v8015_v41, 6  ;;  %v3288_v46 = vadd.f32 %v3228_v2, %v8745_v16  ;;  %v4880_v52 = vmul.f32 -1.442695, %v3306_v34 }
 0x73a   : > { %v6264_v4 = vpop.eup %6263  ;;  %6283 = vtanh.f32 %v3311_v51  ;;  %v3292_v8 = vadd.f32 %v3232_v5, %v7183_v25  ;;  %v4881_v13 = vmul.f32 -1.442695, %v3310_v45  ;;  %v3296_v42 = vadd.f32 %v3236_v36, %v7192_v35 }
 0x73b   : > { %v6266_v27 = vpop.eup %6265  ;;  %6285 = vtanh.f32 %v3315_v3  ;;  %v4882_v57 = vmul.f32 -1.442695, %v3314_v30  ;;  %v3300_v2 = vadd.f32 %v3240_v9, %v7201_v22 }
 0x73c   : > { %v6268_v43 = vpop.eup %6267  ;;  %6287 = vpow2.f32 %v4875_v31  ;;  %v4884_v5 = vmul.f32 -1.442695, %v3292_v8 }
 0x73d   : > { %v6270_v51 = vpop.eup %6269  ;;  %v8063_v20 = vmul.f32 %v6268_v43, %v6256_v18  ;;  %6289 = vpow2.f32 %v4876_v53  ;;  %v3304_v53 = vadd.f32 %v3244_v49, %v7215_v19  ;;  %v4883_v43 = vmul.f32 -1.442695, %v3288_v46 }
 0x73e   : > { %v6272_v3 = vpop.eup %6271  ;;  %v8066_v56 = vmul.f32 %v6270_v51, %v6258_v17  ;;  %6291 = vpow2.f32 %v4877_v47  ;;  %v4886_v30 = vmul.f32 -1.442695, %v3300_v2  ;;  %v3248_v51 = vrot.slane %v8015_v41, 1 }
 0x73f   : > { %v6274_v31 = vpop.eup %6273  ;;  %v8069_v63 = vmul.f32 %v6272_v3, %v6260_v29  ;;  %6293 = vpow2.f32 %v4878_v38  ;;  %v4885_v29 = vmul.f32 -1.442695, %v3296_v42  ;;  %v4887_v9 = vmul.f32 -1.442695, %v3304_v53 }
 0x740   : > { %v6276_v18 = vpop.eup %6275  ;;  %6295 = vpow2.f32 %v4879_v14  ;;  %v8073_v34 = vmul.f32 %v6274_v31, %v6262_v1 }
 0x741   : > { %v6278_v17 = vpop.eup %6277  ;;  %6297 = vpow2.f32 %v4880_v52  ;;  %v8075_v45 = vmul.f32 %v6276_v18, %v6264_v4  ;;  %v3312_v18 = vadd.f32 %v3248_v51, %v7289_v12 }
 0x742   : > { %v6280_v47 = vpop.eup %6279  ;;  %6299 = vpow2.f32 %v4881_v13 }
 0x743   : > { %v6282_v36 = vpop.eup %6281  ;;  %6301 = vpow2.f32 %v4882_v57 }
 0x744   : > { %v6284_v38 = vpop.eup %6283  ;;  %6303 = vpow2.f32 %v4883_v43  ;;  %v8077_v14 = vmul.f32 %v6282_v36, %v6266_v27  ;;  %v3308_v27 = vadd.f32 %v8015_v41, %v7282_v6 }
 0x745   : > { %v6286_v49 = vpop.eup %6285  ;;  %6305 = vpow2.f32 %v4884_v5  ;;  %v8079_v46 = vmul.f32 %v6284_v38, %v6278_v17 }
 0x746   : > { %v6288_v1 = vpop.eup %6287  ;;  %6307 = vpow2.f32 %v4885_v29  ;;  %v8082_v4 = vmul.f32 %v6286_v49, %v6280_v47  ;;  %v3252_v47 = vrot.slane %v8015_v41, 2  ;;  %v4889_v49 = vmul.f32 -1.442695, %v3312_v18 }
 0x747   : > { %v6290_v52 = vpop.eup %6289  ;;  %v3389_v8 = vadd.f32 1.0, %v6288_v1  ;;  %6309 = vpow2.f32 %v4886_v30  ;;  %v4888_v30 = vmul.f32 -1.442695, %v3308_v27 }
 0x748   : > { %v6292_v57 = vpop.eup %6291  ;;  %v3390_v3 = vadd.f32 1.0, %v6290_v52  ;;  %6311 = vpow2.f32 %v4887_v9 }
 0x749   : > { %v6294_v13 = vpop.eup %6293  ;;  %v3391_v42 = vadd.f32 1.0, %v6292_v57  ;;  %6313 = vrcp.f32 %v3389_v8  ;;  %v3316_v8 = vadd.f32 %v3252_v47, %v7298_v26 }
 0x74a   : > { %v6296_v31 = vpop.eup %6295  ;;  %v3392_v2 = vadd.f32 1.0, %v6294_v13  ;;  %6315 = vrcp.f32 %v3390_v3 }
 0x74b   : > { %v6298_v53 = vpop.eup %6297  ;;  %v3393_v43 = vadd.f32 1.0, %v6296_v31  ;;  %6317 = vrcp.f32 %v3391_v42  ;;  %v3477_v42 = vrot.slane %v7936_v48, 7  ;;  %v3481_v48 = vrot.slane %v7952_v44, 7 }
 0x74c   : > { %v6300_v17 = vpop.eup %6299  ;;  %v3394_v5 = vadd.f32 1.0, %v6298_v53  ;;  %6319 = vrcp.f32 %v3392_v2  ;;  %v3478_v2 = vrot.slane %v7940_v39, 7 }
 0x74d   : > { %v6302_v29 = vpop.eup %6301  ;;  %v3395_v36 = vadd.f32 1.0, %v6300_v17  ;;  %6321 = vrcp.f32 %v3393_v43  ;;  %v3479_v43 = vrot.slane %v7944_v10, 7  ;;  %v4890_v17 = vmul.f32 -1.442695, %v3316_v8 }
 0x74e   : > { %v6304_v38 = vpop.eup %6303  ;;  %v3396_v9 = vadd.f32 1.0, %v6302_v29  ;;  %6323 = vrcp.f32 %v3394_v5  ;;  %v3480_v29 = vrot.slane %v7948_v60, 7  ;;  %v3483_v60 = vrot.slane %v7960_v61, 7 }
 0x74f   : > { %v6306_v1 = vpop.eup %6305  ;;  %6325 = vrcp.f32 %v3395_v36  ;;  %v3445_v52 = vadd.f32 1.0, %v6304_v38 }
 0x750   : > { %v6308_v51 = vpop.eup %6307  ;;  %6327 = vrcp.f32 %v3396_v9  ;;  %v3446_v57 = vadd.f32 1.0, %v6306_v1 }
 0x751   : > { %v6310_v3 = vpop.eup %6309  ;;  %6329 = vpow2.f32 %v4888_v30  ;;  %v3447_v13 = vadd.f32 1.0, %v6308_v51 }
 0x752   : > { %v6312_v41 = vpop.eup %6311  ;;  %6331 = vpow2.f32 %v4889_v49  ;;  %v3448_v27 = vadd.f32 1.0, %v6310_v3  ;;  %v3482_v49 = vrot.slane %v7956_v23, 7 }
 0x753   : > { %v6314_v31 = vpop.eup %6313  ;;  %v3449_v18 = vadd.f32 1.0, %v6312_v41  ;;  %6333 = vrcp.f32 %v3445_v52 }
 0x754   : > { %v6316_v53 = vpop.eup %6315  ;;  %6335 = vrcp.f32 %v3446_v57  ;;  %v3493_v5 = vmul.f32 %v6314_v31, %v3477_v42 }
 0x755   : > { %v6318_v47 = vpop.eup %6317  ;;  %6337 = vrcp.f32 %v3447_v13  ;;  %v3494_v36 = vmul.f32 %v6316_v53, %v3478_v2 }
 0x756   : > { %v6320_v30 = vpop.eup %6319  ;;  %6339 = vrcp.f32 %v3448_v27  ;;  %v3495_v38 = vmul.f32 %v6318_v47, %v3479_v43  ;;  %v8095_v39 = vadd.f32 %v8063_v20, %v3493_v5  ;;  %v3484_v20 = vrot.slane %v7964_v59, 7 }
 0x757   : > { %v6322_v9 = vpop.eup %6321  ;;  %6341 = vrcp.f32 %v3449_v18  ;;  %v3496_v10 = vmul.f32 %v6320_v30, %v3480_v29  ;;  %v8099_v1 = vadd.f32 %v8066_v56, %v3494_v36 }
 0x758   : > { %v6324_v52 = vpop.eup %6323  ;;  %6343 = vpow2.f32 %v4890_v17  ;;  %v3497_v51 = vmul.f32 %v6322_v9, %v3481_v48  ;;  %v8103_v44 = vadd.f32 %v8069_v63, %v3495_v38 }
 0x759   : > { %v6326_v8 = vpop.eup %6325  ;;  %v3498_v57 = vmul.f32 %v6324_v52, %v3482_v49  ;;  %v8107_v3 = vadd.f32 %v8073_v34, %v3496_v10  ;;  %6345 = vtanh.f32 %v8095_v39 }
 0x75a   : > { %v6328_v23 = vpop.eup %6327  ;;  %v3499_v56 = vmul.f32 %v6326_v8, %v3483_v60  ;;  %v8111_v13 = vadd.f32 %v8075_v45, %v3497_v51  ;;  %6347 = vtanh.f32 %v8099_v1 }
 0x75b   : > { %v6330_v61 = vpop.eup %6329  ;;  %v3500_v41 = vmul.f32 %v6328_v23, %v3484_v20  ;;  %v8115_v63 = vadd.f32 %v8077_v14, %v3498_v57  ;;  %6349 = vtanh.f32 %v8103_v44 }
 0x75c   : > { %v6332_v59 = vpop.eup %6331  ;;  %v3450_v42 = vadd.f32 1.0, %v6330_v61  ;;  %v8119_v34 = vadd.f32 %v8079_v46, %v3499_v56  ;;  %6351 = vtanh.f32 %v8107_v3 }
 0x75d   : > { %v6334_v27 = vpop.eup %6333  ;;  %v3451_v31 = vadd.f32 1.0, %v6332_v59  ;;  %v8123_v45 = vadd.f32 %v8082_v4, %v3500_v41  ;;  %6353 = vtanh.f32 %v8111_v13 }
 0x75e   : > { %v6336_v2 = vpop.eup %6335  ;;  %6355 = vrcp.f32 %v3450_v42 }
 0x75f   : > { %v6338_v14 = vpop.eup %6337  ;;  %6357 = vrcp.f32 %v3451_v31 }
 0x760   : > { %v6340_v18 = vpop.eup %6339  ;;  %6359 = vtanh.f32 %v8115_v63 }
 0x761   : > { %v6342_v53 = vpop.eup %6341  ;;  %6361 = vtanh.f32 %v8119_v34 }
 0x762   : > { %v6344_v46 = vpop.eup %6343  ;;  %6363 = vtanh.f32 %v8123_v45 }
 0x763   : > { %v6346_v43 = vpop.eup %6345  ;;  %v3452_v17 = vadd.f32 1.0, %v6344_v46 }
 0x764   : > { %v6348_v5 = vpop.eup %6347  ;;  %v3525_v4 = vmul.f32 %v6346_v43, %v6334_v27 }
 0x765   : > { %v6350_v47 = vpop.eup %6349  ;;  %6365 = vrcp.f32 %v3452_v17  ;;  %v3526_v29 = vmul.f32 %v6348_v5, %v6336_v2  ;;  %v8880_v5 = vld [vmem:[#allocation37_spill] sm:$0xff] }
 0x766   : > { %v6352_v36 = vpop.eup %6351  ;;  %v3527_v30 = vmul.f32 %v6350_v47, %v6338_v14  ;;  %v3541_v48 = vrot.slane %v3525_v4, 5 }
 0x767   : > { %v6354_v38 = vpop.eup %6353  ;;  %v3528_v9 = vmul.f32 %v6352_v36, %v6340_v18  ;;  %v3542_v49 = vrot.slane %v3526_v29, 4 }
 0x768   : > { %v6356_v10 = vpop.eup %6355  ;;  %v3529_v52 = vmul.f32 %v6354_v38, %v6342_v53  ;;  %v3544_v60 = vrot.slane %v3527_v30, 3 }
 0x769   : > { %v6358_v51 = vpop.eup %6357  ;;  %v3543_v8 = vsel %vm1150_vm1, %v3542_v49, %v3541_v48  ;;  %v3546_v20 = vrot.slane %v3528_v9, 2 }
 0x76a   : > { %v6360_v57 = vpop.eup %6359  ;;  %v3545_v23 = vsel %vm1153_vm2, %v3544_v60, %v3543_v8  ;;  %v3548_v56 = vrot.slane %v3529_v52, 1 }
 0x76b   : > { %v6362_v61 = vpop.eup %6361  ;;  %v3530_v41 = vmul.f32 %v6360_v57, %v6356_v10  ;;  %v3547_v59 = vsel %vm1156_vm3, %v3546_v20, %v3545_v23  ;;  %v8882_v20 = vld [vmem:[#allocation39_spill] sm:$0xff]  ;;  %v8883_v23 = vld [vmem:[#allocation40_spill] sm:$0xff] }
 0x76c   : > { %v3531_v42 = vmul.f32 %v6362_v61, %v6358_v51  ;;  %v3549_v27 = vsel %vm1159_vm4, %v3548_v56, %v3547_v59  ;;  %v6364_v31 = vpop.eup %6363  ;;  %v8881_v51 = vld [vmem:[#allocation38_spill] sm:$0xff]  ;;  %v8884_v61 = vld [vmem:[#allocation41_spill] sm:$0xff] }
 0x76d   : > { %v3550_v2 = vsel %vm1162_vm5, %v3530_v41, %v3549_v27  ;;  %v8885_v59 = vld [vmem:[#allocation42_spill] sm:$0xff]  ;;  %v8886_v27 = vld [vmem:[#allocation43_spill] sm:$0xff] }
 0x76e   : > { %v3551_v14 = vrot.slane %v3531_v42, 7 }
 0x76f   : > { %v6366_v18 = vpop.eup %6365 }
 0x770   : > { %v3532_v53 = vmul.f32 %v6366_v18, %v6364_v31  ;;  %v3552_v46 = vsel %vm1165_vm6, %v3551_v14, %v3550_v2  ;;  %v8887_v14 = vld [vmem:[#allocation45_spill] sm:$0xff] }
 0x772   : > { %v3553_v43 = vrot.slane %v3532_v53, 6 }
 0x774   : > { %v3554_v17 = vsel %vm1168_vm7, %v3553_v43, %v3552_v46 }
 0x775   : > { %3621 = vmatmul.mubr.f32.vlgmr.msra.gmra.mrb[28].mxu0 %v3554_v17  ;;  %3692 = vmatmul.mubr.f32.vlgmr.msra.gmra.mrb[28].mxu1 %v3554_v17 }
 0x776   : > { %5449 = vmatpush1.bf16.msra.mxu0 %v6890_v24  ;;  %5481 = vmatpush1.bf16.msra.mxu1 %v6895_v28  ;;  %v8865_v24 = vld [vmem:[#allocation22_spill] sm:$0xff]  ;;  %v8866_v28 = vld [vmem:[#allocation23_spill] sm:$0xff] }
 0x777   : > { %5451 = vmatprep.subr.bf16.mxu0 %v6899_v32  ;;  %5483 = vmatprep.subr.bf16.mxu1 %v6901_v33  ;;  %v8867_v32 = vld [vmem:[#allocation24_spill] sm:$0xff]  ;;  %v8868_v33 = vld [vmem:[#allocation25_spill] sm:$0xff] }
 0x778   : > { %4097 = vmatprep.mubr.f32.mxu0 %v8674_v7  ;;  %4168 = vmatprep.mubr.f32.mxu1 %v8674_v7  ;;  %v8870_v7 = vld [vmem:[#allocation27_spill] sm:$0xff] }
 0x77a   : > { %5453 = vmatpush1.bf16.msra.mxu0 %v6905_v37  ;;  %5485 = vmatpush1.bf16.msra.mxu1 %v8707_v58  ;;  %v8869_v37 = vld [vmem:[#allocation26_spill] sm:$0xff]  ;;  %v8871_v58 = vld [vmem:[#allocation28_spill] sm:$0xff] }
 0x77b   : > { %5455 = vmatprep.subr.bf16.mxu0 %v8708_v50  ;;  %5487 = vmatprep.subr.bf16.mxu1 %v8709_v40  ;;  %v8872_v50 = vld [vmem:[#allocation29_spill] sm:$0xff]  ;;  %v8873_v40 = vld [vmem:[#allocation30_spill] sm:$0xff] }
 0x77e   : > { %5457 = vmatpush1.bf16.msra.mxu0 %v8710_v0  ;;  %5489 = vmatpush1.bf16.msra.mxu1 %v8711_v15  ;;  %v8874_v0 = vld [vmem:[#allocation31_spill] sm:$0xff]  ;;  %v8875_v15 = vld [vmem:[#allocation32_spill] sm:$0xff] }
 0x77f   : > { %5459 = vmatprep.subr.bf16.mxu0 %v8712_v62  ;;  %5491 = vmatprep.subr.bf16.mxu1 %v8713_v54  ;;  %v8876_v62 = vld [vmem:[#allocation33_spill] sm:$0xff]  ;;  %v8877_v54 = vld [vmem:[#allocation34_spill] sm:$0xff] }
 0x782   : > { %5461 = vmatpush1.bf16.msra.mxu0 %v8746_v55  ;;  %5493 = vmatpush1.bf16.msra.mxu1 %v8747_v21  ;;  %v8878_v55 = vld [vmem:[#allocation35_spill] sm:$0xff]  ;;  %v8879_v21 = vld [vmem:[#allocation36_spill] sm:$0xff] }
 0x783   : > { %5463 = vmatprep.subr.bf16.mxu0 %v8865_v24  ;;  %5495 = vmatprep.subr.bf16.mxu1 %v8866_v28 }
 0x786   : > { %5465 = vmatpush1.bf16.msra.mxu0 %v8867_v32  ;;  %5497 = vmatpush1.bf16.msra.mxu1 %v8868_v33 }
 0x787   : > { %5467 = vmatprep.subr.bf16.mxu0 %v8869_v37  ;;  %5499 = vmatprep.subr.bf16.mxu1 %v8870_v7 }
 0x78a   : > { %5469 = vmatpush1.bf16.msra.mxu0 %v8871_v58  ;;  %5501 = vmatpush1.bf16.msra.mxu1 %v8872_v50 }
 0x78b   : > { %5471 = vmatprep.subr.bf16.mxu0 %v8873_v40  ;;  %5503 = vmatprep.subr.bf16.mxu1 %v8874_v0  ;;  %v8888_v40 = vld [vmem:[#allocation46_spill] sm:$0xff] }
 0x78e   : > { %5473 = vmatpush1.bf16.msra.mxu0 %v8875_v15  ;;  %5505 = vmatpush1.bf16.msra.mxu1 %v8876_v62  ;;  %v8889_v15 = vld [vmem:[#allocation48_spill] sm:$0xff] }
 0x78f   : > { %5475 = vmatprep.subr.bf16.mxu0 %v8877_v54  ;;  %5507 = vmatprep.subr.bf16.mxu1 %v8878_v55  ;;  %v8890_v54 = vld [vmem:[#allocation49_spill] sm:$0xff] }
 0x792   : > { %5477 = vmatpush1.bf16.msra.mxu0 %v8879_v21  ;;  %5509 = vmatpush1.bf16.msra.mxu1 %v8880_v5  ;;  %v8891_v21 = vld [vmem:[#allocation52_spill] sm:$0xff] }
 0x848   : > { %v3622_v4 = vpop.f32.mrb[28].mxu0  ;;  %v8168_v47 = vpop.f32.mrb[28].mxu1 }
 0x849   : > { %v3702_v29 = vrot.slane %v3622_v4, 2  ;;  %v3706_v36 = vrot.slane %v3622_v4, 3  ;;  %v3710_v30 = vrot.slane %v3622_v4, 4  ;;  %v3714_v48 = vrot.slane %v3622_v4, 5  ;;  %v8170_v38 = vpop.f32.mrb[29].mxu0  ;;  %v8172_v9 = vpop.f32.mrb[29].mxu1 }
 0x84a   : > { %v3718_v49 = vrot.slane %v3622_v4, 6  ;;  %v3722_v10 = vrot.slane %v3622_v4, 7  ;;  %v3726_v52 = vrot.slane %v3622_v4, 1  ;;  %v3786_v60 = vadd.f32 %v3622_v4, %v8848_v11  ;;  %v8892_v4 = vld [vmem:[#allocation50_spill] sm:$0xff] }
 0x84b   : > { %v3762_v8 = vadd.f32 %v3702_v29, %v8881_v51  ;;  %v3766_v57 = vadd.f32 %v3706_v36, %v8882_v20  ;;  %v3770_v56 = vadd.f32 %v3710_v30, %v8883_v23  ;;  %v3774_v41 = vadd.f32 %v3714_v48, %v8884_v61 }
 0x84c   : > { %v3778_v42 = vadd.f32 %v3718_v49, %v8885_v59  ;;  %v3782_v31 = vadd.f32 %v3722_v10, %v8886_v27  ;;  %v4897_v2 = vmul.f32 -1.442695, %v3786_v60  ;;  %v3790_v18 = vadd.f32 %v3726_v52, %v8887_v14 }
 0x84d   : > { %v4891_v53 = vmul.f32 -1.442695, %v3762_v8  ;;  %v4892_v46 = vmul.f32 -1.442695, %v3766_v57  ;;  %v4893_v43 = vmul.f32 -1.442695, %v3770_v56 }
 0x84e   : > { %v4894_v17 = vmul.f32 -1.442695, %v3774_v41  ;;  %6367 = vpow2.f32 %v4897_v2  ;;  %v4895_v24 = vmul.f32 -1.442695, %v3778_v42  ;;  %v3704_v28 = vrot.slane %v8168_v47, 2 }
 0x84f   : > { %6369 = vpow2.f32 %v4891_v53  ;;  %v3708_v32 = vrot.slane %v8168_v47, 3  ;;  %v4896_v33 = vmul.f32 -1.442695, %v3782_v31  ;;  %v3712_v37 = vrot.slane %v8168_v47, 4 }
 0x850   : > { %6371 = vpow2.f32 %v4892_v46  ;;  %v4898_v7 = vmul.f32 -1.442695, %v3790_v18  ;;  %v3716_v58 = vrot.slane %v8168_v47, 5  ;;  %v3720_v50 = vrot.slane %v8168_v47, 6  ;;  %v8893_v46 = vld [vmem:[#allocation57_spill] sm:$0xff] }
 0x851   : > { %6373 = vpow2.f32 %v4893_v43  ;;  %v3764_v0 = vadd.f32 %v3704_v28, %v8888_v40  ;;  %v3768_v62 = vadd.f32 %v3708_v32, %v8889_v15  ;;  %v3772_v55 = vadd.f32 %v3712_v37, %v8890_v54 }
 0x852   : > { %6375 = vpow2.f32 %v4894_v17  ;;  %v3776_v5 = vadd.f32 %v3716_v58, %v8891_v21  ;;  %v3780_v29 = vadd.f32 %v3720_v50, %v8892_v4  ;;  %v3724_v49 = vrot.slane %v8168_v47, 7 }
 0x853   : > { %6377 = vpow2.f32 %v4895_v24  ;;  %v3703_v60 = vrot.slane %v8170_v38, 2  ;;  %v3707_v56 = vrot.slane %v8170_v38, 3  ;;  %v3728_v31 = vrot.slane %v8168_v47, 1 }
 0x854   : > { %6379 = vpow2.f32 %v4896_v33  ;;  %v3711_v2 = vrot.slane %v8170_v38, 4  ;;  %v3784_v43 = vadd.f32 %v3724_v49, %v8893_v46  ;;  %v3715_v17 = vrot.slane %v8170_v38, 5  ;;  %v8894_v33 = vld [vmem:[#allocation47_spill] sm:$0xff] }
 0x855   : > { %6381 = vpow2.f32 %v4898_v7  ;;  %v3719_v32 = vrot.slane %v8170_v38, 6  ;;  %v3763_v37 = vadd.f32 %v3703_v60, %v8894_v33  ;;  %v3723_v50 = vrot.slane %v8170_v38, 7 }
 0x856   : > { %6383 = vtanh.f32 %v3764_v0  ;;  %v8895_v0 = vld [vmem:[#allocation53_spill] sm:$0xff]  ;;  %v3727_v60 = vrot.slane %v8170_v38, 1 }
 0x857   : > { %6385 = vtanh.f32 %v3768_v62  ;;  %v3767_v62 = vadd.f32 %v3707_v56, %v8895_v0 }
 0x858   : > { %v6368_v36 = vpop.eup %6367  ;;  %6387 = vtanh.f32 %v3772_v55 }
 0x859   : > { %v6370_v30 = vpop.eup %6369  ;;  %v3824_v48 = vadd.f32 1.0, %v6368_v36  ;;  %6389 = vtanh.f32 %v3776_v5 }
 0x85a   : > { %v6372_v10 = vpop.eup %6371  ;;  %v3818_v52 = vadd.f32 1.0, %v6370_v30  ;;  %6391 = vtanh.f32 %v3780_v29  ;;  %v8896_v29 = vld [vmem:[#allocation58_spill] sm:$0xff] }
 0x85b   : > { %v6374_v8 = vpop.eup %6373  ;;  %v3819_v57 = vadd.f32 1.0, %v6372_v10  ;;  %6393 = vrcp.f32 %v3824_v48  ;;  %v3788_v36 = vadd.f32 %v8168_v47, %v8896_v29  ;;  %v8897_v30 = vld [vmem:[#allocation54_spill] sm:$0xff]  ;;  %v8898_v10 = vld [vmem:[#allocation61_spill] sm:$0xff]  ;;  %v8901_v47 = vld [vmem:[#allocation59_spill] sm:$0xff] }
 0x85c   : > { %v6376_v41 = vpop.eup %6375  ;;  %v3820_v42 = vadd.f32 1.0, %v6374_v8  ;;  %6395 = vrcp.f32 %v3818_v52  ;;  %v3771_v48 = vadd.f32 %v3711_v2, %v8897_v30  ;;  %v3792_v52 = vadd.f32 %v3728_v31, %v8898_v10  ;;  %v8899_v8 = vld [vmem:[#allocation55_spill] sm:$0xff]  ;;  %v8902_v31 = vld [vmem:[#allocation60_spill] sm:$0xff] }
 0x85d   : > { %v6378_v18 = vpop.eup %6377  ;;  %v3821_v53 = vadd.f32 1.0, %v6376_v41  ;;  %6397 = vrcp.f32 %v3819_v57  ;;  %v3775_v57 = vadd.f32 %v3715_v17, %v8899_v8  ;;  %v4900_v2 = vmul.f32 -1.442695, %v3767_v62 }
 0x85e   : > { %v6380_v24 = vpop.eup %6379  ;;  %v3822_v28 = vadd.f32 1.0, %v6378_v18  ;;  %6399 = vrcp.f32 %v3820_v42  ;;  %v8900_v42 = vld [vmem:[#allocation56_spill] sm:$0xff]  ;;  %v4899_v18 = vmul.f32 -1.442695, %v3763_v37  ;;  %v3787_v10 = vadd.f32 %v8170_v38, %v8902_v31 }
 0x85f   : > { %v6382_v7 = vpop.eup %6381  ;;  %v3823_v58 = vadd.f32 1.0, %v6380_v24  ;;  %6401 = vrcp.f32 %v3821_v53  ;;  %v3779_v56 = vadd.f32 %v3719_v32, %v8900_v42  ;;  %v3705_v53 = vrot.slane %v8172_v9, 2  ;;  %v8903_v32 = vld [vmem:[#allocation62_spill] sm:$0xff] }
 0x860   : > { %v6384_v55 = vpop.eup %6383  ;;  %v3825_v5 = vadd.f32 1.0, %v6382_v7  ;;  %6403 = vrcp.f32 %v3822_v28  ;;  %v3783_v28 = vadd.f32 %v3723_v50, %v8901_v47  ;;  %v3709_v7 = vrot.slane %v8172_v9, 3 }
 0x861   : > { %v6386_v49 = vpop.eup %6385  ;;  %6405 = vrcp.f32 %v3823_v58  ;;  %v4901_v17 = vmul.f32 -1.442695, %v3771_v48  ;;  %v3791_v37 = vadd.f32 %v3727_v60, %v8903_v32  ;;  %v4902_v42 = vmul.f32 -1.442695, %v3775_v57 }
 0x862   : > { %v6388_v41 = vpop.eup %6387  ;;  %6407 = vrcp.f32 %v3825_v5  ;;  %v3713_v5 = vrot.slane %v8172_v9, 4  ;;  %v4903_v50 = vmul.f32 -1.442695, %v3779_v56  ;;  %v3721_v62 = vrot.slane %v8172_v9, 6 }
 0x863   : > { %v6390_v24 = vpop.eup %6389  ;;  %6409 = vtanh.f32 %v3784_v43  ;;  %v3717_v43 = vrot.slane %v8172_v9, 5  ;;  %v4904_v38 = vmul.f32 -1.442695, %v3783_v28  ;;  %v3769_v48 = vadd.f32 %v3709_v7, %v7183_v25 }
 0x864   : > { %v6392_v58 = vpop.eup %6391  ;;  %6411 = vtanh.f32 %v3788_v36  ;;  %v3765_v36 = vadd.f32 %v3705_v53, %v8745_v16  ;;  %v4905_v60 = vmul.f32 -1.442695, %v3787_v10  ;;  %v3773_v57 = vadd.f32 %v3713_v5, %v7192_v35 }
 0x865   : > { %v6394_v8 = vpop.eup %6393  ;;  %6413 = vtanh.f32 %v3792_v52  ;;  %v4906_v32 = vmul.f32 -1.442695, %v3791_v37  ;;  %v3777_v53 = vadd.f32 %v3717_v43, %v7201_v22 }
 0x866   : > { %v6396_v30 = vpop.eup %6395  ;;  %6415 = vpow2.f32 %v4899_v18  ;;  %v4907_v28 = vmul.f32 -1.442695, %v3765_v36 }
 0x867   : > { %v6398_v47 = vpop.eup %6397  ;;  %v8220_v0 = vmul.f32 %v6396_v30, %v6384_v55  ;;  %6417 = vpow2.f32 %v4900_v2  ;;  %v3781_v30 = vadd.f32 %v3721_v62, %v7215_v19 }
 0x868   : > { %v6400_v52 = vpop.eup %6399  ;;  %v8223_v31 = vmul.f32 %v6398_v47, %v6386_v49  ;;  %6419 = vpow2.f32 %v4901_v17  ;;  %v4908_v47 = vmul.f32 -1.442695, %v3769_v48 }
 0x869   : > { %v6402_v18 = vpop.eup %6401  ;;  %v8226_v56 = vmul.f32 %v6400_v52, %v6388_v41  ;;  %6421 = vpow2.f32 %v4902_v42  ;;  %v4909_v41 = vmul.f32 -1.442695, %v3773_v57  ;;  %v4910_v42 = vmul.f32 -1.442695, %v3777_v53 }
 0x86a   : > { %v6404_v55 = vpop.eup %6403  ;;  %6423 = vpow2.f32 %v4903_v50  ;;  %v8230_v2 = vmul.f32 %v6402_v18, %v6390_v24  ;;  %v4911_v37 = vmul.f32 -1.442695, %v3781_v30  ;;  %v3725_v24 = vrot.slane %v8172_v9, 7 }
 0x86b   : > { %v6406_v49 = vpop.eup %6405  ;;  %6425 = vpow2.f32 %v4904_v38  ;;  %v8232_v10 = vmul.f32 %v6404_v55, %v6392_v58 }
 0x86c   : > { %v6408_v7 = vpop.eup %6407  ;;  %6427 = vpow2.f32 %v4905_v60  ;;  %v3785_v18 = vadd.f32 %v3725_v24, %v7282_v6 }
 0x86d   : > { %v6410_v17 = vpop.eup %6409  ;;  %6429 = vpow2.f32 %v4906_v32 }
 0x86e   : > { %v6412_v5 = vpop.eup %6411  ;;  %6431 = vpow2.f32 %v4907_v28  ;;  %v8234_v43 = vmul.f32 %v6410_v17, %v6406_v49 }
 0x86f   : > { %v6414_v50 = vpop.eup %6413  ;;  %6433 = vpow2.f32 %v4908_v47  ;;  %v8237_v62 = vmul.f32 %v6412_v5, %v6394_v8  ;;  %v3789_v8 = vadd.f32 %v8172_v9, %v7289_v12 }
 0x870   : > { %v6416_v36 = vpop.eup %6415  ;;  %6435 = vpow2.f32 %v4909_v41  ;;  %v8239_v58 = vmul.f32 %v6414_v50, %v6408_v7  ;;  %v3729_v7 = vrot.slane %v8172_v9, 1 }
 0x871   : > { %v6418_v38 = vpop.eup %6417  ;;  %v3866_v48 = vadd.f32 1.0, %v6416_v36  ;;  %6437 = vpow2.f32 %v4910_v42  ;;  %v4912_v42 = vmul.f32 -1.442695, %v3785_v18  ;;  %v4913_v50 = vmul.f32 -1.442695, %v3789_v8 }
 0x872   : > { %v6420_v32 = vpop.eup %6419  ;;  %v3867_v52 = vadd.f32 1.0, %v6418_v38  ;;  %6439 = vpow2.f32 %v4911_v37 }
 0x873   : > { %v6422_v60 = vpop.eup %6421  ;;  %v3868_v57 = vadd.f32 1.0, %v6420_v32  ;;  %6441 = vrcp.f32 %v3866_v48  ;;  %v3793_v48 = vadd.f32 %v3729_v7, %v7298_v26 }
 0x874   : > { %v6424_v53 = vpop.eup %6423  ;;  %v3869_v55 = vadd.f32 1.0, %v6422_v60  ;;  %6443 = vrcp.f32 %v3867_v52 }
 0x875   : > { %v6426_v30 = vpop.eup %6425  ;;  %v3870_v28 = vadd.f32 1.0, %v6424_v53  ;;  %6445 = vrcp.f32 %v3868_v57  ;;  %v3954_v57 = vrot.slane %v8095_v39, 7  ;;  %v3958_v39 = vrot.slane %v8111_v13, 7 }
 0x876   : > { %v6428_v49 = vpop.eup %6427  ;;  %v3871_v47 = vadd.f32 1.0, %v6426_v30  ;;  %6447 = vrcp.f32 %v3869_v55  ;;  %v3955_v55 = vrot.slane %v8099_v1, 7 }
 0x877   : > { %v6430_v41 = vpop.eup %6429  ;;  %v3872_v17 = vadd.f32 1.0, %v6428_v49  ;;  %6449 = vrcp.f32 %v3870_v28  ;;  %v3956_v28 = vrot.slane %v8103_v44, 7  ;;  %v4914_v49 = vmul.f32 -1.442695, %v3793_v48 }
 0x878   : > { %v6432_v5 = vpop.eup %6431  ;;  %v3873_v37 = vadd.f32 1.0, %v6430_v41  ;;  %6451 = vrcp.f32 %v3871_v47  ;;  %v3957_v41 = vrot.slane %v8107_v3, 7  ;;  %v3960_v3 = vrot.slane %v8119_v34, 7 }
 0x879   : > { %v6434_v24 = vpop.eup %6433  ;;  %6453 = vrcp.f32 %v3872_v17  ;;  %v3922_v36 = vadd.f32 1.0, %v6432_v5 }
 0x87a   : > { %v6436_v38 = vpop.eup %6435  ;;  %6455 = vrcp.f32 %v3873_v37  ;;  %v3923_v32 = vadd.f32 1.0, %v6434_v24 }
 0x87b   : > { %v6438_v52 = vpop.eup %6437  ;;  %6457 = vpow2.f32 %v4912_v42  ;;  %v3924_v60 = vadd.f32 1.0, %v6436_v38 }
 0x87c   : > { %v6440_v9 = vpop.eup %6439  ;;  %6459 = vpow2.f32 %v4913_v50  ;;  %v3925_v18 = vadd.f32 1.0, %v6438_v52  ;;  %v3959_v50 = vrot.slane %v8115_v63, 7 }
 0x87d   : > { %v6442_v53 = vpop.eup %6441  ;;  %v3926_v8 = vadd.f32 1.0, %v6440_v9  ;;  %6461 = vrcp.f32 %v3922_v36 }
 0x87e   : > { %v6444_v30 = vpop.eup %6443  ;;  %6463 = vrcp.f32 %v3923_v32  ;;  %v3970_v47 = vmul.f32 %v6442_v53, %v3954_v57 }
 0x87f   : > { %v6446_v7 = vpop.eup %6445  ;;  %6465 = vrcp.f32 %v3924_v60  ;;  %v3971_v17 = vmul.f32 %v6444_v30, %v3955_v55 }
 0x880   : > { %v6448_v42 = vpop.eup %6447  ;;  %6467 = vrcp.f32 %v3925_v18  ;;  %v3972_v5 = vmul.f32 %v6446_v7, %v3956_v28  ;;  %v8252_v1 = vadd.f32 %v8220_v0, %v3970_v47  ;;  %v3961_v0 = vrot.slane %v8123_v45, 7 }
 0x881   : > { %v6450_v37 = vpop.eup %6449  ;;  %6469 = vrcp.f32 %v3926_v8  ;;  %v3973_v44 = vmul.f32 %v6448_v42, %v3957_v41  ;;  %v8256_v24 = vadd.f32 %v8223_v31, %v3971_v17 }
 0x882   : > { %v6452_v36 = vpop.eup %6451  ;;  %6471 = vpow2.f32 %v4914_v49  ;;  %v3974_v38 = vmul.f32 %v6450_v37, %v3958_v39  ;;  %v8260_v13 = vadd.f32 %v8226_v56, %v3972_v5 }
 0x883   : > { %v6454_v48 = vpop.eup %6453  ;;  %v3975_v32 = vmul.f32 %v6452_v36, %v3959_v50  ;;  %v8264_v52 = vadd.f32 %v8230_v2, %v3973_v44  ;;  %6473 = vtanh.f32 %v8252_v1 }
 0x884   : > { %v6456_v63 = vpop.eup %6455  ;;  %v3976_v31 = vmul.f32 %v6454_v48, %v3960_v3  ;;  %v8268_v60 = vadd.f32 %v8232_v10, %v3974_v38  ;;  %6475 = vtanh.f32 %v8256_v24 }
 0x885   : > { %v6458_v34 = vpop.eup %6457  ;;  %v3977_v9 = vmul.f32 %v6456_v63, %v3961_v0  ;;  %v8272_v56 = vadd.f32 %v8234_v43, %v3975_v32  ;;  %6477 = vtanh.f32 %v8260_v13 }
 0x886   : > { %v6460_v45 = vpop.eup %6459  ;;  %v3927_v57 = vadd.f32 1.0, %v6458_v34  ;;  %v8276_v2 = vadd.f32 %v8237_v62, %v3976_v31  ;;  %6479 = vtanh.f32 %v8264_v52 }
 0x887   : > { %v6462_v18 = vpop.eup %6461  ;;  %v3928_v53 = vadd.f32 1.0, %v6460_v45  ;;  %v8280_v10 = vadd.f32 %v8239_v58, %v3977_v9  ;;  %6481 = vtanh.f32 %v8268_v60 }
 0x888   : > { %v6464_v55 = vpop.eup %6463  ;;  %6483 = vrcp.f32 %v3927_v57 }
 0x889   : > { %v6466_v43 = vpop.eup %6465  ;;  %6485 = vrcp.f32 %v3928_v53 }
 0x88a   : > { %v6468_v8 = vpop.eup %6467  ;;  %6487 = vtanh.f32 %v8272_v56 }
 0x88b   : > { %v6470_v30 = vpop.eup %6469  ;;  %6489 = vtanh.f32 %v8276_v2 }
 0x88c   : > { %v6472_v62 = vpop.eup %6471  ;;  %6491 = vtanh.f32 %v8280_v10 }
 0x88d   : > { %v6474_v28 = vpop.eup %6473  ;;  %v3929_v49 = vadd.f32 1.0, %v6472_v62 }
 0x88e   : > { %v6476_v47 = vpop.eup %6475  ;;  %v4002_v58 = vmul.f32 %v6474_v28, %v6462_v18 }
 0x88f   : > { %v6478_v7 = vpop.eup %6477  ;;  %6493 = vrcp.f32 %v3929_v49  ;;  %v4003_v41 = vmul.f32 %v6476_v47, %v6464_v55 }
 0x890   : > { %v6480_v17 = vpop.eup %6479  ;;  %v4004_v42 = vmul.f32 %v6478_v7, %v6466_v43  ;;  %v4018_v39 = vrot.slane %v4002_v58, 6 }
 0x891   : > { %v6482_v5 = vpop.eup %6481  ;;  %v4005_v37 = vmul.f32 %v6480_v17, %v6468_v8  ;;  %v4019_v50 = vrot.slane %v4003_v41, 5 }
 0x892   : > { %v6484_v44 = vpop.eup %6483  ;;  %v4006_v36 = vmul.f32 %v6482_v5, %v6470_v30  ;;  %v4021_v3 = vrot.slane %v4004_v42, 4 }
 0x893   : > { %v6486_v38 = vpop.eup %6485  ;;  %v4020_v48 = vsel %vm1150_vm1, %v4019_v50, %v4018_v39  ;;  %v4023_v0 = vrot.slane %v4005_v37, 3 }
 0x894   : > { %v6488_v32 = vpop.eup %6487  ;;  %v4022_v63 = vsel %vm1153_vm2, %v4021_v3, %v4020_v48  ;;  %v4025_v31 = vrot.slane %v4006_v36, 2 }
 0x895   : > { %v6490_v34 = vpop.eup %6489  ;;  %v4007_v9 = vmul.f32 %v6488_v32, %v6484_v44  ;;  %v4024_v45 = vsel %vm1156_vm3, %v4023_v0, %v4022_v63 }
 0x896   : > { %v4008_v57 = vmul.f32 %v6490_v34, %v6486_v38  ;;  %v4026_v18 = vsel %vm1159_vm4, %v4025_v31, %v4024_v45  ;;  %v6492_v53 = vpop.eup %6491 }
 0x897   : > { %v4027_v55 = vrot.slane %v4007_v9, 1 }
 0x899   : > { %v6494_v43 = vpop.eup %6493  ;;  %v4028_v8 = vsel %vm1162_vm5, %v4027_v55, %v4026_v18 }
 0x89a   : > { %v4009_v30 = vmul.f32 %v6494_v43, %v6492_v53  ;;  %v4029_v62 = vsel %vm1165_vm6, %v4008_v57, %v4028_v8 }
 0x89c   : > { %v4030_v28 = vrot.slane %v4009_v30, 7 }
 0x89e   : > { %v4031_v49 = vsel %vm1168_vm7, %v4030_v28, %v4029_v62 }
 0x89f   : > { %4098 = vmatmul.mubr.f32.vlgmr.msra.gmra.mrb[30].mxu0 %v4031_v49  ;;  %4169 = vmatmul.mubr.f32.vlgmr.msra.gmra.mrb[30].mxu1 %v4031_v49 }
 0x972   : > { %v4099_v47 = vpop.f32.mrb[30].mxu0  ;;  %v8293_v58 = vpop.f32.mrb[30].mxu1 }
 0x973   : > { %v4179_v7 = vrot.slane %v4099_v47, 1  ;;  %v4183_v41 = vrot.slane %v4099_v47, 2  ;;  %v4187_v17 = vrot.slane %v4099_v47, 3  ;;  %v4191_v42 = vrot.slane %v4099_v47, 4  ;;  %v8295_v39 = vpop.f32.mrb[31].mxu0  ;;  %v8297_v5 = vpop.f32.mrb[31].mxu1 }
 0x974   : > { %v4195_v37 = vrot.slane %v4099_v47, 5  ;;  %v4199_v50 = vrot.slane %v4099_v47, 6  ;;  %v4203_v44 = vrot.slane %v4099_v47, 7  ;;  %v4267_v36 = vadd.f32 %v4099_v47, %v8887_v14 }
 0x975   : > { %v4239_v3 = vadd.f32 %v4179_v7, %v8881_v51  ;;  %v4243_v38 = vadd.f32 %v4183_v41, %v8882_v20  ;;  %v4247_v48 = vadd.f32 %v4187_v17, %v8883_v23  ;;  %v4251_v0 = vadd.f32 %v4191_v42, %v8884_v61 }
 0x976   : > { %v4255_v32 = vadd.f32 %v4195_v37, %v8885_v59  ;;  %v4259_v63 = vadd.f32 %v4199_v50, %v8886_v27  ;;  %v4922_v31 = vmul.f32 -1.442695, %v4267_v36  ;;  %v4263_v34 = vadd.f32 %v4203_v44, %v8848_v11 }
 0x977   : > { %v4915_v9 = vmul.f32 -1.442695, %v4239_v3  ;;  %v4916_v45 = vmul.f32 -1.442695, %v4243_v38  ;;  %v4917_v57 = vmul.f32 -1.442695, %v4247_v48 }
 0x978   : > { %v4918_v18 = vmul.f32 -1.442695, %v4251_v0  ;;  %6495 = vpow2.f32 %v4922_v31  ;;  %v4919_v51 = vmul.f32 -1.442695, %v4255_v32  ;;  %v4181_v20 = vrot.slane %v8293_v58, 1 }
 0x979   : > { %6497 = vpow2.f32 %v4915_v9  ;;  %v4185_v23 = vrot.slane %v8293_v58, 2  ;;  %v4920_v61 = vmul.f32 -1.442695, %v4259_v63  ;;  %v4189_v59 = vrot.slane %v8293_v58, 3  ;;  %v8904_v9 = vld [vmem:[#allocation53_spill] sm:$0xff] }
 0x97a   : > { %6499 = vpow2.f32 %v4916_v45  ;;  %v4921_v27 = vmul.f32 -1.442695, %v4263_v34  ;;  %v4193_v14 = vrot.slane %v8293_v58, 4  ;;  %v4197_v11 = vrot.slane %v8293_v58, 5 }
 0x97b   : > { %6501 = vpow2.f32 %v4917_v57  ;;  %v4241_v53 = vadd.f32 %v4181_v20, %v8888_v40  ;;  %v4245_v55 = vadd.f32 %v4185_v23, %v8889_v15  ;;  %v4249_v43 = vadd.f32 %v4189_v59, %v8890_v54 }
 0x97c   : > { %6503 = vpow2.f32 %v4918_v18  ;;  %v4253_v8 = vadd.f32 %v4193_v14, %v8891_v21  ;;  %v4257_v30 = vadd.f32 %v4197_v11, %v8892_v4  ;;  %v4201_v28 = vrot.slane %v8293_v58, 6  ;;  %v8908_v11 = vld [vmem:[#allocation56_spill] sm:$0xff] }
 0x97d   : > { %6505 = vpow2.f32 %v4919_v51  ;;  %v4205_v40 = vrot.slane %v8293_v58, 7  ;;  %v4180_v54 = vrot.slane %v8295_v39, 1  ;;  %v4184_v4 = vrot.slane %v8295_v39, 2  ;;  %v8905_v51 = vld [vmem:[#allocation54_spill] sm:$0xff] }
 0x97e   : > { %6507 = vpow2.f32 %v4920_v61  ;;  %v4261_v37 = vadd.f32 %v4201_v28, %v8893_v46  ;;  %v4188_v50 = vrot.slane %v8295_v39, 3  ;;  %v4192_v38 = vrot.slane %v8295_v39, 4  ;;  %v8906_v61 = vld [vmem:[#allocation61_spill] sm:$0xff] }
 0x97f   : > { %6509 = vpow2.f32 %v4921_v27  ;;  %v4265_v3 = vadd.f32 %v4205_v40, %v8896_v29  ;;  %v4196_v32 = vrot.slane %v8295_v39, 5  ;;  %v4240_v63 = vadd.f32 %v4180_v54, %v8894_v33  ;;  %v8907_v33 = vld [vmem:[#allocation55_spill] sm:$0xff]  ;;  %v8910_v40 = vld [vmem:[#allocation60_spill] sm:$0xff] }
 0x980   : > { %6511 = vtanh.f32 %v4241_v53  ;;  %v4200_v46 = vrot.slane %v8295_v39, 6  ;;  %v4244_v45 = vadd.f32 %v4184_v4, %v8904_v9  ;;  %v4204_v29 = vrot.slane %v8295_v39, 7 }
 0x981   : > { %6513 = vtanh.f32 %v4245_v55  ;;  %v4248_v20 = vadd.f32 %v4188_v50, %v8905_v51  ;;  %v4269_v59 = vadd.f32 %v8293_v58, %v8906_v61  ;;  %v4252_v27 = vadd.f32 %v4192_v38, %v8907_v33 }
 0x982   : > { %v6496_v62 = vpop.eup %6495  ;;  %6515 = vtanh.f32 %v4249_v43  ;;  %v4256_v53 = vadd.f32 %v4196_v32, %v8908_v11  ;;  %v4923_v55 = vmul.f32 -1.442695, %v4240_v63  ;;  %v4182_v43 = vrot.slane %v8297_v5, 1 }
 0x983   : > { %v6498_v49 = vpop.eup %6497  ;;  %v4302_v47 = vadd.f32 1.0, %v6496_v62  ;;  %6517 = vtanh.f32 %v4253_v8  ;;  %v4924_v28 = vmul.f32 -1.442695, %v4244_v45  ;;  %v4264_v58 = vadd.f32 %v4204_v29, %v8910_v40 }
 0x984   : > { %v6500_v15 = vpop.eup %6499  ;;  %v4295_v7 = vadd.f32 1.0, %v6498_v49  ;;  %6519 = vtanh.f32 %v4257_v30  ;;  %v8909_v30 = vld [vmem:[#allocation59_spill] sm:$0xff]  ;;  %v4186_v49 = vrot.slane %v8297_v5, 2  ;;  %v4926_v4 = vmul.f32 -1.442695, %v4252_v27 }
 0x985   : > { %v6502_v41 = vpop.eup %6501  ;;  %v4296_v21 = vadd.f32 1.0, %v6500_v15  ;;  %6521 = vrcp.f32 %v4302_v47  ;;  %v4260_v62 = vadd.f32 %v4200_v46, %v8909_v30  ;;  %v4925_v15 = vmul.f32 -1.442695, %v4248_v20 }
 0x986   : > { %v6504_v17 = vpop.eup %6503  ;;  %v4297_v42 = vadd.f32 1.0, %v6502_v41  ;;  %6523 = vrcp.f32 %v4295_v7  ;;  %v4190_v7 = vrot.slane %v8297_v5, 3  ;;  %v8911_v41 = vld [vmem:[#allocation62_spill] sm:$0xff]  ;;  %v4198_v50 = vrot.slane %v8297_v5, 5 }
 0x987   : > { %v6506_v44 = vpop.eup %6505  ;;  %v4298_v36 = vadd.f32 1.0, %v6504_v17  ;;  %6525 = vrcp.f32 %v4296_v21  ;;  %v4268_v21 = vadd.f32 %v8295_v39, %v8911_v41  ;;  %v4194_v17 = vrot.slane %v8297_v5, 4 }
 0x988   : > { %v6508_v48 = vpop.eup %6507  ;;  %v4299_v0 = vadd.f32 1.0, %v6506_v44  ;;  %6527 = vrcp.f32 %v4297_v42  ;;  %v4242_v44 = vadd.f32 %v4182_v43, %v8745_v16  ;;  %v4928_v38 = vmul.f32 -1.442695, %v4260_v62 }
 0x989   : > { %v6510_v31 = vpop.eup %6509  ;;  %v4300_v34 = vadd.f32 1.0, %v6508_v48  ;;  %6529 = vrcp.f32 %v4298_v36  ;;  %v4246_v48 = vadd.f32 %v4186_v49, %v7183_v25  ;;  %v4929_v39 = vmul.f32 -1.442695, %v4264_v58 }
 0x98a   : > { %v6512_v57 = vpop.eup %6511  ;;  %v4301_v18 = vadd.f32 1.0, %v6510_v31  ;;  %6531 = vrcp.f32 %v4299_v0  ;;  %v4250_v63 = vadd.f32 %v4190_v7, %v7192_v35  ;;  %v4930_v46 = vmul.f32 -1.442695, %v4268_v21 }
 0x98b   : > { %v6514_v23 = vpop.eup %6513  ;;  %6533 = vrcp.f32 %v4300_v34  ;;  %v4254_v16 = vadd.f32 %v4194_v17, %v7201_v22  ;;  %v4258_v25 = vadd.f32 %v4198_v50, %v7215_v19  ;;  %v4932_v51 = vmul.f32 -1.442695, %v4246_v48 }
 0x98c   : > { %v6516_v14 = vpop.eup %6515  ;;  %6535 = vrcp.f32 %v4301_v18  ;;  %v4933_v20 = vmul.f32 -1.442695, %v4250_v63  ;;  %v4202_v19 = vrot.slane %v8297_v5, 6  ;;  %v4270_v41 = vadd.f32 %v8297_v5, %v7298_v26 }
 0x98d   : > { %v6518_v8 = vpop.eup %6517  ;;  %6537 = vtanh.f32 %v4261_v37  ;;  %v4927_v37 = vmul.f32 -1.442695, %v4256_v53  ;;  %v4934_v61 = vmul.f32 -1.442695, %v4254_v16  ;;  %v4935_v33 = vmul.f32 -1.442695, %v4258_v25 }
 0x98e   : > { %v6520_v47 = vpop.eup %6519  ;;  %6539 = vtanh.f32 %v4265_v3  ;;  %v4434_v25 = vrot.slane %v8264_v52, 7  ;;  %v4438_v52 = vrot.slane %v8280_v10, 7 }
 0x98f   : > { %v6522_v54 = vpop.eup %6521  ;;  %6541 = vtanh.f32 %v4269_v59 }
 0x990   : > { %v6524_v42 = vpop.eup %6523  ;;  %6543 = vpow2.f32 %v4923_v55  ;;  %v4206_v55 = vrot.slane %v8297_v5, 7 }
 0x991   : > { %v6526_v36 = vpop.eup %6525  ;;  %v8345_v3 = vmul.f32 %v6524_v42, %v6512_v57  ;;  %6545 = vpow2.f32 %v4924_v28  ;;  %v4931_v57 = vmul.f32 -1.442695, %v4242_v44 }
 0x992   : > { %v6528_v0 = vpop.eup %6527  ;;  %v8348_v32 = vmul.f32 %v6526_v36, %v6514_v23  ;;  %6547 = vpow2.f32 %v4925_v15  ;;  %v4266_v15 = vadd.f32 %v4206_v55, %v7289_v12  ;;  %v4938_v12 = vmul.f32 -1.442695, %v4270_v41 }
 0x993   : > { %v6530_v31 = vpop.eup %6529  ;;  %v8351_v34 = vmul.f32 %v6528_v0, %v6516_v14  ;;  %6549 = vpow2.f32 %v4926_v4 }
 0x994   : > { %v6532_v9 = vpop.eup %6531  ;;  %v8354_v45 = vmul.f32 %v6530_v31, %v6518_v8  ;;  %6551 = vpow2.f32 %v4927_v37  ;;  %v4937_v44 = vmul.f32 -1.442695, %v4266_v15 }
 0x995   : > { %v6534_v18 = vpop.eup %6533  ;;  %v8357_v29 = vmul.f32 %v6532_v9, %v6520_v47  ;;  %6553 = vpow2.f32 %v4928_v38  ;;  %v4262_v47 = vadd.f32 %v4202_v19, %v7282_v6 }
 0x996   : > { %v6536_v35 = vpop.eup %6535  ;;  %6555 = vpow2.f32 %v4929_v39  ;;  %v4431_v39 = vrot.slane %v8252_v1, 7 }
 0x997   : > { %v6538_v23 = vpop.eup %6537  ;;  %6557 = vpow2.f32 %v4930_v46  ;;  %v4936_v37 = vmul.f32 -1.442695, %v4262_v47  ;;  %v4432_v46 = vrot.slane %v8256_v24, 7 }
 0x998   : > { %v6540_v59 = vpop.eup %6539  ;;  %v8359_v22 = vmul.f32 %v6538_v23, %v6534_v18  ;;  %6559 = vpow2.f32 %v4931_v57  ;;  %v4433_v57 = vrot.slane %v8260_v13, 7 }
 0x999   : > { %v6542_v27 = vpop.eup %6541  ;;  %v8361_v14 = vmul.f32 %v6540_v59, %v6536_v35  ;;  %6561 = vpow2.f32 %v4932_v51  ;;  %v4435_v35 = vrot.slane %v8268_v60, 7 }
 0x99a   : > { %v6544_v11 = vpop.eup %6543  ;;  %v8364_v53 = vmul.f32 %v6542_v27, %v6522_v54  ;;  %6563 = vpow2.f32 %v4933_v20  ;;  %v4436_v20 = vrot.slane %v8272_v56, 7 }
 0x99b   : > { %v6546_v43 = vpop.eup %6545  ;;  %v4343_v8 = vadd.f32 1.0, %v6544_v11  ;;  %6565 = vpow2.f32 %v4934_v61  ;;  %v4437_v61 = vrot.slane %v8276_v2, 7 }
 0x99c   : > { %v6548_v30 = vpop.eup %6547  ;;  %v4344_v62 = vadd.f32 1.0, %v6546_v43  ;;  %6567 = vpow2.f32 %v4935_v33 }
 0x99d   : > { %v6550_v28 = vpop.eup %6549  ;;  %v4345_v49 = vadd.f32 1.0, %v6548_v30  ;;  %6569 = vrcp.f32 %v4343_v8 }
 0x99e   : > { %v6552_v40 = vpop.eup %6551  ;;  %v4346_v58 = vadd.f32 1.0, %v6550_v28  ;;  %6571 = vrcp.f32 %v4344_v62 }
 0x99f   : > { %v6554_v7 = vpop.eup %6553  ;;  %v4347_v54 = vadd.f32 1.0, %v6552_v40  ;;  %6573 = vrcp.f32 %v4345_v49 }
 0x9a0   : > { %v6556_v21 = vpop.eup %6555  ;;  %v4348_v4 = vadd.f32 1.0, %v6554_v7  ;;  %6575 = vrcp.f32 %v4346_v58 }
 0x9a1   : > { %v6558_v17 = vpop.eup %6557  ;;  %v4349_v42 = vadd.f32 1.0, %v6556_v21  ;;  %6577 = vrcp.f32 %v4347_v54 }
 0x9a2   : > { %v6560_v50 = vpop.eup %6559  ;;  %v4350_v6 = vadd.f32 1.0, %v6558_v17  ;;  %6579 = vrcp.f32 %v4348_v4 }
 0x9a3   : > { %v6562_v36 = vpop.eup %6561  ;;  %6581 = vrcp.f32 %v4349_v42  ;;  %v4399_v48 = vadd.f32 1.0, %v6560_v50 }
 0x9a4   : > { %v6564_v38 = vpop.eup %6563  ;;  %6583 = vrcp.f32 %v4350_v6  ;;  %v4400_v26 = vadd.f32 1.0, %v6562_v36 }
 0x9a5   : > { %v6566_v0 = vpop.eup %6565  ;;  %6585 = vpow2.f32 %v4936_v37  ;;  %v4401_v63 = vadd.f32 1.0, %v6564_v38 }
 0x9a6   : > { %v6568_v5 = vpop.eup %6567  ;;  %6587 = vpow2.f32 %v4937_v44  ;;  %v4402_v16 = vadd.f32 1.0, %v6566_v0 }
 0x9a7   : > { %v6570_v31 = vpop.eup %6569  ;;  %6589 = vpow2.f32 %v4938_v12  ;;  %v4403_v11 = vadd.f32 1.0, %v6568_v5 }
 0x9a8   : > { %v6572_v9 = vpop.eup %6571  ;;  %v4447_v18 = vmul.f32 %v6570_v31, %v4431_v39  ;;  %6591 = vrcp.f32 %v4399_v48 }
 0x9a9   : > { %v6574_v51 = vpop.eup %6573  ;;  %v4448_v1 = vmul.f32 %v6572_v9, %v4432_v46  ;;  %6593 = vrcp.f32 %v4400_v26 }
 0x9aa   : > { %v6576_v23 = vpop.eup %6575  ;;  %v4449_v24 = vmul.f32 %v6574_v51, %v4433_v57  ;;  %v4463_v59 = vadd.f32 %v8345_v3, %v4447_v18  ;;  %6595 = vrcp.f32 %v4401_v63 }
 0x9ab   : > { %v6578_v33 = vpop.eup %6577  ;;  %v4450_v13 = vmul.f32 %v6576_v23, %v4434_v25  ;;  %v4464_v27 = vadd.f32 %v8348_v32, %v4448_v1  ;;  %6597 = vrcp.f32 %v4402_v16 }
 0x9ac   : > { %v6580_v19 = vpop.eup %6579  ;;  %v4451_v60 = vmul.f32 %v6578_v33, %v4435_v35  ;;  %v4465_v56 = vadd.f32 %v8351_v34, %v4449_v24  ;;  %6599 = vtanh.f32 %v4463_v59  ;;  %4535 = vst [vmem:[#allocation3 - $0x7] sm:$0x80] %v4463_v59 }
 0x9ad   : > { %v6582_v55 = vpop.eup %6581  ;;  %v4452_v2 = vmul.f32 %v6580_v19, %v4436_v20  ;;  %v4466_v43 = vadd.f32 %v8354_v45, %v4450_v13  ;;  %6601 = vtanh.f32 %v4464_v27  ;;  %v4520_v3 = vrot.slane %v4464_v27, 7 }
 0x9ae   : > { %v6584_v8 = vpop.eup %6583  ;;  %v4453_v30 = vmul.f32 %v6582_v55, %v4437_v61  ;;  %v4467_v10 = vadd.f32 %v8357_v29, %v4451_v60  ;;  %6603 = vtanh.f32 %v4465_v56  ;;  %v4521_v32 = vrot.slane %v4465_v56, 6 }
 0x9af   : > { %v6586_v62 = vpop.eup %6585  ;;  %v4454_v28 = vmul.f32 %v6584_v8, %v4438_v52  ;;  %v4468_v49 = vadd.f32 %v8359_v22, %v4452_v2  ;;  %6605 = vtanh.f32 %v4466_v43  ;;  %v4523_v34 = vrot.slane %v4466_v43, 5  ;;  %v4542_v43 = vld [vmem:[%s8498_s4] sm:$0xff] (!%p4939_p10)  ;;  %v4544_v8 = vld [vmem:[%s8498_s4 + $0x10] sm:$0xff] (!%p4939_p10) }
 0x9b0   : > { %v6588_v47 = vpop.eup %6587  ;;  %v4469_v40 = vadd.f32 %v8361_v14, %v4453_v30  ;;  %6607 = vtanh.f32 %v4467_v10  ;;  %v4522_v45 = vsel %vm1150_vm1, %v4521_v32, %v4520_v3  ;;  %v4525_v58 = vrot.slane %v4467_v10, 4  ;;  %v4543_v3 = vld [vmem:[%s8498_s4 + $0x8] sm:$0xff] (!%p4939_p10)  ;;  %v4545_v32 = vld [vmem:[%s8498_s4 + $0x18] sm:$0xff] (!%p4939_p10) }
 0x9b1   : > { %v6590_v15 = vpop.eup %6589  ;;  %v4470_v7 = vadd.f32 %v8364_v53, %v4454_v28  ;;  %6609 = vtanh.f32 %v4468_v49  ;;  %v4524_v29 = vsel %vm1153_vm2, %v4523_v34, %v4522_v45  ;;  %v4527_v54 = vrot.slane %v4468_v49, 3  ;;  %v4546_v49 = vld [vmem:[%s8498_s4 + $0x20] sm:$0xff] (!%p4939_p10)  ;;  %v4547_v34 = vld [vmem:[%s8498_s4 + $0x28] sm:$0xff] (!%p4939_p10)  ;;  %v4549_v45 = vld [vmem:[%s8498_s4 + $0x38] sm:$0xff] (!%p4939_p10) }
 0x9b2   : > { %v6592_v41 = vpop.eup %6591  ;;  %6611 = vtanh.f32 %v4469_v40  ;;  %v4526_v22 = vsel %vm1156_vm3, %v4525_v58, %v4524_v29  ;;  %v4529_v21 = vrot.slane %v4469_v40, 2  ;;  %v4404_v4 = vadd.f32 1.0, %v6586_v62  ;;  %v4548_v40 = vld [vmem:[%s8498_s4 + $0x30] sm:$0xff] (!%p4939_p10) }
 0x9b3   : > { %v6594_v17 = vpop.eup %6593  ;;  %6613 = vtanh.f32 %v4470_v7  ;;  %v4528_v14 = vsel %vm1159_vm4, %v4527_v54, %v4526_v22  ;;  %v4531_v42 = vrot.slane %v4470_v7, 1  ;;  %v4405_v37 = vadd.f32 1.0, %v6588_v47  ;;  %v4551_v7 = vld [vmem:[%s8498_s4 + $0x48] sm:$0xff] (!%p4939_p10)  ;;  %v4552_v54 = vld [vmem:[%s8498_s4 + $0x50] sm:$0xff] (!%p4939_p10) }
 0x9b4   : > { %v6596_v50 = vpop.eup %6595  ;;  %v4530_v6 = vsel %vm1162_vm5, %v4529_v21, %v4528_v14  ;;  %v4406_v53 = vadd.f32 1.0, %v6590_v15  ;;  %6615 = vrcp.f32 %v4403_v11  ;;  %v6734_v30 = vmov (!%p4939_p10), 0.0|0.0   ;;  %v4550_v15 = vld [vmem:[%s8498_s4 + $0x40] sm:$0xff] (!%p4939_p10)  ;;  %v4556_v14 = vld [vmem:[%s8498_s4 + $0x70] sm:$0xff] (!%p4939_p10) }
 0x9b5   : > { %v6598_v44 = vpop.eup %6597  ;;  %v4532_v36 = vsel %vm1165_vm6, %v4531_v42, %v4530_v6  ;;  %6617 = vrcp.f32 %v4404_v4  ;;  %5510 = vmatprep.subr.bf16.mxu0 (!%p4939_p10), %v6734_v30  ;;  %v5511_v10 = vpack.c.bf16 (!%p4939_p10), %v4543_v3, %v4542_v43  ;;  %v6736_v62 = vmov (!%p4939_p10), 0.0   ;;  %v4554_v21 = vld [vmem:[%s8498_s4 + $0x60] sm:$0xff] (!%p4939_p10)  ;;  %v4555_v4 = vld [vmem:[%s8498_s4 + $0x68] sm:$0xff] (!%p4939_p10)  ;;  %v4557_v42 = vld [vmem:[%s8498_s4 + $0x78] sm:$0xff] (!%p4939_p10) }
 0x9b6   : > { %v6600_v12 = vpop.eup %6599  ;;  %4536 = vst [vmem:[#allocation3 + $0x1] sm:$0x7f] %v4532_v36  ;;  %6619 = vrcp.f32 %v4405_v37  ;;  %4995 = vmatprep.mubr.msk.f32.mxu0 (!%p4939_p10), %vm6735_vm8, %v6736_v62  ;;  %v5514_v28 = vpack.c.bf16 (!%p4939_p10), %v4545_v32, %v4544_v8  ;;  %v5517_v47 = vpack.c.bf16 (!%p4939_p10), %v4547_v34, %v4546_v49  ;;  %v5520_v58 = vpack.c.bf16 (!%p4939_p10), %v4549_v45, %v4548_v40  ;;  %v4940_v6 = vld [vmem:[%s8499_s5] ss:$0 sm:$0xff] (!%p4939_p10) }
 0x9b7   : > { %v6602_v38 = vpop.eup %6601  ;;  %6621 = vrcp.f32 %v4406_v53  ;;  %v4479_v48 = vmul.f32 %v6600_v12, %v6592_v41  ;;  %5512 = vmatpush3.bf16.msra.mxu0 (!%p4939_p10), %v5511_v10  ;;  %v5523_v29 = vpack.c.bf16 (!%p4939_p10), %v4551_v7, %v4550_v15  ;;  %v4553_v41 = vld [vmem:[%s8498_s4 + $0x58] sm:$0xff] (!%p4939_p10)  ;;  %v5532_v37 = vpack.c.bf16 (!%p4939_p10), %v4557_v42, %v4556_v14 }
 0x9b8   : > { %v6604_v0 = vpop.eup %6603  ;;  %v4480_v26 = vmul.f32 %v6602_v38, %v6594_v17  ;;  %5513 = vmatprep.subr.bf16.mxu0 (!%p4939_p10), %v6734_v30  ;;  %v5526_v22 = vpack.c.bf16 (!%p4939_p10), %v4553_v41, %v4552_v54  ;;  %v5529_v17 = vpack.c.bf16 (!%p4939_p10), %v4555_v4, %v4554_v21 }
 0x9b9   : > { %v6606_v5 = vpop.eup %6605  ;;  %v4481_v39 = vmul.f32 %v6604_v0, %v6596_v50  ;;  %4510 = vst [vmem:[#allocation2 - $0x7] sm:$0x80] %v4479_v48 }
 0x9ba   : > { %v6608_v63 = vpop.eup %6607  ;;  %v4482_v31 = vmul.f32 %v6606_v5, %v6598_v44  ;;  %v4495_v46 = vrot.slane %v4480_v26, 7 }
 0x9bb   : > { %v6610_v16 = vpop.eup %6609  ;;  %v4496_v9 = vrot.slane %v4481_v39, 6  ;;  %5515 = vmatpush3.bf16.msra.mxu0 (!%p4939_p10), %v5514_v28 }
 0x9bc   : > { %v6612_v25 = vpop.eup %6611  ;;  %v4498_v57 = vrot.slane %v4482_v31, 5  ;;  %5516 = vmatprep.subr.bf16.mxu0 (!%p4939_p10), %v6734_v30 }
 0x9bd   : > { %v6614_v18 = vpop.eup %6613  ;;  %v4497_v51 = vsel %vm1150_vm1, %v4496_v9, %v4495_v46 }
 0x9be   : > { %v6616_v35 = vpop.eup %6615  ;;  %v4499_v20 = vsel %vm1153_vm2, %v4498_v57, %v4497_v51 }
 0x9bf   : > { %v6618_v1 = vpop.eup %6617  ;;  %v4483_v23 = vmul.f32 %v6616_v35, %v6608_v63  ;;  %5518 = vmatpush3.bf16.msra.mxu0 (!%p4939_p10), %v5517_v47 }
 0x9c0   : > { %v6620_v61 = vpop.eup %6619  ;;  %v4484_v24 = vmul.f32 %v6618_v1, %v6610_v16  ;;  %5519 = vmatprep.subr.bf16.mxu0 (!%p4939_p10), %v6734_v30 }
 0x9c1   : > { %v6622_v59 = vpop.eup %6621  ;;  %v4485_v33 = vmul.f32 %v6620_v61, %v6612_v25  ;;  %v4500_v52 = vrot.slane %v4483_v23, 4  ;;  %4540 = sbr.rel (%p4939_p10) target bundleno = 2759 (0xac7), region = 94 }
 0x9c2   : > { %v4486_v13 = vmul.f32 %v6622_v59, %v6614_v18  ;;  %v4502_v27 = vrot.slane %v4484_v24, 3 }
 0x9c3   : > { %v4501_v19 = vsel %vm1156_vm3, %v4500_v52, %v4499_v20  ;;  %v4504_v60 = vrot.slane %v4485_v33, 2  ;;  %5521 = vmatpush3.bf16.msra.mxu0 (!%p4939_p10), %v5520_v58 }
 0x9c4   : > { %v4503_v56 = vsel %vm1159_vm4, %v4502_v27, %v4501_v19  ;;  %v4506_v11 = vrot.slane %v4486_v13, 1  ;;  %5522 = vmatprep.subr.bf16.mxu0 (!%p4939_p10), %v6734_v30 }
 0x9c5   : > { %v4505_v55 = vsel %vm1162_vm5, %v4504_v60, %v4503_v56 }
 0x9c6   : > { %v4507_v2 = vsel %vm1165_vm6, %v4506_v11, %v4505_v55 }
 0x9c7   : > { %4511 = vst [vmem:[#allocation2 + $0x1] sm:$0x7f] %v4507_v2  ;;  %5524 = vmatpush3.bf16.msra.mxu0 (!%p4939_p10), %v5523_v29 }
 0x9c8   : > { %5525 = vmatprep.subr.bf16.mxu0 %v6734_v30 }
 0x9cb   : > { %5527 = vmatpush3.bf16.msra.mxu0 %v5526_v22 }
 0x9cc   : > { %5528 = vmatprep.subr.bf16.mxu0 %v6734_v30 }
 0x9ce   : > { %v4541_v50 = vld [vmem:[#allocation2] sm:$0xff] }
 0x9cf   : > { %5530 = vmatpush3.bf16.msra.mxu0 %v5529_v17 }
 0x9d0   : > { %5531 = vmatprep.subr.bf16.mxu0 %v6734_v30 }
 0x9d3   : > { %5533 = vmatpush3.bf16.msra.mxu0 %v5532_v37 }
 0x9d6   : > { %4996 = vmatmul.mubr.f32.vlgmr.msra.gmra.mrb[0].mxu0 %v4541_v50 }
 0xaa9   : > { %v4631_v53 = vpop.f32.mrb[0].mxu0 }
 0xaaa   : > { %v4632_v44 = vadd.f32 %v4940_v6, %v4631_v53  ;;  %v4997_v36 = vpop.f32.mrb[1].mxu0 }
 0xaac   : > { %v4941_v12 = vmul.f32 -1.442695, %v4632_v44 }
 0xaae   : > { %6623 = vpow2.f32 %v4941_v12 }
 0xab8   : > { %v6624_v38 = vpop.eup %6623 }
 0xab9   : > { %v4638_v48 = vadd.f32 1.0, %v6624_v38 }
 0xabb   : > { %6625 = vrcp.f32 %v4638_v48 }
 0xac5   : > { %v6626_v0 = vpop.eup %6625 }
 0xac6   : > { %4641 = vst [vmem:[#allocation8] sm:$0xff] %v6626_v0 }
 0xac7 PF: > { %p8453_p12 = scmp.eq.s32.totalorder %s4721_s26, 3  ;;  %s6737_s16 = smov [#allocation8]  }
 0xac8   : > { %s4651_s17 = sshll.u32 %s6737_s16, 4  ;;  %s4652_s17 = int_to_ptr.vmem [resolvable:$true] %s4651_s17 }
 0xac9   : > { %s6655_s18 = scalar_lea.vmem %s4652_s17, 128  ;;  %p6662_p4 = scmp.lt.s32.totalorder %s4652_s17, %s4652_s17 }
 0xaca   : > { %p6656_p0 = scmp.ne.s32.totalorder %s4652_s17, %s6655_s18  ;;  %p6663_p5 = scmp.lt.s32.totalorder %s6655_s18, %s6655_s18 }
 0xacc   : > { %p6657_p1 = pnand %p6656_p0, %p8453_p12  ;;  %p6664_p6 = por %p6663_p5, %p6662_p4 }
 0xace   : > { %p6658_p2 = pneg %p6657_p1 }
 0xad0   : > { %p6665_p9 = pnand %p6664_p6, %p6658_p2 }
 0xad2   : > { %6668 = shalt.err (!%p6665_p9)
}
 0xad3   : > { %s6669_s26 = scalar_lea.hbm %s8500_s6, 128 }
 0xad4   : > { %p6670_p11 = scmp.ne.s32.totalorder %s8500_s6, %s6669_s26  ;;  %p6675_p7 = scmp.lt.u32.totalorder %s6669_s26, %s8500_s6 }
 0xad6   : > { %p6671_p13 = pnand %p6670_p11, %p8453_p12 }
 0xad8   : > { %p6672_p3 = pneg %p6671_p13 }
 0xada   : > { %p6677_p8 = pnand %p6675_p7, %p6672_p3 }
 0xadc   : > { %6680 = shalt.err (!%p6677_p8)
}
 0xadd   : > { %5539 = dma.vmem_to_hbm [thread:$0]  (%p8453_p12), %s4652_s17, 128, %s8500_s6, [#allocation7]  }
 0xade   : > { %6706 = dma.done.wait (%p8453_p12), [#allocation7], 128  }
 0xadf   : > { %6708 = vsyncadd (%p8453_p12), [#allocation7], 4294967168 }
 0xae0 PF: > { %s18_s25 = sadd.s32 1, %s6727_s25   ;;  %s8913_s21 = smov %s6715_s22 }
 0xae1   : > { %p15_p10 = scmp.ge.s32.totalorder %s18_s25, 6   ;;  %s8914_s22 = smov %s6825_s9 }
 0xae2   : > { %s8915_s23 = smov %s6723_s24  ;;  %s8916_s24 = smov %s8918_s27 }
 0xae3   :  { %17 = sbr.rel (!%p15_p10) target bundleno = 4 (0x4), region = 128 }
 0xaea   :  { %4664 = vsyncpa [#allocation6], 1 }
 0xaeb   :  { %4666 = vsyncpa [#allocation6 + $0x1], 1 }
 0xaec   :  { %4667 = vsyncpa [#allocation7], 1 }
 0xaed   :  { %4669 = vsyncpa [#allocation7 + $0x1], 1 }

</bundles_post_ra>
